<compile_context>
chip_gen: v7x
topology: tpu7x:2x2x1
jax: 0.10.0
libtpu: 0.0.40
codegen_flags: <defaults>
</compile_context>

<pallas_src>
import jax
import jax.numpy as jnp
from jax.experimental import pallas as pl
from jax.experimental.pallas import tpu as pltpu


def resblock_forward(x_nchw, params, compute_dtype=jnp.float32, images_per_step=None):
    """Fused Pallas ResBlock forward.  x_nchw: (B, Cin, H, W) -> (B, Cout, Ho, Wo)."""
    B, Cin, H, W = x_nchw.shape
    w1, b1 = params["w1"], params["b1"]   # (Cout, Cin, 1, 1), (Cout,)
    w2, b2 = params["w2"], params["b2"]   # (Cmid, Cin, 3, 3), (Cmid,)
    w3, b3 = params["w3"], params["b3"]   # (Cout, Cmid, 3, 3), (Cout,)
    Cout, Cmid = w1.shape[0], w2.shape[0]
    Cq = Cmid + Cout                      # conv2 lanes + shortcut lanes

    Wp = W + 2                            # padded row pitch
    PP = (H + 2) * Wp                     # flattened padded image length
    PP8 = ((PP + 7) // 8) * 8             # per-image pitch rounded to a sublane multiple (even)
    half = PP8 // 2
    Ho, Wo = (H + 1) // 2, (W + 1) // 2   # stride-2 output size (matches both branches)
    Npos = H * Wp - 2                     # stage-1 rows per image (incl. row-wrap garbage)
    Nb = (Ho - 1) * Wp + Wo               # stage-2 rows per image (incl. row-wrap garbage)

    # --- images per grid step: amortize ~0.35us/step, but keep >=2 steps for v7x's 2 TCs.
    if images_per_step is None:
        images_per_step = 1
        for d in range(B // 2, 0, -1):
            if B % d == 0:
                images_per_step = d
                break
    Bblk = images_per_step
    assert B % Bblk == 0, "images_per_step must divide the batch"
    G = B // Bblk
    Npos_blk = (Bblk - 1) * PP8 + Npos    # stage-1 slab rows per step
    Nb_blk = (Bblk - 1) * half + Nb       # stage-2 slab rows per step
    KC1, KC2 = 9 * Cin, 9 * Cq            # folded-K sizes

    # ------------- JAX-side glue: layout only (pad / flatten / repack weights) -------------
    x_nhwc = jnp.transpose(x_nchw, (0, 2, 3, 1))
    xp = jnp.pad(x_nhwc, ((0, 0), (1, 1), (1, 1), (0, 0))).reshape(B, PP, Cin)
    xp = jnp.pad(xp, ((0, 0), (0, PP8 - PP), (0, 0)))
    xp = xp.reshape(B * PP8, Cin).astype(compute_dtype)

    # conv2 taps folded into K (9*Cin); the 1x1 shortcut rides on extra output lanes of the
    # centre tap (rows 4*Cin:5*Cin).
    w2t = jnp.transpose(w2, (2, 3, 1, 0)).reshape(KC1, Cmid)
    w1m = w1.reshape(Cout, Cin).T
    w2sc = jnp.zeros((KC1, Cout), w2.dtype).at[4 * Cin:5 * Cin].set(w1m)
    w2k = jnp.concatenate([w2t, w2sc], axis=1).astype(compute_dtype)        # (9*Cin, Cq)

    # conv3 taps folded into K (9*Cq); identity on the shortcut lanes of the centre tap.
    w3t = jnp.transpose(w3, (2, 3, 1, 0)).reshape(9, Cmid, Cout)
    w3sc = jnp.zeros((9, Cout, Cout), w3.dtype).at[4].set(jnp.eye(Cout, dtype=w3.dtype))
    w3k = jnp.concatenate([w3t, w3sc], axis=1).reshape(KC2, Cout).astype(compute_dtype)

    b2k = jnp.concatenate([b2, jnp.zeros((Cout,), b2.dtype)]
                          ).reshape(1, Cq).astype(jnp.float32)
    b31 = (b3 + b1).reshape(1, Cout).astype(jnp.float32)

    stage_input = compute_dtype != jnp.float32   # bf16: one f32 staging cast (not per tap)
    mm_dtype = compute_dtype

    def kernel(xp_ref, w2k_ref, b2_ref, w3k_ref, b31_ref, o_ref, yp_ref, *xf):
        if stage_input:
            xf_ref = xf[0]
            xf_ref[...] = xp_ref[...].astype(jnp.float32)   # single cast for tap slicing
            src = xf_ref
        else:
            src = xp_ref                                    # f32: read taps directly

        # conv3 zero padding: only the border rows; the interior is overwritten below.
        yp_ref[pl.ds(0, Wp + 1), :] = jnp.zeros((Wp + 1, Cq), jnp.float32)
        tail = Wp + 1 + Npos_blk
        yp_ref[pl.ds(tail, Bblk * PP8 - tail), :] = jnp.zeros(
            (Bblk * PP8 - tail, Cq), jnp.float32)

        # ---- stage 1: conv2 (3x3,s=1,p=1) + ReLU, shortcut lanes folded in; ONE matmul ----
        x_cat = jnp.concatenate(
            [src[pl.ds(kh * Wp + kw, Npos_blk), :] for kh in range(3) for kw in range(3)],
            axis=-1)                                                     # (Npos_blk, 9*Cin)
        acc1 = jnp.dot(x_cat.astype(mm_dtype), w2k_ref[...],
                       preferred_element_type=jnp.float32) + b2_ref[...]
        lane = jax.lax.broadcasted_iota(jnp.int32, (1, Cq), 1)
        acc1 = jnp.where(lane < Cmid, jnp.maximum(acc1, 0.0), acc1)      # ReLU conv2 lanes only
        row = jax.lax.broadcasted_iota(jnp.int32, (Npos_blk, 1), 0)
        lo = (row + (Wp + 1)) % PP8                                      # offset inside image slab
        p = lo - (Wp + 1)                                                # local conv2 position
        valid = (p >= 0) & (p < Npos) & ((p % Wp) < W)                   # wrap cols / inter-image
        acc1 = jnp.where(valid, acc1, 0.0)
        yp_ref[pl.ds(Wp + 1, Npos_blk), :] = acc1                        # place at pad offset (1,1)

        # ---- stage 2: conv3 (3x3,s=2,p=1) + shortcut add via identity lanes; ONE matmul ----
        y_cat = jnp.concatenate(
            [yp_ref[pl.ds(kh * Wp + kw, Nb_blk, stride=2), :]            # stride-2 subsample
             for kh in range(3) for kw in range(3)],
            axis=-1)                                                     # (Nb_blk, 9*Cq)
        acc2 = jnp.dot(y_cat.astype(mm_dtype), w3k_ref[...],
                       preferred_element_type=jnp.float32) + b31_ref[...]
        o_ref[0] = acc2.astype(o_ref.dtype)                              # ONE bulk store

    itemsize = jnp.dtype(compute_dtype).itemsize
    cost = pl.CostEstimate(
        flops=int(2 * G * (Npos_blk * KC1 * Cq + Nb_blk * KC2 * Cout)),
        transcendentals=0,
        bytes_accessed=int(B * PP8 * Cin * itemsize + G * Nb_blk * Cout * 4
                           + (KC1 * Cq + KC2 * Cout) * itemsize + (Cq + Cout) * 4),
    )

    scratch = [pltpu.VMEM((Bblk * PP8, Cq), jnp.float32)]   # padded conv2 output + shortcut lanes
    if stage_input:
        scratch.append(pltpu.VMEM((Bblk * PP8, Cin), jnp.float32))

    out_raw = pl.pallas_call(
        kernel,
        out_shape=jax.ShapeDtypeStruct((G, Nb_blk, Cout), jnp.float32),
        grid=(G,),
        in_specs=[
            pl.BlockSpec((Bblk * PP8, Cin), lambda g: (g, 0)),
            pl.BlockSpec((KC1, Cq), lambda g: (0, 0)),       # grid-invariant: fetched once
            pl.BlockSpec((1, Cq), lambda g: (0, 0)),
            pl.BlockSpec((KC2, Cout), lambda g: (0, 0)),
            pl.BlockSpec((1, Cout), lambda g: (0, 0)),
        ],
        out_specs=pl.BlockSpec((1, Nb_blk, Cout), lambda g: (g, 0, 0)),
        scratch_shapes=scratch,
        compiler_params=pltpu.CompilerParams(
            dimension_semantics=("parallel",),
            vmem_limit_bytes=32 * 1024 * 1024,
        ),
        cost_estimate=cost,
    )(xp, w2k, b2k, w3k, b31)

    # Crop the valid stride-2 positions (pure layout; cheap XLA reshapes / slices).
    out_pad = jnp.pad(out_raw, ((0, 0), (0, Bblk * half - Nb_blk), (0, 0)))
    out_pad = out_pad.reshape(G, Bblk, half, Cout)[:, :, :Ho * Wp, :]
    out_nhwc = out_pad.reshape(B, Ho, Wp, Cout)[:, :, :Wo, :]
    return jnp.transpose(out_nhwc, (0, 3, 1, 2))             # back to NCHW


# --------------------------- pure-JAX reference -----------------------------

def resblock_reference(x, params):
    dn = ("NCHW", "OIHW", "NCHW")
    y = jax.lax.conv_general_dilated(x, params["w2"], (1, 1), ((1, 1), (1, 1)),
                                     dimension_numbers=dn)
    y = y + params["b2"][None, :, None, None]
    y = jnp.maximum(y, 0.0)
    y = jax.lax.conv_general_dilated(y, params["w3"], (2, 2), ((1, 1), (1, 1)),
                                     dimension_numbers=dn)
    y = y + params["b3"][None, :, None, None]
    s = jax.lax.conv_general_dilated(x, params["w1"], (2, 2), ((0, 0), (0, 0)),
                                     dimension_numbers=dn)
    s = s + params["b1"][None, :, None, None]
    return s + y


# ---------------------------------- main ------------------------------------

def _init_params(key, cin, cout, cmid=16):
    ks = jax.random.split(key, 6)
    def w(k, shape, fan_in):
        return (jax.random.normal(k, shape, jnp.float32) / jnp.sqrt(fan_in)).astype(jnp.float32)
    return {
        "w1": w(ks[0], (cout, cin, 1, 1), cin * 1 * 1),
        "b1": w(ks[1], (cout,), cin * 1 * 1),
        "w2": w(ks[2], (cmid, cin, 3, 3), cin * 3 * 3),
        "b2": w(ks[3], (cmid,), cin * 3 * 3),
        "w3": w(ks[4], (cout, cmid, 3, 3), cmid * 3 * 3),
        "b3": w(ks[5], (cout,), cmid * 3 * 3),
    }


if __name__ == "__main__":
    key = jax.random.PRNGKey(0)
    k_x, k_p, k_x2 = jax.random.split(key, 3)

    B, Cin, H, W, Cout = 2, 4, 16, 16, 8
    x = jax.random.normal(k_x, (B, Cin, H, W), jnp.float32)
    params = _init_params(k_p, Cin, Cout)

    fwd = jax.jit(resblock_forward, static_argnames=("compute_dtype", "images_per_step"))
    ref = resblock_reference(x, params)

    # f32 path, one image per grid step (2 steps -> both v7x TensorCores).
    out = jax.block_until_ready(fwd(x, params))
    assert out.shape == ref.shape == (B, Cout, H // 2, W // 2)
    assert jnp.allclose(out, ref, atol=1e-3, rtol=1e-3), "f32 kernel mismatch vs reference"

    # f32 path with both images flattened into one grid step's M dimension.
    out_b = jax.block_until_ready(fwd(x, params, images_per_step=2))
    assert jnp.allclose(out_b, ref, atol=1e-3, rtol=1e-3), "batched-M kernel mismatch vs reference"

    # bf16-activation / bf16-MXU path (f32 accumulation): compare vs a bf16-rounded reference.
    bf = lambda a: a.astype(jnp.bfloat16).astype(jnp.float32)
    params_bf = {k: (bf(v) if k.startswith("w") else v) for k, v in params.items()}
    ref_bf = resblock_reference(bf(x), params_bf)
    out_bf = jax.block_until_ready(fwd(x, params, compute_dtype=jnp.bfloat16))
    assert jnp.allclose(out_bf, ref_bf, atol=5e-2, rtol=5e-2), "bf16 kernel mismatch vs reference"

    # Odd spatial size (exercises Ho = (H+1)//2 paths).
    x_odd = jax.random.normal(k_x2, (B, Cin, 15, 15), jnp.float32)
    out_odd = jax.block_until_ready(fwd(x_odd, params))
    ref_odd = resblock_reference(x_odd, params)
    assert out_odd.shape == ref_odd.shape
    assert jnp.allclose(out_odd, ref_odd, atol=1e-3, rtol=1e-3), "odd-size kernel mismatch"

    print("KERNEL_OK")
</pallas_src>

<mosaic_0001>
module attributes {stable_mosaic.version = 11 : i64} {
  func.func @kernel(%arg0: i32, %arg1: memref<328x4xf32, #tpu.memory_space<vmem>>, %arg2: memref<36x24xf32, #tpu.memory_space<vmem>>, %arg3: memref<1x24xf32, #tpu.memory_space<vmem>>, %arg4: memref<216x8xf32, #tpu.memory_space<vmem>>, %arg5: memref<1x8xf32, #tpu.memory_space<vmem>>, %arg6: memref<1x134x8xf32, #tpu.memory_space<vmem>>, %arg7: memref<328x24xf32, #tpu.memory_space<vmem>>) attributes {dimension_semantics = [#tpu.dimension_semantics<parallel>], iteration_bounds = array<i64: 2>, scalar_prefetch = 0 : i64, scratch_operands = 1 : i64, tpu.core_type = #tpu.core_type<tc>, window_params = [{transform_indices = @transform_0, window_bounds = array<i64: 328, 4>}, {pipeline_mode = #tpu.pipeline_mode<synchronous>, transform_indices = @transform_1, window_bounds = array<i64: 36, 24>}, {pipeline_mode = #tpu.pipeline_mode<synchronous>, transform_indices = @transform_2, window_bounds = array<i64: 1, 24>}, {pipeline_mode = #tpu.pipeline_mode<synchronous>, transform_indices = @transform_3, window_bounds = array<i64: 216, 8>}, {pipeline_mode = #tpu.pipeline_mode<synchronous>, transform_indices = @transform_4, window_bounds = array<i64: 1, 8>}, {transform_indices = @transform_5, window_bounds = array<i64: 1, 134, 8>}]} {
    %cst = arith.constant 0.000000e+00 : f32
    %0 = vector.broadcast %cst : f32 to vector<19x24xf32>
    %c0 = arith.constant 0 : index
    %c0_0 = arith.constant 0 : index
    %1 = vector.load %arg7[%c0, %c0_0] : memref<328x24xf32, #tpu.memory_space<vmem>>, vector<19x24xf32>
    tpu.vector_store %arg7[%c0, %c0_0], %0 {strides = array<i32>} : memref<328x24xf32, #tpu.memory_space<vmem>>, vector<19x24xf32>,
    %cst_1 = arith.constant 0.000000e+00 : f32
    %2 = vector.broadcast %cst_1 : f32 to vector<23x24xf32>
    %c305 = arith.constant 305 : index
    %c0_2 = arith.constant 0 : index
    %3 = vector.load %arg7[%c305, %c0_2] : memref<328x24xf32, #tpu.memory_space<vmem>>, vector<23x24xf32>
    tpu.vector_store %arg7[%c305, %c0_2], %2 {strides = array<i32>} : memref<328x24xf32, #tpu.memory_space<vmem>>, vector<23x24xf32>,
    %c0_3 = arith.constant 0 : index
    %c0_4 = arith.constant 0 : index
    %4 = vector.load %arg1[%c0_3, %c0_4] : memref<328x4xf32, #tpu.memory_space<vmem>>, vector<286x4xf32>
    %c1 = arith.constant 1 : index
    %c0_5 = arith.constant 0 : index
    %5 = vector.load %arg1[%c1, %c0_5] : memref<328x4xf32, #tpu.memory_space<vmem>>, vector<286x4xf32>
    %c2 = arith.constant 2 : index
    %c0_6 = arith.constant 0 : index
    %6 = vector.load %arg1[%c2, %c0_6] : memref<328x4xf32, #tpu.memory_space<vmem>>, vector<286x4xf32>
    %c18 = arith.constant 18 : index
    %c0_7 = arith.constant 0 : index
    %7 = vector.load %arg1[%c18, %c0_7] : memref<328x4xf32, #tpu.memory_space<vmem>>, vector<286x4xf32>
    %c19 = arith.constant 19 : index
    %c0_8 = arith.constant 0 : index
    %8 = vector.load %arg1[%c19, %c0_8] : memref<328x4xf32, #tpu.memory_space<vmem>>, vector<286x4xf32>
    %c20 = arith.constant 20 : index
    %c0_9 = arith.constant 0 : index
    %9 = vector.load %arg1[%c20, %c0_9] : memref<328x4xf32, #tpu.memory_space<vmem>>, vector<286x4xf32>
    %c36 = arith.constant 36 : index
    %c0_10 = arith.constant 0 : index
    %10 = vector.load %arg1[%c36, %c0_10] : memref<328x4xf32, #tpu.memory_space<vmem>>, vector<286x4xf32>
    %c37 = arith.constant 37 : index
    %c0_11 = arith.constant 0 : index
    %11 = vector.load %arg1[%c37, %c0_11] : memref<328x4xf32, #tpu.memory_space<vmem>>, vector<286x4xf32>
    %c38 = arith.constant 38 : index
    %c0_12 = arith.constant 0 : index
    %12 = vector.load %arg1[%c38, %c0_12] : memref<328x4xf32, #tpu.memory_space<vmem>>, vector<286x4xf32>
    %13 = tpu.concatenate %4, %5, %6, %7, %8, %9, %10, %11, %12 in 1 : vector<286x4xf32>, vector<286x4xf32>, vector<286x4xf32>, vector<286x4xf32>, vector<286x4xf32>, vector<286x4xf32>, vector<286x4xf32>, vector<286x4xf32>, vector<286x4xf32> -> vector<286x36xf32>
    %c0_13 = arith.constant 0 : index
    %c0_14 = arith.constant 0 : index
    %14 = vector.load %arg2[%c0_13, %c0_14] : memref<36x24xf32, #tpu.memory_space<vmem>>, vector<36x24xf32>
    %cst_15 = arith.constant dense<0.000000e+00> : vector<286x24xf32>
    %15 = tpu.matmul %13, %14, %cst_15 {dimension_numbers = #tpu.dot_dimension_numbers<[1], [0], [0], [1], [0, 0, 1, 1], [], []>} : vector<286x36xf32>, vector<36x24xf32>, vector<286x24xf32> -> vector<286x24xf32>
    %c0_16 = arith.constant 0 : index
    %c0_17 = arith.constant 0 : index
    %16 = vector.load %arg3[%c0_16, %c0_17] : memref<1x24xf32, #tpu.memory_space<vmem>>, vector<1x24xf32>
    %17 = vector.broadcast %16 : vector<1x24xf32> to vector<286x24xf32>
    %18 = arith.addf %15, %17 : vector<286x24xf32>
    %19 = tpu.iota {dimensions = array<i32: 1>} : vector<1x24xi32>
    %c16_i32 = arith.constant 16 : i32
    %20 = vector.broadcast %c16_i32 : i32 to vector<1x24xi32>
    %21 = arith.cmpi slt, %19, %20 : vector<1x24xi32>
    %cst_18 = arith.constant 0.000000e+00 : f32
    %22 = vector.broadcast %cst_18 : f32 to vector<286x24xf32>
    %23 = arith.maximumf %18, %22 : vector<286x24xf32>
    %24 = vector.shape_cast %21 : vector<1x24xi1> to vector<1x24xi1>
    %25 = vector.broadcast %24 : vector<1x24xi1> to vector<286x24xi1>
    %26 = arith.select %25, %23, %18 : vector<286x24xi1>, vector<286x24xf32>
    %27 = tpu.iota {dimensions = array<i32: 0>} : vector<286x1xi32>
    %c19_i32 = arith.constant 19 : i32
    %28 = vector.broadcast %c19_i32 : i32 to vector<286x1xi32>
    %29 = arith.addi %27, %28 : vector<286x1xi32>
    %c328_i32 = arith.constant 328 : i32
    %c0_i32 = arith.constant 0 : i32
    %30 = arith.cmpi eq, %c328_i32, %c0_i32 : i32
    %c1_i32 = arith.constant 1 : i32
    %31 = arith.select %30, %c1_i32, %c328_i32 : i32
    %32 = vector.broadcast %31 : i32 to vector<286x1xi32>
    %33 = arith.remsi %29, %32 : vector<286x1xi32>
    %c0_i32_19 = arith.constant 0 : i32
    %34 = vector.broadcast %c0_i32_19 : i32 to vector<286x1xi32>
    %35 = arith.cmpi ne, %33, %34 : vector<286x1xi32>
    %c0_i32_20 = arith.constant 0 : i32
    %36 = vector.broadcast %c0_i32_20 : i32 to vector<286x1xi32>
    %37 = arith.cmpi slt, %33, %36 : vector<286x1xi32>
    %c0_i32_21 = arith.constant 0 : i32
    %38 = arith.cmpi slt, %31, %c0_i32_21 : i32
    %39 = vector.broadcast %38 : i1 to vector<286x1xi1>
    %40 = vector.broadcast %39 : vector<286x1xi1> to vector<286x1xi1>
    %41 = arith.xori %37, %40 : vector<286x1xi1>
    %42 = arith.andi %41, %35 : vector<286x1xi1>
    %43 = vector.broadcast %31 : i32 to vector<286x1xi32>
    %44 = arith.addi %33, %43 : vector<286x1xi32>
    %45 = arith.select %42, %44, %33 : vector<286x1xi1>, vector<286x1xi32>
    %c19_i32_22 = arith.constant 19 : i32
    %46 = vector.broadcast %c19_i32_22 : i32 to vector<286x1xi32>
    %47 = arith.subi %45, %46 : vector<286x1xi32>
    %c0_i32_23 = arith.constant 0 : i32
    %48 = vector.broadcast %c0_i32_23 : i32 to vector<286x1xi32>
    %49 = arith.cmpi sge, %47, %48 : vector<286x1xi32>
    %c286_i32 = arith.constant 286 : i32
    %50 = vector.broadcast %c286_i32 : i32 to vector<286x1xi32>
    %51 = arith.cmpi slt, %47, %50 : vector<286x1xi32>
    %52 = arith.andi %49, %51 : vector<286x1xi1>
    %c18_i32 = arith.constant 18 : i32
    %c0_i32_24 = arith.constant 0 : i32
    %53 = arith.cmpi eq, %c18_i32, %c0_i32_24 : i32
    %c1_i32_25 = arith.constant 1 : i32
    %54 = arith.select %53, %c1_i32_25, %c18_i32 : i32
    %55 = vector.broadcast %54 : i32 to vector<286x1xi32>
    %56 = arith.remsi %47, %55 : vector<286x1xi32>
    %c0_i32_26 = arith.constant 0 : i32
    %57 = vector.broadcast %c0_i32_26 : i32 to vector<286x1xi32>
    %58 = arith.cmpi ne, %56, %57 : vector<286x1xi32>
    %c0_i32_27 = arith.constant 0 : i32
    %59 = vector.broadcast %c0_i32_27 : i32 to vector<286x1xi32>
    %60 = arith.cmpi slt, %56, %59 : vector<286x1xi32>
    %c0_i32_28 = arith.constant 0 : i32
    %61 = arith.cmpi slt, %54, %c0_i32_28 : i32
    %62 = vector.broadcast %61 : i1 to vector<286x1xi1>
    %63 = vector.broadcast %62 : vector<286x1xi1> to vector<286x1xi1>
    %64 = arith.xori %60, %63 : vector<286x1xi1>
    %65 = arith.andi %64, %58 : vector<286x1xi1>
    %66 = vector.broadcast %54 : i32 to vector<286x1xi32>
    %67 = arith.addi %56, %66 : vector<286x1xi32>
    %68 = arith.select %65, %67, %56 : vector<286x1xi1>, vector<286x1xi32>
    %c16_i32_29 = arith.constant 16 : i32
    %69 = vector.broadcast %c16_i32_29 : i32 to vector<286x1xi32>
    %70 = arith.cmpi slt, %68, %69 : vector<286x1xi32>
    %71 = arith.andi %52, %70 : vector<286x1xi1>
    %cst_30 = arith.constant 0.000000e+00 : f32
    %72 = vector.shape_cast %71 : vector<286x1xi1> to vector<286x1xi1>
    %73 = vector.broadcast %72 : vector<286x1xi1> to vector<286x24xi1>
    %74 = vector.broadcast %cst_30 : f32 to vector<286x24xf32>
    %75 = arith.select %73, %26, %74 : vector<286x24xi1>, vector<286x24xf32>
    %c19_31 = arith.constant 19 : index
    %c0_32 = arith.constant 0 : index
    %76 = vector.load %arg7[%c19_31, %c0_32] : memref<328x24xf32, #tpu.memory_space<vmem>>, vector<286x24xf32>
    tpu.vector_store %arg7[%c19_31, %c0_32], %75 {strides = array<i32>} : memref<328x24xf32, #tpu.memory_space<vmem>>, vector<286x24xf32>,
    %c0_33 = arith.constant 0 : index
    %c0_34 = arith.constant 0 : index
    %77 = tpu.strided_load %arg7[%c0_33, %c0_34] {strides = array<i32: 2, 1>} : memref<328x24xf32, #tpu.memory_space<vmem>>, vector<134x24xf32>
    %c1_35 = arith.constant 1 : index
    %c0_36 = arith.constant 0 : index
    %78 = tpu.strided_load %arg7[%c1_35, %c0_36] {strides = array<i32: 2, 1>} : memref<328x24xf32, #tpu.memory_space<vmem>>, vector<134x24xf32>
    %c2_37 = arith.constant 2 : index
    %c0_38 = arith.constant 0 : index
    %79 = tpu.strided_load %arg7[%c2_37, %c0_38] {strides = array<i32: 2, 1>} : memref<328x24xf32, #tpu.memory_space<vmem>>, vector<134x24xf32>
    %c18_39 = arith.constant 18 : index
    %c0_40 = arith.constant 0 : index
    %80 = tpu.strided_load %arg7[%c18_39, %c0_40] {strides = array<i32: 2, 1>} : memref<328x24xf32, #tpu.memory_space<vmem>>, vector<134x24xf32>
    %c19_41 = arith.constant 19 : index
    %c0_42 = arith.constant 0 : index
    %81 = tpu.strided_load %arg7[%c19_41, %c0_42] {strides = array<i32: 2, 1>} : memref<328x24xf32, #tpu.memory_space<vmem>>, vector<134x24xf32>
    %c20_43 = arith.constant 20 : index
    %c0_44 = arith.constant 0 : index
    %82 = tpu.strided_load %arg7[%c20_43, %c0_44] {strides = array<i32: 2, 1>} : memref<328x24xf32, #tpu.memory_space<vmem>>, vector<134x24xf32>
    %c36_45 = arith.constant 36 : index
    %c0_46 = arith.constant 0 : index
    %83 = tpu.strided_load %arg7[%c36_45, %c0_46] {strides = array<i32: 2, 1>} : memref<328x24xf32, #tpu.memory_space<vmem>>, vector<134x24xf32>
    %c37_47 = arith.constant 37 : index
    %c0_48 = arith.constant 0 : index
    %84 = tpu.strided_load %arg7[%c37_47, %c0_48] {strides = array<i32: 2, 1>} : memref<328x24xf32, #tpu.memory_space<vmem>>, vector<134x24xf32>
    %c38_49 = arith.constant 38 : index
    %c0_50 = arith.constant 0 : index
    %85 = tpu.strided_load %arg7[%c38_49, %c0_50] {strides = array<i32: 2, 1>} : memref<328x24xf32, #tpu.memory_space<vmem>>, vector<134x24xf32>
    %86 = tpu.concatenate %77, %78, %79, %80, %81, %82, %83, %84, %85 in 1 : vector<134x24xf32>, vector<134x24xf32>, vector<134x24xf32>, vector<134x24xf32>, vector<134x24xf32>, vector<134x24xf32>, vector<134x24xf32>, vector<134x24xf32>, vector<134x24xf32> -> vector<134x216xf32>
    %c0_51 = arith.constant 0 : index
    %c0_52 = arith.constant 0 : index
    %87 = vector.load %arg4[%c0_51, %c0_52] : memref<216x8xf32, #tpu.memory_space<vmem>>, vector<216x8xf32>
    %cst_53 = arith.constant dense<0.000000e+00> : vector<134x8xf32>
    %88 = tpu.matmul %86, %87, %cst_53 {dimension_numbers = #tpu.dot_dimension_numbers<[1], [0], [0], [1], [0, 0, 1, 1], [], []>} : vector<134x216xf32>, vector<216x8xf32>, vector<134x8xf32> -> vector<134x8xf32>
    %c0_54 = arith.constant 0 : index
    %c0_55 = arith.constant 0 : index
    %89 = vector.load %arg5[%c0_54, %c0_55] : memref<1x8xf32, #tpu.memory_space<vmem>>, vector<1x8xf32>
    %90 = vector.broadcast %89 : vector<1x8xf32> to vector<134x8xf32>
    %91 = arith.addf %88, %90 : vector<134x8xf32>
    %c0_56 = arith.constant 0 : index
    %c0_57 = arith.constant 0 : index
    %c0_58 = arith.constant 0 : index
    %92 = vector.load %arg6[%c0_56, %c0_57, %c0_58] : memref<1x134x8xf32, #tpu.memory_space<vmem>>, vector<1x134x8xf32>
    %93 = vector.shape_cast %92 : vector<1x134x8xf32> to vector<134x8xf32>
    %94 = vector.shape_cast %91 : vector<134x8xf32> to vector<1x134x8xf32>
    tpu.vector_store %arg6[%c0_56, %c0_57, %c0_58], %94 {strides = array<i32>} : memref<1x134x8xf32, #tpu.memory_space<vmem>>, vector<1x134x8xf32>,
    return
  }
  func.func @transform_0(%arg0: i32) -> (i32, i32) {
    %c0_i32 = arith.constant 0 : i32
    %c0_i32_0 = arith.constant 0 : i32
    return %arg0, %c0_i32 : i32, i32
  }
  func.func @transform_1(%arg0: i32) -> (i32, i32) {
    %c0_i32 = arith.constant 0 : i32
    %c0_i32_0 = arith.constant 0 : i32
    %c0_i32_1 = arith.constant 0 : i32
    return %c0_i32, %c0_i32_0 : i32, i32
  }
  func.func @transform_2(%arg0: i32) -> (i32, i32) {
    %c0_i32 = arith.constant 0 : i32
    %c0_i32_0 = arith.constant 0 : i32
    %c0_i32_1 = arith.constant 0 : i32
    return %c0_i32, %c0_i32_0 : i32, i32
  }
  func.func @transform_3(%arg0: i32) -> (i32, i32) {
    %c0_i32 = arith.constant 0 : i32
    %c0_i32_0 = arith.constant 0 : i32
    %c0_i32_1 = arith.constant 0 : i32
    return %c0_i32, %c0_i32_0 : i32, i32
  }
  func.func @transform_4(%arg0: i32) -> (i32, i32) {
    %c0_i32 = arith.constant 0 : i32
    %c0_i32_0 = arith.constant 0 : i32
    %c0_i32_1 = arith.constant 0 : i32
    return %c0_i32, %c0_i32_0 : i32, i32
  }
  func.func @transform_5(%arg0: i32) -> (i32, i32, i32) {
    %c0_i32 = arith.constant 0 : i32
    %c0_i32_0 = arith.constant 0 : i32
    %c0_i32_1 = arith.constant 0 : i32
    return %arg0, %c0_i32, %c0_i32_0 : i32, i32, i32
  }
}

</mosaic_0001>

<bundles_post_ra>
// kernel: resblock_forward.1
= control target key start
LH: loop header
LB: loop body
LE: loop exit
PB: predicated region body
PF: predicated region fallthrough
CT: control target
= control target key end

     0   :  { %s5821_s18 = smov 0   ;;  %s10686_s0 = inlined_call_operand.vmem [shape: f32[656,4], index: 0, kind: input, shape index: {}]   ;;  %s10687_s1 = inlined_call_operand.vmem [shape: f32[36,24], index: 1, kind: input, shape index: {}]   ;;  %s10688_s2 = inlined_call_operand.vmem [shape: f32[1,24], index: 2, kind: input, shape index: {}]   ;;  %s10689_s3 = inlined_call_operand.vmem [shape: f32[216,8], index: 3, kind: input, shape index: {}]   ;;  %s10690_s4 = inlined_call_operand.vmem [shape: f32[1,8], index: 4, kind: input, shape index: {}]   ;;  %s10691_s5 = inlined_call_operand.vmem [shape: f32[2,134,8], index: 5, kind: output, shape index: {}]  }
   0x1 LB: > { %s5827_s19 = sadd.s32 4294967295, %s5773_s18   ;;  %p5120_p0 = scmp.ge.s32.totalorder %s5773_s18, 1  ;;  %s5773_s18 = sphi %s5821_s18, %s15_s18  }
   0x2   : > { %p188_p1 = scmp.lt.s32.totalorder %s5773_s18, 3 }
   0x4   : > { %p189_p2 = pnand %p5120_p0, %p188_p1 }
   0x6   : > { %192 = sbr.rel (%p189_p2) target bundleno = 1313 (0x521), region = 40 }
   0xd   : > { %s216_s20 = smul.u32 41, %s5827_s19  ;;  %s5775_s25 = smov 4   ;;  %vm1996_vm0 = vcmask 1043456   ;;  %vm10696_vm1 = vcmask 64512   ;;  %vm10692_vm2 = vcmask 31744   ;;  %vm10695_vm3 = vcmask 97280  }
   0xe   : > { %s5776_s26 = smov 8   ;;  %s5777_s27 = smov 12   ;;  %vm10694_vm4 = vcmask 130048   ;;  %vm1728_vm5 = vcmask 162816   ;;  %vm10700_vm6 = vcmask 195584   ;;  %vm10699_vm7 = vcmask 228352  }
   0xf   : > { %p217_p3 = scmp.lt.s32.totalorder %s216_s20, 81  ;;  %s5778_s7 = smov 16   ;;  %vm10693_vm8 = vcmask 261120   ;;  %vm10698_vm9 = vcmask 293888   ;;  %vm230_vm10 = vcmask 190464  }
  0x10   : > { %s5779_s10 = smov 20   ;;  %s5780_s13 = smov 24  }
  0x11   : > { %s11320_s20 = smov (!%p217_p3, %s216_s20), 81  ;;  %s5781_s16 = smov 28  }
  0x12   : > { %s5121_s21 = sshll.u32 %s11320_s20, 3  ;;  %s5782_s17 = smov 32  }
  0x13   : > { %s5835_s24 = scalar_lea.vmem %s10686_s0, %s5121_s21  ;;  %s5786_s8 = smov 120  }
  0x14   : > { %v274_v0 = vld [vmem:[%s5835_s24 + $0x11] sm:$0xff]  ;;  %v272_v1 = vld [vmem:[%s5835_s24 + $0x1] sm:$0xff]  ;;  %v275_v2 = vld [vmem:[%s5835_s24 + $0x19] sm:$0xff]  ;;  %s5787_s29 = smov 72   ;;  %s5788_s11 = smov 96  }
  0x15   : > { %534 = vrot.lane.b32.xlu1 %v274_v0, %s5775_s25  ;;  %530 = vrot.lane.b32.xlu0 %v272_v1, %s5775_s25  ;;  %v273_v3 = vld [vmem:[%s5835_s24 + $0x9] sm:$0xff]  ;;  %v276_v5 = vld [vmem:[%s5835_s24 + $0x21] sm:$0xff]  ;;  %s5789_s21 = smov 40   ;;  %s5790_s22 = smov 64  }
  0x16   : > { %v277_v4 = vld [vmem:[%s5835_s24 + $0x29] sm:$0xff]  ;;  %v279_v6 = vld [vmem:[%s5835_s24 + $0x39] sm:$0xff]  ;;  %v278_v7 = vld [vmem:[%s5835_s24 + $0x31] sm:$0xff]  ;;  %p222_p4 = scmp.lt.s32.totalorder %s5827_s19, 1 }
  0x17   : > { %v281_v8 = vld [vmem:[%s5835_s24 + $0x49] sm:$0xff]  ;;  %v280_v9 = vld [vmem:[%s5835_s24 + $0x41] sm:$0xff]  ;;  %v283_v10 = vld [vmem:[%s5835_s24 + $0x59] sm:$0xff] }
  0x18   : > { %v282_v11 = vld [vmem:[%s5835_s24 + $0x51] sm:$0xff]  ;;  %v285_v12 = vld [vmem:[%s5835_s24 + $0x69] sm:$0xff]  ;;  %v284_v13 = vld [vmem:[%s5835_s24 + $0x61] sm:$0xff]  ;;  %s11322_s19 = smov (!%p222_p4, %s5827_s19), 1 }
  0x19   : > { %536 = vrot.lane.b32.xlu1 %v275_v2, %s5775_s25  ;;  %532 = vrot.lane.b32.xlu0 %v273_v3, %s5775_s25  ;;  %v287_v14 = vld [vmem:[%s5835_s24 + $0x79] sm:$0xff]  ;;  %v286_v15 = vld [vmem:[%s5835_s24 + $0x71] sm:$0xff] }
  0x1a   : > { %v289_v16 = vld [vmem:[%s5835_s24 + $0x89] sm:$0xff]  ;;  %v288_v17 = vld [vmem:[%s5835_s24 + $0x81] sm:$0xff]  ;;  %v291_v18 = vld [vmem:[%s5835_s24 + $0x99] sm:$0xff] }
  0x1b   : > { %v290_v19 = vld [vmem:[%s5835_s24 + $0x91] sm:$0xff]  ;;  %v293_v20 = vld [vmem:[%s5835_s24 + $0xa9] sm:$0xff]  ;;  %v292_v21 = vld [vmem:[%s5835_s24 + $0xa1] sm:$0xff] }
  0x1c   : > { %v295_v22 = vld [vmem:[%s5835_s24 + $0xb9] sm:$0xff]  ;;  %v294_v23 = vld [vmem:[%s5835_s24 + $0xb1] sm:$0xff]  ;;  %v297_v24 = vld [vmem:[%s5835_s24 + $0xc9] sm:$0xff] }
  0x1d   : > { %540 = vrot.lane.b32.xlu1 %v277_v4, %s5775_s25  ;;  %538 = vrot.lane.b32.xlu0 %v276_v5, %s5775_s25  ;;  %v296_v25 = vld [vmem:[%s5835_s24 + $0xc1] sm:$0xff]  ;;  %v299_v26 = vld [vmem:[%s5835_s24 + $0xd9] sm:$0xff] }
  0x1e   : > { %v298_v27 = vld [vmem:[%s5835_s24 + $0xd1] sm:$0xff]  ;;  %v301_v28 = vld [vmem:[%s5835_s24 + $0xe9] sm:$0xff]  ;;  %v300_v29 = vld [vmem:[%s5835_s24 + $0xe1] sm:$0xff] }
  0x1f   : > { %v303_v30 = vld [vmem:[%s5835_s24 + $0xf9] sm:$0xff]  ;;  %v302_v31 = vld [vmem:[%s5835_s24 + $0xf1] sm:$0xff]  ;;  %v305_v32 = vld [vmem:[%s5835_s24 + $0x109] sm:$0xff] }
  0x20   : > { %v304_v33 = vld [vmem:[%s5835_s24 + $0x101] sm:$0xff]  ;;  %v307_v34 = vld [vmem:[%s5835_s24 + $0x119] sm:$0x3f]  ;;  %v306_v35 = vld [vmem:[%s5835_s24 + $0x111] sm:$0xff] }
  0x21   : > { %544 = vrot.lane.b32.xlu1 %v279_v6, %s5775_s25  ;;  %542 = vrot.lane.b32.xlu0 %v278_v7, %s5775_s25  ;;  %v309_v36 = vld [vmem:[%s5835_s24 + $0xa] sm:$0xff]  ;;  %v308_v37 = vld [vmem:[%s5835_s24 + $0x2] sm:$0xff] }
  0x22   : > { %v5914_v38 = vld [vmem:[%s5835_s24 + $0x1a] sm:$0xff]  ;;  %v5917_v39 = vld [vmem:[%s5835_s24 + $0x12] sm:$0xff]  ;;  %v5924_v40 = vld [vmem:[%s5835_s24 + $0x2a] sm:$0xff] }
  0x23   : > { %v5927_v41 = vld [vmem:[%s5835_s24 + $0x22] sm:$0xff]  ;;  %v5934_v42 = vld [vmem:[%s5835_s24 + $0x3a] sm:$0xff]  ;;  %v5937_v43 = vld [vmem:[%s5835_s24 + $0x32] sm:$0xff] }
  0x24   : > { %v5944_v44 = vld [vmem:[%s5835_s24 + $0x4a] sm:$0xff]  ;;  %v5947_v45 = vld [vmem:[%s5835_s24 + $0x42] sm:$0xff]  ;;  %v5954_v46 = vld [vmem:[%s5835_s24 + $0x5a] sm:$0xff] }
  0x25   : > { %548 = vrot.lane.b32.xlu1 %v281_v8, %s5775_s25  ;;  %546 = vrot.lane.b32.xlu0 %v280_v9, %s5775_s25  ;;  %v5957_v47 = vld [vmem:[%s5835_s24 + $0x52] sm:$0xff]  ;;  %v5964_v48 = vld [vmem:[%s5835_s24 + $0x6a] sm:$0xff] }
  0x26   : > { %v5967_v49 = vld [vmem:[%s5835_s24 + $0x62] sm:$0xff]  ;;  %v5974_v50 = vld [vmem:[%s5835_s24 + $0x7a] sm:$0xff]  ;;  %v5977_v51 = vld [vmem:[%s5835_s24 + $0x72] sm:$0xff] }
  0x27   : > { %v5984_v52 = vld [vmem:[%s5835_s24 + $0x8a] sm:$0xff]  ;;  %v5987_v53 = vld [vmem:[%s5835_s24 + $0x82] sm:$0xff]  ;;  %v5994_v54 = vld [vmem:[%s5835_s24 + $0x9a] sm:$0xff] }
  0x28   : > { %v5997_v55 = vld [vmem:[%s5835_s24 + $0x92] sm:$0xff]  ;;  %v6004_v56 = vld [vmem:[%s5835_s24 + $0xaa] sm:$0xff]  ;;  %v6007_v57 = vld [vmem:[%s5835_s24 + $0xa2] sm:$0xff] }
  0x29   : > { %552 = vrot.lane.b32.xlu1 %v283_v10, %s5775_s25  ;;  %550 = vrot.lane.b32.xlu0 %v282_v11, %s5775_s25  ;;  %v6014_v58 = vld [vmem:[%s5835_s24 + $0xba] sm:$0xff]  ;;  %v6017_v59 = vld [vmem:[%s5835_s24 + $0xb2] sm:$0xff] }
  0x2a   : > { %v6028_v62 = vld [vmem:[%s5835_s24 + $0xca] sm:$0xff]  ;;  %v6031_v63 = vld [vmem:[%s5835_s24 + $0xc2] sm:$0xff]  ;;  %v6042_v2 = vld [vmem:[%s5835_s24 + $0xda] sm:$0xff] }
  0x2b   : > { %v6045_v3 = vld [vmem:[%s5835_s24 + $0xd2] sm:$0xff]  ;;  %v6056_v6 = vld [vmem:[%s5835_s24 + $0xea] sm:$0xff]  ;;  %v6059_v7 = vld [vmem:[%s5835_s24 + $0xe2] sm:$0xff] }
  0x2c   : > { %v6070_v10 = vld [vmem:[%s5835_s24 + $0xfa] sm:$0xff]  ;;  %v6073_v11 = vld [vmem:[%s5835_s24 + $0xf2] sm:$0xff] }
  0x2d   : > { %556 = vrot.lane.b32.xlu1 %v285_v12, %s5775_s25  ;;  %554 = vrot.lane.b32.xlu0 %v284_v13, %s5775_s25 }
  0x31   : > { %560 = vrot.lane.b32.xlu1 %v287_v14, %s5775_s25  ;;  %558 = vrot.lane.b32.xlu0 %v286_v15, %s5775_s25  ;;  %v6084_v14 = vld [vmem:[%s5835_s24 + $0x10a] sm:$0xff]  ;;  %v6087_v15 = vld [vmem:[%s5835_s24 + $0x102] sm:$0xff] }
  0x35   : > { %564 = vrot.lane.b32.xlu1 %v289_v16, %s5775_s25  ;;  %562 = vrot.lane.b32.xlu0 %v288_v17, %s5775_s25 }
  0x39   : > { %568 = vrot.lane.b32.xlu1 %v291_v18, %s5775_s25  ;;  %566 = vrot.lane.b32.xlu0 %v290_v19, %s5775_s25  ;;  %v343_v18 = vld [vmem:[%s5835_s24 + $0x11a] sm:$0x3f]  ;;  %v6099_v19 = vld [vmem:[%s5835_s24 + $0x112] sm:$0xff] }
  0x3d   : > { %572 = vrot.lane.b32.xlu1 %v293_v20, %s5775_s25  ;;  %570 = vrot.lane.b32.xlu0 %v292_v21, %s5775_s25 }
  0x41   : > { %576 = vrot.lane.b32.xlu1 %v295_v22, %s5775_s25  ;;  %574 = vrot.lane.b32.xlu0 %v294_v23, %s5775_s25 }
  0x45   : > { %580 = vrot.lane.b32.xlu1 %v297_v24, %s5775_s25  ;;  %578 = vrot.lane.b32.xlu0 %v296_v25, %s5775_s25 }
  0x49   : > { %584 = vrot.lane.b32.xlu1 %v299_v26, %s5775_s25  ;;  %582 = vrot.lane.b32.xlu0 %v298_v27, %s5775_s25 }
  0x4d   : > { %588 = vrot.lane.b32.xlu1 %v301_v28, %s5775_s25  ;;  %586 = vrot.lane.b32.xlu0 %v300_v29, %s5775_s25 }
  0x51   : > { %592 = vrot.lane.b32.xlu1 %v303_v30, %s5775_s25  ;;  %590 = vrot.lane.b32.xlu0 %v302_v31, %s5775_s25 }
  0x55   : > { %596 = vrot.lane.b32.xlu1 %v305_v32, %s5775_s25  ;;  %594 = vrot.lane.b32.xlu0 %v304_v33, %s5775_s25 }
  0x59   : > { %600 = vrot.lane.b32.xlu1 %v307_v34, %s5775_s25  ;;  %598 = vrot.lane.b32.xlu0 %v306_v35, %s5775_s25 }
  0x5d   : > { %676 = vrot.lane.b32.xlu1 %v309_v36, %s5776_s26  ;;  %674 = vrot.lane.b32.xlu0 %v308_v37, %s5776_s26 }
  0x61   : > { %680 = vrot.lane.b32.xlu1 %v5914_v38, %s5776_s26  ;;  %678 = vrot.lane.b32.xlu0 %v5917_v39, %s5776_s26 }
  0x65   : > { %684 = vrot.lane.b32.xlu1 %v5924_v40, %s5776_s26  ;;  %682 = vrot.lane.b32.xlu0 %v5927_v41, %s5776_s26 }
  0x69   : > { %688 = vrot.lane.b32.xlu1 %v5934_v42, %s5776_s26  ;;  %686 = vrot.lane.b32.xlu0 %v5937_v43, %s5776_s26 }
  0x6d   : > { %692 = vrot.lane.b32.xlu1 %v5944_v44, %s5776_s26  ;;  %690 = vrot.lane.b32.xlu0 %v5947_v45, %s5776_s26 }
  0x71   : > { %696 = vrot.lane.b32.xlu1 %v5954_v46, %s5776_s26  ;;  %694 = vrot.lane.b32.xlu0 %v5957_v47, %s5776_s26 }
  0x75   : > { %700 = vrot.lane.b32.xlu1 %v5964_v48, %s5776_s26  ;;  %698 = vrot.lane.b32.xlu0 %v5967_v49, %s5776_s26 }
  0x79   : > { %704 = vrot.lane.b32.xlu1 %v5974_v50, %s5776_s26  ;;  %702 = vrot.lane.b32.xlu0 %v5977_v51, %s5776_s26 }
  0x7d   : > { %708 = vrot.lane.b32.xlu1 %v5984_v52, %s5776_s26  ;;  %706 = vrot.lane.b32.xlu0 %v5987_v53, %s5776_s26 }
  0x81   : > { %712 = vrot.lane.b32.xlu1 %v5994_v54, %s5776_s26  ;;  %710 = vrot.lane.b32.xlu0 %v5997_v55, %s5776_s26 }
  0x85   : > { %716 = vrot.lane.b32.xlu1 %v6004_v56, %s5776_s26  ;;  %714 = vrot.lane.b32.xlu0 %v6007_v57, %s5776_s26 }
  0x87   : > { %v6019_v60 = vpop.permute.xlu1 %534  ;;  %v6021_v61 = vpop.permute.xlu0 %530 }
  0x89   : > { %720 = vrot.lane.b32.xlu1 %v6014_v58, %s5776_s26  ;;  %718 = vrot.lane.b32.xlu0 %v6017_v59, %s5776_s26 }
  0x8b   : > { %v6033_v0 = vpop.permute.xlu1 %536  ;;  %v6035_v1 = vpop.permute.xlu0 %532 }
  0x8d   : > { %724 = vrot.lane.b32.xlu1 %v6028_v62, %s5776_s26  ;;  %722 = vrot.lane.b32.xlu0 %v6031_v63, %s5776_s26 }
  0x8f   : > { %v6047_v4 = vpop.permute.xlu1 %540  ;;  %v6049_v5 = vpop.permute.xlu0 %538 }
  0x91   : > { %728 = vrot.lane.b32.xlu1 %v6042_v2, %s5776_s26  ;;  %726 = vrot.lane.b32.xlu0 %v6045_v3, %s5776_s26 }
  0x93   : > { %v6061_v8 = vpop.permute.xlu1 %544  ;;  %v6063_v9 = vpop.permute.xlu0 %542 }
  0x95   : > { %732 = vrot.lane.b32.xlu1 %v6056_v6, %s5776_s26  ;;  %730 = vrot.lane.b32.xlu0 %v6059_v7, %s5776_s26 }
  0x97   : > { %v6075_v12 = vpop.permute.xlu1 %548  ;;  %v6077_v13 = vpop.permute.xlu0 %546 }
  0x99   : > { %736 = vrot.lane.b32.xlu1 %v6070_v10, %s5776_s26  ;;  %734 = vrot.lane.b32.xlu0 %v6073_v11, %s5776_s26 }
  0x9b   : > { %v6089_v16 = vpop.permute.xlu1 %552  ;;  %v6091_v17 = vpop.permute.xlu0 %550 }
  0x9d   : > { %740 = vrot.lane.b32.xlu1 %v6084_v14, %s5776_s26  ;;  %738 = vrot.lane.b32.xlu0 %v6087_v15, %s5776_s26 }
  0x9f   : > { %v6101_v20 = vpop.permute.xlu1 %556  ;;  %v6103_v21 = vpop.permute.xlu0 %554 }
  0xa1   : > { %744 = vrot.lane.b32.xlu1 %v343_v18, %s5776_s26  ;;  %742 = vrot.lane.b32.xlu0 %v6099_v19, %s5776_s26 }
  0xa3   : > { %v6108_v22 = vpop.permute.xlu1 %560  ;;  %v6110_v23 = vpop.permute.xlu0 %558 }
  0xa5   : > { %787 = vrot.lane.b32.xlu1 %v5914_v38, %s5777_s27  ;;  %785 = vrot.lane.b32.xlu0 %v5917_v39, %s5777_s27 }
  0xa7   : > { %v6116_v24 = vpop.permute.xlu1 %564  ;;  %v6118_v25 = vpop.permute.xlu0 %562 }
  0xa8   : > { %10706 = vst [vmem:[#allocation3_spill] sm:$0xff] %v6116_v24  ;;  %10707 = vst [vmem:[#allocation4_spill] sm:$0xff] %v6118_v25 }
  0xa9   : > { %791 = vrot.lane.b32.xlu1 %v5924_v40, %s5777_s27  ;;  %789 = vrot.lane.b32.xlu0 %v5927_v41, %s5777_s27 }
  0xab   : > { %v6124_v26 = vpop.permute.xlu1 %568  ;;  %v6126_v27 = vpop.permute.xlu0 %566 }
  0xac   : > { %10708 = vst [vmem:[#allocation5_spill] sm:$0xff] %v6124_v26  ;;  %10709 = vst [vmem:[#allocation6_spill] sm:$0xff] %v6126_v27 }
  0xad   : > { %795 = vrot.lane.b32.xlu1 %v5934_v42, %s5777_s27  ;;  %793 = vrot.lane.b32.xlu0 %v5937_v43, %s5777_s27 }
  0xaf   : > { %v6132_v28 = vpop.permute.xlu1 %572  ;;  %v6134_v29 = vpop.permute.xlu0 %570 }
  0xb0   : > { %10710 = vst [vmem:[#allocation7_spill] sm:$0xff] %v6132_v28  ;;  %10711 = vst [vmem:[#allocation8_spill] sm:$0xff] %v6134_v29  ;;  %v465_v29 = vld [vmem:[%s5835_s24 + $0x5e] sm:$0xff] }
  0xb1   : > { %799 = vrot.lane.b32.xlu1 %v5944_v44, %s5777_s27  ;;  %797 = vrot.lane.b32.xlu0 %v5947_v45, %s5777_s27 }
  0xb3   : > { %v6140_v30 = vpop.permute.xlu1 %576  ;;  %v6142_v31 = vpop.permute.xlu0 %574 }
  0xb4   : > { %10712 = vst [vmem:[#allocation9_spill] sm:$0xff] %v6140_v30  ;;  %10713 = vst [vmem:[#allocation10_spill] sm:$0xff] %v6142_v31  ;;  %v464_v31 = vld [vmem:[%s5835_s24 + $0x56] sm:$0xff] }
  0xb5   : > { %803 = vrot.lane.b32.xlu1 %v5954_v46, %s5777_s27  ;;  %801 = vrot.lane.b32.xlu0 %v5957_v47, %s5777_s27 }
  0xb7   : > { %v6148_v32 = vpop.permute.xlu1 %580  ;;  %v6150_v33 = vpop.permute.xlu0 %578 }
  0xb8   : > { %10714 = vst [vmem:[#allocation11_spill] sm:$0xff] %v6148_v32  ;;  %10715 = vst [vmem:[#allocation12_spill] sm:$0xff] %v6150_v33 }
  0xb9   : > { %807 = vrot.lane.b32.xlu1 %v5964_v48, %s5777_s27  ;;  %805 = vrot.lane.b32.xlu0 %v5967_v49, %s5777_s27 }
  0xbb   : > { %v6156_v34 = vpop.permute.xlu1 %584  ;;  %v6158_v35 = vpop.permute.xlu0 %582 }
  0xbc   : > { %10716 = vst [vmem:[#allocation13_spill] sm:$0xff] %v6156_v34  ;;  %10717 = vst [vmem:[#allocation14_spill] sm:$0xff] %v6158_v35 }
  0xbd   : > { %811 = vrot.lane.b32.xlu1 %v5974_v50, %s5777_s27  ;;  %809 = vrot.lane.b32.xlu0 %v5977_v51, %s5777_s27 }
  0xbf   : > { %v6164_v36 = vpop.permute.xlu1 %588  ;;  %v6166_v37 = vpop.permute.xlu0 %586 }
  0xc0   : > { %10718 = vst [vmem:[#allocation15_spill] sm:$0xff] %v6164_v36  ;;  %10719 = vst [vmem:[#allocation16_spill] sm:$0xff] %v6166_v37 }
  0xc1   : > { %815 = vrot.lane.b32.xlu1 %v5984_v52, %s5777_s27  ;;  %813 = vrot.lane.b32.xlu0 %v5987_v53, %s5777_s27 }
  0xc3   : > { %v6172_v38 = vpop.permute.xlu1 %592  ;;  %v6174_v39 = vpop.permute.xlu0 %590 }
  0xc4   : > { %10720 = vst [vmem:[#allocation17_spill] sm:$0xff] %v6172_v38  ;;  %10721 = vst [vmem:[#allocation18_spill] sm:$0xff] %v6174_v39  ;;  %v461_v39 = vld [vmem:[%s5835_s24 + $0x3e] sm:$0xff] }
  0xc5   : > { %819 = vrot.lane.b32.xlu1 %v5994_v54, %s5777_s27  ;;  %817 = vrot.lane.b32.xlu0 %v5997_v55, %s5777_s27  ;;  %v347_v54 = vld [vmem:[%s5835_s24 + $0x13] sm:$0xff] }
  0xc7   : > { %v6180_v40 = vpop.permute.xlu1 %596  ;;  %v6182_v41 = vpop.permute.xlu0 %594 }
  0xc8   : > { %10722 = vst [vmem:[#allocation19_spill] sm:$0xff] %v6180_v40  ;;  %10723 = vst [vmem:[#allocation20_spill] sm:$0xff] %v6182_v41 }
  0xc9   : > { %823 = vrot.lane.b32.xlu1 %v6004_v56, %s5777_s27  ;;  %821 = vrot.lane.b32.xlu0 %v6007_v57, %s5777_s27  ;;  %v1875_v57 = vld [vmem:[%s10687_s1] sm:$0xff] }
  0xcb   : > { %v6188_v42 = vpop.permute.xlu1 %600  ;;  %v6190_v43 = vpop.permute.xlu0 %598 }
  0xcc   : > { %10724 = vst [vmem:[#allocation21_spill] sm:$0xff] %v6188_v42  ;;  %10725 = vst [vmem:[#allocation22_spill] sm:$0xff] %v6190_v43 }
  0xcd   : > { %827 = vrot.lane.b32.xlu1 %v6014_v58, %s5777_s27  ;;  %825 = vrot.lane.b32.xlu0 %v6017_v59, %s5777_s27  ;;  %v1876_v58 = vld [vmem:[%s10687_s1 + $0x8] sm:$0xff] }
  0xce   : > { %v5358_v59 = vpack.c.bf16 %v1876_v58, %v1875_v57  ;;  %v1879_v57 = vld [vmem:[%s10687_s1 + $0x20] sm:$0xf] }
  0xcf   : > { %v6196_v44 = vpop.permute.xlu1 %676  ;;  %v6198_v45 = vpop.permute.xlu0 %674 }
  0xd0   : > { %5359 = vmatprep.subr.bf16.mxu0 %v5358_v59 }
  0xd1   : > { %831 = vrot.lane.b32.xlu1 %v6028_v62, %s5777_s27  ;;  %829 = vrot.lane.b32.xlu0 %v6031_v63, %s5777_s27  ;;  %v383_v62 = vld [vmem:[%s5835_s24 + $0x14] sm:$0xff] }
  0xd2   : > { %v348_v63 = vld [vmem:[%s5835_s24 + $0x1b] sm:$0xff]  ;;  %5361 = vmatpush3.bf16.msra.mxu0 %v5358_v59 }
  0xd3   : > { %v6204_v46 = vpop.permute.xlu1 %680  ;;  %v6206_v47 = vpop.permute.xlu0 %678 }
  0xd5   : > { %835 = vrot.lane.b32.xlu1 %v6042_v2, %s5777_s27  ;;  %833 = vrot.lane.b32.xlu0 %v6045_v3, %s5777_s27 }
  0xd7   : > { %v6212_v48 = vpop.permute.xlu1 %684  ;;  %v6214_v49 = vpop.permute.xlu0 %682 }
  0xd9   : > { %839 = vrot.lane.b32.xlu1 %v6056_v6, %s5777_s27  ;;  %837 = vrot.lane.b32.xlu0 %v6059_v7, %s5777_s27  ;;  %v1877_v6 = vld [vmem:[%s10687_s1 + $0x10] sm:$0xff]  ;;  %v1878_v7 = vld [vmem:[%s10687_s1 + $0x18] sm:$0xff] }
  0xdb   : > { %v6220_v50 = vpop.permute.xlu1 %688  ;;  %v6222_v51 = vpop.permute.xlu0 %686 }
  0xdd   : > { %843 = vrot.lane.b32.xlu1 %v6070_v10, %s5777_s27  ;;  %841 = vrot.lane.b32.xlu0 %v6073_v11, %s5777_s27  ;;  %v385_v10 = vld [vmem:[%s5835_s24 + $0x24] sm:$0xff]  ;;  %v384_v11 = vld [vmem:[%s5835_s24 + $0x1c] sm:$0xff] }
  0xdf   : > { %v6228_v52 = vpop.permute.xlu1 %692  ;;  %v6230_v53 = vpop.permute.xlu0 %690 }
  0xe1   : > { %847 = vrot.lane.b32.xlu1 %v6084_v14, %s5777_s27  ;;  %845 = vrot.lane.b32.xlu0 %v6087_v15, %s5777_s27  ;;  %v5362_v14 = vpack.c.bf16 %v1878_v7, %v1877_v6 }
  0xe3   : > { %v6237_v55 = vpop.permute.xlu1 %696  ;;  %v6239_v56 = vpop.permute.xlu0 %694  ;;  %5363 = vmatprep.subr.bf16.mxu0 %v5362_v14 }
  0xe4   : > { %5365 = vmatpush3.bf16.msra.mxu0 %v5362_v14  ;;  %v458_v14 = vld [vmem:[%s5835_s24 + $0x26] sm:$0xff] }
  0xe5   : > { %929 = vrot.lane.b32.xlu1 %v347_v54, %s5778_s7  ;;  %849 = vrot.lane.b32.xlu0 %v6099_v19, %s5777_s27  ;;  %v422_v19 = vld [vmem:[%s5835_s24 + $0x25] sm:$0xff] }
  0xe6   : > { %v386_v54 = vld [vmem:[%s5835_s24 + $0x2c] sm:$0xff]  ;;  %5302 = vmatprep.subr.msk.mxu0 %vm1996_vm0, %v1879_v57 }
  0xe7   : > { %v6252_v2 = vpop.permute.xlu1 %700  ;;  %v6254_v3 = vpop.permute.xlu0 %698 }
  0xe8   : > { %5303 = vmatpush3.msk.msra.mxu0 %vm1996_vm0, %v1879_v57  ;;  %v459_v57 = vld [vmem:[%s5835_s24 + $0x2e] sm:$0xff] }
  0xe9   : > { %1073 = vrot.lane.b32.xlu1 %v383_v62, %s5779_s10  ;;  %931 = vrot.lane.b32.xlu0 %v348_v63, %s5778_s7  ;;  %v423_v62 = vld [vmem:[%s5835_s24 + $0x2d] sm:$0xff]  ;;  %v349_v63 = vld [vmem:[%s5835_s24 + $0x23] sm:$0xff] }
  0xeb   : > { %v6266_v15 = vpop.permute.xlu1 %704  ;;  %v6268_v18 = vpop.permute.xlu0 %702 }
  0xec   : > { %10726 = vst [vmem:[#allocation23_spill] sm:$0xff] %v6266_v15 }
  0xed   : > { %1184 = vrot.lane.b32.xlu1 %v385_v10, %s5780_s13  ;;  %1075 = vrot.lane.b32.xlu0 %v384_v11, %s5779_s10  ;;  %v350_v11 = vld [vmem:[%s5835_s24 + $0x2b] sm:$0xff] }
  0xef   : > { %v6277_v58 = vpop.permute.xlu1 %708  ;;  %v6279_v59 = vpop.permute.xlu0 %706 }
  0xf0   : > { %10727 = vst [vmem:[#allocation24_spill] sm:$0xff] %v6277_v58  ;;  %10728 = vst [vmem:[#allocation25_spill] sm:$0xff] %v6279_v59  ;;  %v398_v59 = vld [vmem:[%s5835_s24 + $0x8c] sm:$0xff] }
  0xf1   : > { %1328 = vrot.lane.b32.xlu1 %v422_v19, %s5781_s16  ;;  %1186 = vrot.lane.b32.xlu0 %v386_v54, %s5780_s13 }
  0xf3   : > { %v6285_v6 = vpop.permute.xlu1 %712  ;;  %v6287_v7 = vpop.permute.xlu0 %710 }
  0xf4   : > { %10729 = vst [vmem:[#allocation26_spill] sm:$0xff] %v6285_v6  ;;  %10730 = vst [vmem:[#allocation27_spill] sm:$0xff] %v6287_v7 }
  0xf5   : > { %1330 = vrot.lane.b32.xlu1 %v423_v62, %s5781_s16  ;;  %933 = vrot.lane.b32.xlu0 %v349_v63, %s5778_s7  ;;  %v387_v63 = vld [vmem:[%s5835_s24 + $0x34] sm:$0xff] }
  0xf7   : > { %v6293_v43 = vpop.permute.xlu1 %716  ;;  %v6295_v19 = vpop.permute.xlu0 %714 }
  0xf8   : > { %10731 = vst [vmem:[#allocation28_spill] sm:$0xff] %v6293_v43  ;;  %10732 = vst [vmem:[#allocation29_spill] sm:$0xff] %v6295_v19  ;;  %v463_v19 = vld [vmem:[%s5835_s24 + $0x4e] sm:$0xff] }
  0xf9   : > { %935 = vrot.lane.b32.xlu1 %v350_v11, %s5778_s7  ;;  %1472 = vrot.lane.b32.xlu0 %v458_v14, %s5782_s17  ;;  %v424_v11 = vld [vmem:[%s5835_s24 + $0x35] sm:$0xff] }
  0xfa   : > { %v388_v14 = vld [vmem:[%s5835_s24 + $0x3c] sm:$0xff] }
  0xfb   : > { %v6300_v42 = vpop.permute.xlu1 %720  ;;  %v6302_v62 = vpop.permute.xlu0 %718 }
  0xfc   : > { %10733 = vst [vmem:[#allocation30_spill] sm:$0xff] %v6300_v42  ;;  %10734 = vst [vmem:[#allocation31_spill] sm:$0xff] %v6302_v62 }
  0xfd   : > { %1474 = vrot.lane.b32.xlu1 %v459_v57, %s5782_s17  ;;  %1077 = vrot.lane.b32.xlu0 %v385_v10, %s5779_s10  ;;  %v425_v10 = vld [vmem:[%s5835_s24 + $0x3d] sm:$0xff]  ;;  %v351_v57 = vld [vmem:[%s5835_s24 + $0x33] sm:$0xff] }
  0xff   : > { %v6307_v41 = vpop.permute.xlu1 %724  ;;  %v6309_v40 = vpop.permute.xlu0 %722 }
 0x100   : > { %10735 = vst [vmem:[#allocation32_spill] sm:$0xff] %v6307_v41  ;;  %10736 = vst [vmem:[#allocation33_spill] sm:$0xff] %v6309_v40 }
 0x101   : > { %1188 = vrot.lane.b32.xlu1 %v387_v63, %s5780_s13  ;;  %1079 = vrot.lane.b32.xlu0 %v386_v54, %s5779_s10  ;;  %v352_v54 = vld [vmem:[%s5835_s24 + $0x3b] sm:$0xff] }
 0x103   : > { %v6315_v42 = vpop.permute.xlu1 %728  ;;  %v6317_v62 = vpop.permute.xlu0 %726 }
 0x104   : > { %10737 = vst [vmem:[#allocation34_spill] sm:$0xff] %v6315_v42  ;;  %10738 = vst [vmem:[#allocation35_spill] sm:$0xff] %v6317_v62  ;;  %v460_v42 = vld [vmem:[%s5835_s24 + $0x36] sm:$0xff] }
 0x105   : > { %1332 = vrot.lane.b32.xlu1 %v424_v11, %s5781_s16  ;;  %1190 = vrot.lane.b32.xlu0 %v388_v14, %s5780_s13 }
 0x107   : > { %v6323_v40 = vpop.permute.xlu1 %732  ;;  %v6325_v41 = vpop.permute.xlu0 %730 }
 0x108   : > { %10739 = vst [vmem:[#allocation36_spill] sm:$0xff] %v6323_v40  ;;  %10740 = vst [vmem:[#allocation37_spill] sm:$0xff] %v6325_v41 }
 0x109   : > { %1334 = vrot.lane.b32.xlu1 %v425_v10, %s5781_s16  ;;  %937 = vrot.lane.b32.xlu0 %v351_v57, %s5778_s7  ;;  %v389_v57 = vld [vmem:[%s5835_s24 + $0x44] sm:$0xff] }
 0x10b   : > { %v6331_v62 = vpop.permute.xlu1 %736  ;;  %v6333_v11 = vpop.permute.xlu0 %734 }
 0x10c   : > { %10741 = vst [vmem:[#allocation38_spill] sm:$0xff] %v6331_v62  ;;  %10742 = vst [vmem:[#allocation39_spill] sm:$0xff] %v6333_v11  ;;  %v462_v62 = vld [vmem:[%s5835_s24 + $0x46] sm:$0xff] }
 0x10d   : > { %939 = vrot.lane.b32.xlu1 %v352_v54, %s5778_s7  ;;  %1476 = vrot.lane.b32.xlu0 %v460_v42, %s5782_s17  ;;  %v426_v42 = vld [vmem:[%s5835_s24 + $0x45] sm:$0xff] }
 0x10e   : > { %v390_v54 = vld [vmem:[%s5835_s24 + $0x4c] sm:$0xff] }
 0x10f   : > { %v6338_v40 = vpop.permute.xlu1 %740  ;;  %v6340_v10 = vpop.permute.xlu0 %738 }
 0x110   : > { %10743 = vst [vmem:[#allocation40_spill] sm:$0xff] %v6338_v40  ;;  %10744 = vst [vmem:[#allocation41_spill] sm:$0xff] %v6340_v10 }
 0x111   : > { %1478 = vrot.lane.b32.xlu1 %v461_v39, %s5782_s17  ;;  %1081 = vrot.lane.b32.xlu0 %v387_v63, %s5779_s10  ;;  %v427_v39 = vld [vmem:[%s5835_s24 + $0x4d] sm:$0xff]  ;;  %v353_v63 = vld [vmem:[%s5835_s24 + $0x43] sm:$0xff] }
 0x113   : > { %v6345_v41 = vpop.permute.xlu1 %744  ;;  %v6347_v11 = vpop.permute.xlu0 %742 }
 0x114   : > { %10745 = vst [vmem:[#allocation42_spill] sm:$0xff] %v6345_v41  ;;  %10746 = vst [vmem:[#allocation43_spill] sm:$0xff] %v6347_v11 }
 0x115   : > { %1192 = vrot.lane.b32.xlu1 %v389_v57, %s5780_s13  ;;  %1083 = vrot.lane.b32.xlu0 %v388_v14, %s5779_s10  ;;  %v354_v14 = vld [vmem:[%s5835_s24 + $0x4b] sm:$0xff] }
 0x117   : > { %v6353_v40 = vpop.permute.xlu1 %787  ;;  %v6355_v10 = vpop.permute.xlu0 %785 }
 0x119   : > { %1336 = vrot.lane.b32.xlu1 %v426_v42, %s5781_s16  ;;  %1194 = vrot.lane.b32.xlu0 %v390_v54, %s5780_s13 }
 0x11b   : > { %v6361_v11 = vpop.permute.xlu1 %791  ;;  %v6363_v41 = vpop.permute.xlu0 %789 }
 0x11d   : > { %1338 = vrot.lane.b32.xlu1 %v427_v39, %s5781_s16  ;;  %941 = vrot.lane.b32.xlu0 %v353_v63, %s5778_s7  ;;  %v391_v63 = vld [vmem:[%s5835_s24 + $0x54] sm:$0xff] }
 0x11f   : > { %v6369_v43 = vpop.permute.xlu1 %795  ;;  %v6371_v42 = vpop.permute.xlu0 %793 }
 0x121   : > { %943 = vrot.lane.b32.xlu1 %v354_v14, %s5778_s7  ;;  %1480 = vrot.lane.b32.xlu0 %v462_v62, %s5782_s17  ;;  %v428_v62 = vld [vmem:[%s5835_s24 + $0x55] sm:$0xff] }
 0x122   : > { %v392_v14 = vld [vmem:[%s5835_s24 + $0x5c] sm:$0xff] }
 0x123   : > { %v6376_v38 = vpop.permute.xlu1 %799  ;;  %v6378_v39 = vpop.permute.xlu0 %797 }
 0x125   : > { %1482 = vrot.lane.b32.xlu1 %v463_v19, %s5782_s17  ;;  %1085 = vrot.lane.b32.xlu0 %v389_v57, %s5779_s10  ;;  %v429_v19 = vld [vmem:[%s5835_s24 + $0x5d] sm:$0xff]  ;;  %v355_v57 = vld [vmem:[%s5835_s24 + $0x53] sm:$0xff] }
 0x127   : > { %v6383_v37 = vpop.permute.xlu1 %803  ;;  %v6385_v36 = vpop.permute.xlu0 %801 }
 0x129   : > { %1196 = vrot.lane.b32.xlu1 %v391_v63, %s5780_s13  ;;  %1087 = vrot.lane.b32.xlu0 %v390_v54, %s5779_s10  ;;  %v356_v54 = vld [vmem:[%s5835_s24 + $0x5b] sm:$0xff] }
 0x12b   : > { %v6391_v35 = vpop.permute.xlu1 %807  ;;  %v6393_v34 = vpop.permute.xlu0 %805 }
 0x12d   : > { %1340 = vrot.lane.b32.xlu1 %v428_v62, %s5781_s16  ;;  %1198 = vrot.lane.b32.xlu0 %v392_v14, %s5780_s13 }
 0x12f   : > { %v6399_v33 = vpop.permute.xlu1 %811  ;;  %v6401_v32 = vpop.permute.xlu0 %809 }
 0x131   : > { %1342 = vrot.lane.b32.xlu1 %v429_v19, %s5781_s16  ;;  %945 = vrot.lane.b32.xlu0 %v355_v57, %s5778_s7  ;;  %v393_v57 = vld [vmem:[%s5835_s24 + $0x64] sm:$0xff] }
 0x133   : > { %v6407_v30 = vpop.permute.xlu1 %815  ;;  %v6409_v62 = vpop.permute.xlu0 %813 }
 0x134   : > { %10747 = vst [vmem:[#allocation44_spill] sm:$0xff] %v6407_v30 }
 0x135   : > { %947 = vrot.lane.b32.xlu1 %v356_v54, %s5778_s7  ;;  %1484 = vrot.lane.b32.xlu0 %v464_v31, %s5782_s17  ;;  %v430_v31 = vld [vmem:[%s5835_s24 + $0x65] sm:$0xff] }
 0x136   : > { %v394_v54 = vld [vmem:[%s5835_s24 + $0x6c] sm:$0xff] }
 0x137   : > { %v6414_v28 = vpop.permute.xlu1 %819  ;;  %v6416_v19 = vpop.permute.xlu0 %817 }
 0x138   : > { %10748 = vst [vmem:[#allocation45_spill] sm:$0xff] %v6414_v28  ;;  %10749 = vst [vmem:[#allocation46_spill] sm:$0xff] %v6416_v19  ;;  %v467_v28 = vld [vmem:[%s5835_s24 + $0x6e] sm:$0xff] }
 0x139   : > { %1486 = vrot.lane.b32.xlu1 %v465_v29, %s5782_s17  ;;  %1089 = vrot.lane.b32.xlu0 %v391_v63, %s5779_s10  ;;  %v431_v29 = vld [vmem:[%s5835_s24 + $0x6d] sm:$0xff]  ;;  %v357_v63 = vld [vmem:[%s5835_s24 + $0x63] sm:$0xff] }
 0x13b   : > { %v6421_v6 = vpop.permute.xlu1 %823  ;;  %v6423_v26 = vpop.permute.xlu0 %821 }
 0x13c   : > { %10750 = vst [vmem:[#allocation47_spill] sm:$0xff] %v6421_v6  ;;  %10751 = vst [vmem:[#allocation48_spill] sm:$0xff] %v6423_v26 }
 0x13d   : > { %1200 = vrot.lane.b32.xlu1 %v393_v57, %s5780_s13  ;;  %1091 = vrot.lane.b32.xlu0 %v392_v14, %s5779_s10  ;;  %v358_v14 = vld [vmem:[%s5835_s24 + $0x6b] sm:$0xff] }
 0x13f   : > { %v6429_v7 = vpop.permute.xlu1 %827  ;;  %v6431_v27 = vpop.permute.xlu0 %825 }
 0x140   : > { %10752 = vst [vmem:[#allocation49_spill] sm:$0xff] %v6429_v7  ;;  %10753 = vst [vmem:[#allocation50_spill] sm:$0xff] %v6431_v27  ;;  %v466_v7 = vld [vmem:[%s5835_s24 + $0x66] sm:$0xff] }
 0x141   : > { %1344 = vrot.lane.b32.xlu1 %v430_v31, %s5781_s16  ;;  %1202 = vrot.lane.b32.xlu0 %v394_v54, %s5780_s13 }
 0x143   : > { %v6437_v6 = vpop.permute.xlu1 %831  ;;  %v6439_v26 = vpop.permute.xlu0 %829 }
 0x144   : > { %10754 = vst [vmem:[#allocation51_spill] sm:$0xff] %v6437_v6  ;;  %10755 = vst [vmem:[#allocation52_spill] sm:$0xff] %v6439_v26 }
 0x145   : > { %1346 = vrot.lane.b32.xlu1 %v431_v29, %s5781_s16  ;;  %949 = vrot.lane.b32.xlu0 %v357_v63, %s5778_s7  ;;  %v395_v63 = vld [vmem:[%s5835_s24 + $0x74] sm:$0xff] }
 0x147   : > { %v6445_v27 = vpop.permute.xlu1 %835  ;;  %v6447_v31 = vpop.permute.xlu0 %833 }
 0x148   : > { %10756 = vst [vmem:[#allocation53_spill] sm:$0xff] %v6445_v27  ;;  %10757 = vst [vmem:[#allocation54_spill] sm:$0xff] %v6447_v31 }
 0x149   : > { %951 = vrot.lane.b32.xlu1 %v358_v14, %s5778_s7  ;;  %1488 = vrot.lane.b32.xlu0 %v466_v7, %s5782_s17  ;;  %v432_v7 = vld [vmem:[%s5835_s24 + $0x75] sm:$0xff] }
 0x14a   : > { %v396_v14 = vld [vmem:[%s5835_s24 + $0x7c] sm:$0xff] }
 0x14b   : > { %v6452_v6 = vpop.permute.xlu1 %839  ;;  %v6454_v29 = vpop.permute.xlu0 %837 }
 0x14c   : > { %10758 = vst [vmem:[#allocation55_spill] sm:$0xff] %v6452_v6  ;;  %10759 = vst [vmem:[#allocation56_spill] sm:$0xff] %v6454_v29 }
 0x14d   : > { %1490 = vrot.lane.b32.xlu1 %v467_v28, %s5782_s17  ;;  %1093 = vrot.lane.b32.xlu0 %v393_v57, %s5779_s10  ;;  %v433_v28 = vld [vmem:[%s5835_s24 + $0x7d] sm:$0xff]  ;;  %v359_v57 = vld [vmem:[%s5835_s24 + $0x73] sm:$0xff] }
 0x14f   : > { %v6459_v26 = vpop.permute.xlu1 %843  ;;  %v6461_v31 = vpop.permute.xlu0 %841 }
 0x150   : > { %10760 = vst [vmem:[#allocation57_spill] sm:$0xff] %v6459_v26  ;;  %10761 = vst [vmem:[#allocation58_spill] sm:$0xff] %v6461_v31 }
 0x151   : > { %1204 = vrot.lane.b32.xlu1 %v395_v63, %s5780_s13  ;;  %1095 = vrot.lane.b32.xlu0 %v394_v54, %s5779_s10  ;;  %v360_v54 = vld [vmem:[%s5835_s24 + $0x7b] sm:$0xff] }
 0x153   : > { %v6467_v6 = vpop.permute.xlu1 %847  ;;  %v6469_v29 = vpop.permute.xlu0 %845 }
 0x154   : > { %10762 = vst [vmem:[#allocation59_spill] sm:$0xff] %v6467_v6  ;;  %10763 = vst [vmem:[#allocation60_spill] sm:$0xff] %v6469_v29  ;;  %v468_v6 = vld [vmem:[%s5835_s24 + $0x76] sm:$0xff] }
 0x155   : > { %1348 = vrot.lane.b32.xlu1 %v432_v7, %s5781_s16  ;;  %1206 = vrot.lane.b32.xlu0 %v396_v14, %s5780_s13  ;;  %v469_v7 = vld [vmem:[%s5835_s24 + $0x7e] sm:$0xff] }
 0x157   : > { %v930_v31 = vpop.permute.xlu1 %929  ;;  %v6475_v26 = vpop.permute.xlu0 %849 }
 0x158   : > { %10764 = vst [vmem:[#allocation61_spill] sm:$0xff] %v6475_v26 }
 0x159   : > { %1350 = vrot.lane.b32.xlu1 %v433_v28, %s5781_s16  ;;  %953 = vrot.lane.b32.xlu0 %v359_v57, %s5778_s7  ;;  %v236_v28 = vld [vmem:[%s5835_s24] sm:$0xff] }
 0x15a   : > { %v397_v57 = vld [vmem:[%s5835_s24 + $0x84] sm:$0xff] }
 0x15b   : > { %v1074_v27 = vpop.permute.xlu1 %1073  ;;  %v932_v58 = vpop.permute.xlu0 %931 }
 0x15d   : > { %955 = vrot.lane.b32.xlu1 %v360_v54, %s5778_s7  ;;  %1492 = vrot.lane.b32.xlu0 %v468_v6, %s5782_s17  ;;  %v1581_v6 = vsel %vm10692_vm2, %v236_v28, %v6021_v61  ;;  %v237_v54 = vld [vmem:[%s5835_s24 + $0x8] sm:$0xff] }
 0x15f   : > { %v1185_v29 = vpop.permute.xlu1 %1184  ;;  %v1076_v24 = vpop.permute.xlu0 %1075 }
 0x161   : > { %1494 = vrot.lane.b32.xlu1 %v469_v7, %s5782_s17  ;;  %1097 = vrot.lane.b32.xlu0 %v395_v63, %s5779_s10  ;;  %v1618_v63 = vsel %vm10696_vm1, %v1581_v6, %v6198_v45  ;;  %v434_v7 = vld [vmem:[%s5835_s24 + $0x85] sm:$0xff]  ;;  %v435_v6 = vld [vmem:[%s5835_s24 + $0x8d] sm:$0xff] }
 0x162   : > { %v1655_v25 = vsel %vm10695_vm3, %v1618_v63, %v6355_v10 }
 0x163   : > { %v1329_v26 = vpop.permute.xlu1 %1328  ;;  %v1187_v19 = vpop.permute.xlu0 %1186  ;;  %v1692_v28 = vsel %vm10694_vm4, %v1655_v25, %v930_v31  ;;  %v361_v25 = vld [vmem:[%s5835_s24 + $0x83] sm:$0xff] }
 0x164   : > { %v1729_v15 = vsel %vm1728_vm5, %v1692_v28, %v1074_v27 }
 0x165   : > { %1208 = vrot.lane.b32.xlu1 %v397_v57, %s5780_s13  ;;  %1099 = vrot.lane.b32.xlu0 %v396_v14, %s5779_s10  ;;  %v1582_v14 = vsel %vm10692_vm2, %v237_v54, %v6035_v1  ;;  %v1765_v10 = vsel %vm10700_vm6, %v1729_v15, %v1185_v29 }
 0x166   : > { %v1619_v45 = vsel %vm10696_vm1, %v1582_v14, %v6196_v44  ;;  %v1802_v1 = vsel %vm10699_vm7, %v1765_v10, %v1329_v26  ;;  %v362_v26 = vld [vmem:[%s5835_s24 + $0x8b] sm:$0xff]  ;;  %v399_v10 = vld [vmem:[%s5835_s24 + $0x94] sm:$0xff] }
 0x167   : > { %v1331_v30 = vpop.permute.xlu1 %1330  ;;  %v934_v61 = vpop.permute.xlu0 %933  ;;  %v1656_v31 = vsel %vm10695_vm3, %v1619_v45, %v6353_v40  ;;  %v470_v40 = vld [vmem:[%s5835_s24 + $0x86] sm:$0xff] }
 0x168   : > { %v1693_v63 = vsel %vm10694_vm4, %v1656_v31, %v932_v58 }
 0x169   : > { %1352 = vrot.lane.b32.xlu1 %v434_v7, %s5781_s16  ;;  %1210 = vrot.lane.b32.xlu0 %v398_v59, %s5780_s13  ;;  %v1730_v44 = vsel %vm1728_vm5, %v1693_v63, %v1076_v24  ;;  %v471_v24 = vld [vmem:[%s5835_s24 + $0x8e] sm:$0xff] }
 0x16a   : > { %v1766_v15 = vsel %vm10700_vm6, %v1730_v44, %v1187_v19  ;;  %v436_v63 = vld [vmem:[%s5835_s24 + $0x95] sm:$0xff] }
 0x16b   : > { %v936_v27 = vpop.permute.xlu1 %935  ;;  %v1473_v54 = vpop.permute.xlu0 %1472  ;;  %v1803_v29 = vsel %vm10699_vm7, %v1766_v15, %v1331_v30  ;;  %v238_v30 = vld [vmem:[%s5835_s24 + $0x10] sm:$0xff] }
 0x16c   : > { %v1839_v7 = vsel %vm10693_vm8, %v1802_v1, %v1473_v54  ;;  %v1583_v31 = vsel %vm10692_vm2, %v238_v30, %v6019_v60  ;;  %v239_v1 = vld [vmem:[%s5835_s24 + $0x18] sm:$0xff] }
 0x16d   : > { %1354 = vrot.lane.b32.xlu1 %v435_v6, %s5781_s16  ;;  %957 = vrot.lane.b32.xlu0 %v361_v25, %s5778_s7  ;;  %v1620_v54 = vsel %vm10696_vm1, %v1583_v31, %v6206_v47  ;;  %v1584_v60 = vsel %vm10692_vm2, %v239_v1, %v6033_v0 }
 0x16e   : > { %5304 = vmatprep.mubr.msk.f32.mxu0 %vm10698_vm9, %v1839_v7  ;;  %v400_v7 = vld [vmem:[%s5835_s24 + $0x9c] sm:$0xff]  ;;  %v1621_v47 = vsel %vm10696_vm1, %v1584_v60, %v6204_v46 }
 0x16f   : > { %v1475_v58 = vpop.permute.xlu1 %1474  ;;  %v1078_v28 = vpop.permute.xlu0 %1077 }
 0x170   : > { %v1840_v14 = vsel %vm10693_vm8, %v1803_v29, %v1475_v58  ;;  %v363_v29 = vld [vmem:[%s5835_s24 + $0x93] sm:$0xff] }
 0x171   : > { %959 = vrot.lane.b32.xlu1 %v362_v26, %s5778_s7  ;;  %1496 = vrot.lane.b32.xlu0 %v470_v40, %s5782_s17 }
 0x172   : > { %5305 = vmatmul.mubr.msk.f32.vlgmr.msra.gmra.mrb[0].mxu0 %vm10698_vm9, %v1840_v14 }
 0x173   : > { %v1189_v19 = vpop.permute.xlu1 %1188  ;;  %v1080_v45 = vpop.permute.xlu0 %1079 }
 0x175   : > { %1498 = vrot.lane.b32.xlu1 %v471_v24, %s5782_s17  ;;  %1101 = vrot.lane.b32.xlu0 %v397_v57, %s5779_s10  ;;  %v1657_v57 = vsel %vm10695_vm3, %v1620_v54, %v6363_v41 }
 0x176   : > { %v1694_v26 = vsel %vm10694_vm4, %v1657_v57, %v934_v61  ;;  %v1658_v61 = vsel %vm10695_vm3, %v1621_v47, %v6361_v11  ;;  %v364_v11 = vld [vmem:[%s5835_s24 + $0x9b] sm:$0xff]  ;;  %v401_v57 = vld [vmem:[%s5835_s24 + $0xa4] sm:$0xff] }
 0x177   : > { %v1333_v6 = vpop.permute.xlu1 %1332  ;;  %v1191_v25 = vpop.permute.xlu0 %1190  ;;  %v1731_v40 = vsel %vm1728_vm5, %v1694_v26, %v1078_v28  ;;  %v1695_v14 = vsel %vm10694_vm4, %v1658_v61, %v936_v27 }
 0x178   : > { %v1767_v41 = vsel %vm10700_vm6, %v1731_v40, %v1189_v19  ;;  %v1732_v30 = vsel %vm1728_vm5, %v1695_v14, %v1080_v45  ;;  %v472_v19 = vld [vmem:[%s5835_s24 + $0x96] sm:$0xff]  ;;  %v473_v45 = vld [vmem:[%s5835_s24 + $0x9e] sm:$0xff]  ;;  %v241_v40 = vld [vmem:[%s5835_s24 + $0x28] sm:$0xff] }
 0x179   : > { %1212 = vrot.lane.b32.xlu1 %v399_v10, %s5780_s13  ;;  %1103 = vrot.lane.b32.xlu0 %v398_v59, %s5779_s10  ;;  %v437_v59 = vld [vmem:[%s5835_s24 + $0x9d] sm:$0xff]  ;;  %v1804_v0 = vsel %vm10699_vm7, %v1767_v41, %v1333_v6  ;;  %v1768_v46 = vsel %vm10700_vm6, %v1732_v30, %v1191_v25  ;;  %v438_v41 = vld [vmem:[%s5835_s24 + $0xa5] sm:$0xff] }
 0x17a   : > { %v365_v14 = vld [vmem:[%s5835_s24 + $0xa3] sm:$0xff] }
 0x17b   : > { %v1335_v44 = vpop.permute.xlu1 %1334  ;;  %v938_v15 = vpop.permute.xlu0 %937 }
 0x17c   : > { %v1805_v6 = vsel %vm10699_vm7, %v1768_v46, %v1335_v44 }
 0x17d   : > { %1356 = vrot.lane.b32.xlu1 %v436_v63, %s5781_s16  ;;  %1214 = vrot.lane.b32.xlu0 %v400_v7, %s5780_s13  ;;  %v240_v63 = vld [vmem:[%s5835_s24 + $0x20] sm:$0xff] }
 0x17e   : > { %v1585_v60 = vsel %vm10692_vm2, %v240_v63, %v6049_v5  ;;  %v1586_v5 = vsel %vm10692_vm2, %v241_v40, %v6047_v4  ;;  %v242_v63 = vld [vmem:[%s5835_s24 + $0x30] sm:$0xff] }
 0x17f   : > { %v940_v58 = vpop.permute.xlu1 %939  ;;  %v1477_v28 = vpop.permute.xlu0 %1476  ;;  %v1622_v47 = vsel %vm10696_vm1, %v1585_v60, %v6214_v49  ;;  %v1623_v49 = vsel %vm10696_vm1, %v1586_v5, %v6212_v48  ;;  %v1587_v40 = vsel %vm10692_vm2, %v242_v63, %v6063_v9 }
 0x180   : > { %v1841_v24 = vsel %vm10693_vm8, %v1804_v0, %v1477_v28 }
 0x181   : > { %1358 = vrot.lane.b32.xlu1 %v437_v59, %s5781_s16  ;;  %961 = vrot.lane.b32.xlu0 %v363_v29, %s5778_s7  ;;  %v402_v59 = vld [vmem:[%s5835_s24 + $0xac] sm:$0xff] }
 0x182   : > { %5307 = vmatprep.mubr.msk.f32.mxu0 %vm10698_vm9, %v1841_v24 }
 0x183   : > { %v1479_v27 = vpop.permute.xlu1 %1478  ;;  %v1082_v31 = vpop.permute.xlu0 %1081 }
 0x184   : > { %v1842_v1 = vsel %vm10693_vm8, %v1805_v6, %v1479_v27  ;;  %v474_v6 = vld [vmem:[%s5835_s24 + $0xa6] sm:$0xff] }
 0x185   : > { %963 = vrot.lane.b32.xlu1 %v364_v11, %s5778_s7  ;;  %1500 = vrot.lane.b32.xlu0 %v472_v19, %s5782_s17 }
 0x186   : > { %5308 = vmatmul.mubr.msk.f32.gmra.mrb[2].mxu0 %vm10698_vm9, %v1842_v1 }
 0x187   : > { %v1193_v25 = vpop.permute.xlu1 %1192  ;;  %v1084_v54 = vpop.permute.xlu0 %1083 }
 0x189   : > { %1502 = vrot.lane.b32.xlu1 %v473_v45, %s5782_s17  ;;  %1105 = vrot.lane.b32.xlu0 %v399_v10, %s5779_s10  ;;  %v1659_v10 = vsel %vm10695_vm3, %v1622_v47, %v6371_v42  ;;  %v475_v45 = vld [vmem:[%s5835_s24 + $0xae] sm:$0xff]  ;;  %v243_v47 = vld [vmem:[%s5835_s24 + $0x38] sm:$0xff] }
 0x18a   : > { %v1696_v0 = vsel %vm10694_vm4, %v1659_v10, %v938_v15  ;;  %v1660_v15 = vsel %vm10695_vm3, %v1623_v49, %v6369_v43  ;;  %v366_v43 = vld [vmem:[%s5835_s24 + $0xab] sm:$0xff]  ;;  %v440_v10 = vld [vmem:[%s5835_s24 + $0xb5] sm:$0xff]  ;;  %v1588_v9 = vsel %vm10692_vm2, %v243_v47, %v6061_v8 }
 0x18b   : > { %v1337_v44 = vpop.permute.xlu1 %1336  ;;  %v1195_v26 = vpop.permute.xlu0 %1194  ;;  %v1733_v28 = vsel %vm1728_vm5, %v1696_v0, %v1082_v31  ;;  %v1697_v46 = vsel %vm10694_vm4, %v1660_v15, %v940_v58 }
 0x18c   : > { %v1769_v42 = vsel %vm10700_vm6, %v1733_v28, %v1193_v25  ;;  %v1734_v19 = vsel %vm1728_vm5, %v1697_v46, %v1084_v54  ;;  %v476_v46 = vld [vmem:[%s5835_s24 + $0xb6] sm:$0xff] }
 0x18d   : > { %1216 = vrot.lane.b32.xlu1 %v401_v57, %s5780_s13  ;;  %1107 = vrot.lane.b32.xlu0 %v400_v7, %s5779_s10  ;;  %v439_v7 = vld [vmem:[%s5835_s24 + $0xad] sm:$0xff]  ;;  %v1806_v4 = vsel %vm10699_vm7, %v1769_v42, %v1337_v44  ;;  %v1770_v48 = vsel %vm10700_vm6, %v1734_v19, %v1195_v26 }
 0x18e   : > { %v403_v44 = vld [vmem:[%s5835_s24 + $0xb4] sm:$0xff] }
 0x18f   : > { %v1339_v29 = vpop.permute.xlu1 %1338  ;;  %v942_v61 = vpop.permute.xlu0 %941  ;;  %v367_v42 = vld [vmem:[%s5835_s24 + $0xb3] sm:$0xff] }
 0x190   : > { %v1807_v27 = vsel %vm10699_vm7, %v1770_v48, %v1339_v29  ;;  %v404_v29 = vld [vmem:[%s5835_s24 + $0xbc] sm:$0xff] }
 0x191   : > { %1360 = vrot.lane.b32.xlu1 %v438_v41, %s5781_s16  ;;  %1218 = vrot.lane.b32.xlu0 %v402_v59, %s5780_s13  ;;  %v1624_v41 = vsel %vm10696_vm1, %v1587_v40, %v6222_v51  ;;  %v1625_v51 = vsel %vm10696_vm1, %v1588_v9, %v6220_v50 }
 0x193   : > { %v944_v24 = vpop.permute.xlu1 %943  ;;  %v1481_v30 = vpop.permute.xlu0 %1480 }
 0x194   : > { %v1843_v11 = vsel %vm10693_vm8, %v1806_v4, %v1481_v30 }
 0x195   : > { %1362 = vrot.lane.b32.xlu1 %v439_v7, %s5781_s16  ;;  %965 = vrot.lane.b32.xlu0 %v365_v14, %s5778_s7 }
 0x196   : > { %5310 = vmatprep.mubr.msk.f32.mxu0 %vm10698_vm9, %v1843_v11 }
 0x197   : > { %v1483_v58 = vpop.permute.xlu1 %1482  ;;  %v1086_v31 = vpop.permute.xlu0 %1085 }
 0x198   : > { %v1844_v1 = vsel %vm10693_vm8, %v1807_v27, %v1483_v58  ;;  %v244_v58 = vld [vmem:[%s5835_s24 + $0x40] sm:$0xff] }
 0x199   : > { %967 = vrot.lane.b32.xlu1 %v366_v43, %s5778_s7  ;;  %1504 = vrot.lane.b32.xlu0 %v474_v6, %s5782_s17  ;;  %v477_v43 = vld [vmem:[%s5835_s24 + $0xbe] sm:$0xff] }
 0x19a   : > { %5311 = vmatmul.mubr.msk.f32.gmra.mrb[4].mxu0 %vm10698_vm9, %v1844_v1 }
 0x19b   : > { %v1197_v25 = vpop.permute.xlu1 %1196  ;;  %v1088_v54 = vpop.permute.xlu0 %1087 }
 0x19d   : > { %1506 = vrot.lane.b32.xlu1 %v475_v45, %s5782_s17  ;;  %1109 = vrot.lane.b32.xlu0 %v401_v57, %s5779_s10  ;;  %v1661_v57 = vsel %vm10695_vm3, %v1624_v41, %v6378_v39 }
 0x19e   : > { %v1698_v28 = vsel %vm10694_vm4, %v1661_v57, %v942_v61  ;;  %v1662_v61 = vsel %vm10695_vm3, %v1625_v51, %v6376_v38  ;;  %v368_v38 = vld [vmem:[%s5835_s24 + $0xbb] sm:$0xff]  ;;  %v369_v57 = vld [vmem:[%s5835_s24 + $0xc3] sm:$0xff] }
 0x19f   : > { %v1341_v26 = vpop.permute.xlu1 %1340  ;;  %v1199_v60 = vpop.permute.xlu0 %1198  ;;  %v1735_v49 = vsel %vm1728_vm5, %v1698_v28, %v1086_v31  ;;  %v1699_v15 = vsel %vm10694_vm4, %v1662_v61, %v944_v24  ;;  %v405_v31 = vld [vmem:[%s5835_s24 + $0xc4] sm:$0xff] }
 0x1a0   : > { %v1771_v39 = vsel %vm10700_vm6, %v1735_v49, %v1197_v25  ;;  %v1736_v30 = vsel %vm1728_vm5, %v1699_v15, %v1088_v54  ;;  %v1589_v25 = vsel %vm10692_vm2, %v244_v58, %v6077_v13  ;;  %v245_v54 = vld [vmem:[%s5835_s24 + $0x48] sm:$0xff] }
 0x1a1   : > { %1220 = vrot.lane.b32.xlu1 %v403_v44, %s5780_s13  ;;  %1111 = vrot.lane.b32.xlu0 %v402_v59, %s5779_s10  ;;  %v441_v59 = vld [vmem:[%s5835_s24 + $0xbd] sm:$0xff]  ;;  %v1808_v8 = vsel %vm10699_vm7, %v1771_v39, %v1341_v26  ;;  %v1772_v50 = vsel %vm10700_vm6, %v1736_v30, %v1199_v60  ;;  %v1626_v63 = vsel %vm10696_vm1, %v1589_v25, %v6230_v53  ;;  %v442_v26 = vld [vmem:[%s5835_s24 + $0xc5] sm:$0xff]  ;;  %v5783_v25 = vmov 0.0  }
 0x1a2   : > { %v406_v60 = vld [vmem:[%s5835_s24 + $0xcc] sm:$0xff]  ;;  %v1590_v13 = vsel %vm10692_vm2, %v245_v54, %v6075_v12  ;;  %v407_v30 = vld [vmem:[%s5835_s24 + $0xd4] sm:$0xff]  ;;  %228 = vst.msk [vmem:[#allocation2] sm:$0xff] %vm10700_vm6, %v5783_v25  ;;  %229 = vst.msk [vmem:[#allocation2 + $0x8] sm:$0xff] %vm10700_vm6, %v5783_v25 }
 0x1a3   : > { %v1343_v0 = vpop.permute.xlu1 %1342  ;;  %v946_v5 = vpop.permute.xlu0 %945  ;;  %v1627_v53 = vsel %vm10696_vm1, %v1590_v13, %v6228_v52  ;;  %v478_v39 = vld [vmem:[%s5835_s24 + $0xc6] sm:$0xff]  ;;  %231 = vst.msk [vmem:[#allocation2 + $0x10] sm:$0x7] %vm230_vm10, %v5783_v25 }
 0x1a4   : > { %v1809_v11 = vsel %vm10699_vm7, %v1772_v50, %v1343_v0  ;;  %v1664_v0 = vsel %vm10695_vm3, %v1627_v53, %v6383_v37  ;;  %v370_v37 = vld [vmem:[%s5835_s24 + $0xcb] sm:$0xff] }
 0x1a5   : > { %1364 = vrot.lane.b32.xlu1 %v440_v10, %s5781_s16  ;;  %1222 = vrot.lane.b32.xlu0 %v404_v29, %s5780_s13 }
 0x1a7   : > { %v948_v7 = vpop.permute.xlu1 %947  ;;  %v1485_v14 = vpop.permute.xlu0 %1484 }
 0x1a8   : > { %v1845_v4 = vsel %vm10693_vm8, %v1808_v8, %v1485_v14  ;;  %v1701_v9 = vsel %vm10694_vm4, %v1664_v0, %v948_v7  ;;  %v479_v7 = vld [vmem:[%s5835_s24 + $0xce] sm:$0xff]  ;;  %v248_v0 = vld [vmem:[%s5835_s24 + $0x60] sm:$0xff] }
 0x1a9   : > { %1366 = vrot.lane.b32.xlu1 %v441_v59, %s5781_s16  ;;  %969 = vrot.lane.b32.xlu0 %v367_v42, %s5778_s7 }
 0x1aa   : > { %5313 = vmatprep.mubr.msk.f32.mxu0 %vm10698_vm9, %v1845_v4  ;;  %v246_v4 = vld [vmem:[%s5835_s24 + $0x50] sm:$0xff] }
 0x1ab   : > { %v1487_v24 = vpop.permute.xlu1 %1486  ;;  %v1090_v19 = vpop.permute.xlu0 %1089 }
 0x1ac   : > { %v1846_v48 = vsel %vm10693_vm8, %v1809_v11, %v1487_v24  ;;  %v247_v11 = vld [vmem:[%s5835_s24 + $0x58] sm:$0xff] }
 0x1ad   : > { %971 = vrot.lane.b32.xlu1 %v368_v38, %s5778_s7  ;;  %1508 = vrot.lane.b32.xlu0 %v476_v46, %s5782_s17  ;;  %v1591_v46 = vsel %vm10692_vm2, %v246_v4, %v6091_v17  ;;  %v1592_v17 = vsel %vm10692_vm2, %v247_v11, %v6089_v16 }
 0x1ae   : > { %5314 = vmatmul.mubr.msk.f32.gmra.mrb[6].mxu0 %vm10698_vm9, %v1846_v48  ;;  %v1628_v24 = vsel %vm10696_vm1, %v1591_v46, %v6239_v56  ;;  %v408_v48 = vld [vmem:[%s5835_s24 + $0xdc] sm:$0xff]  ;;  %v1629_v56 = vsel %vm10696_vm1, %v1592_v17, %v6237_v55  ;;  %v483_v17 = vld [vmem:[%s5835_s24 + $0xee] sm:$0xff] }
 0x1af   : > { %v1201_v6 = vpop.permute.xlu1 %1200  ;;  %v1092_v27 = vpop.permute.xlu0 %1091  ;;  %v1666_v16 = vsel %vm10695_vm3, %v1629_v56, %v6391_v35  ;;  %v372_v35 = vld [vmem:[%s5835_s24 + $0xdb] sm:$0xff] }
 0x1b0   : > { %v1738_v51 = vsel %vm1728_vm5, %v1701_v9, %v1092_v27  ;;  %v1593_v9 = vsel %vm10692_vm2, %v248_v0, %v6103_v21 }
 0x1b1   : > { %1510 = vrot.lane.b32.xlu1 %v477_v43, %s5782_s17  ;;  %1113 = vrot.lane.b32.xlu0 %v403_v44, %s5779_s10  ;;  %v1663_v44 = vsel %vm10695_vm3, %v1626_v63, %v6385_v36  ;;  %v1665_v43 = vsel %vm10695_vm3, %v1628_v24, %v6393_v34  ;;  %v445_v34 = vld [vmem:[%s5835_s24 + $0xdd] sm:$0xff]  ;;  %v374_v24 = vld [vmem:[%s5835_s24 + $0xeb] sm:$0xff] }
 0x1b2   : > { %v1700_v41 = vsel %vm10694_vm4, %v1663_v44, %v946_v5 }
 0x1b3   : > { %v1345_v1 = vpop.permute.xlu1 %1344  ;;  %v1203_v45 = vpop.permute.xlu0 %1202  ;;  %v1737_v10 = vsel %vm1728_vm5, %v1700_v41, %v1090_v19  ;;  %v444_v19 = vld [vmem:[%s5835_s24 + $0xd5] sm:$0xff] }
 0x1b4   : > { %v1773_v36 = vsel %vm10700_vm6, %v1737_v10, %v1201_v6  ;;  %v1774_v52 = vsel %vm10700_vm6, %v1738_v51, %v1203_v45  ;;  %v371_v45 = vld [vmem:[%s5835_s24 + $0xd3] sm:$0xff]  ;;  %v1630_v51 = vsel %vm10696_vm1, %v1593_v9, %v6254_v3 }
 0x1b5   : > { %1224 = vrot.lane.b32.xlu1 %v405_v31, %s5780_s13  ;;  %1115 = vrot.lane.b32.xlu0 %v404_v29, %s5779_s10  ;;  %v443_v29 = vld [vmem:[%s5835_s24 + $0xcd] sm:$0xff]  ;;  %v1810_v12 = vsel %vm10699_vm7, %v1773_v36, %v1345_v1  ;;  %v481_v36 = vld [vmem:[%s5835_s24 + $0xde] sm:$0xff] }
 0x1b7   : > { %v1347_v40 = vpop.permute.xlu1 %1346  ;;  %v950_v47 = vpop.permute.xlu0 %949 }
 0x1b8   : > { %v1811_v59 = vsel %vm10699_vm7, %v1774_v52, %v1347_v40  ;;  %v1702_v58 = vsel %vm10694_vm4, %v1665_v43, %v950_v47  ;;  %v480_v47 = vld [vmem:[%s5835_s24 + $0xd6] sm:$0xff]  ;;  %v446_v52 = vld [vmem:[%s5835_s24 + $0xe5] sm:$0xff] }
 0x1b9   : > { %1368 = vrot.lane.b32.xlu1 %v442_v26, %s5781_s16  ;;  %1226 = vrot.lane.b32.xlu0 %v406_v60, %s5780_s13 }
 0x1bb   : > { %v952_v5 = vpop.permute.xlu1 %951  ;;  %v1489_v28 = vpop.permute.xlu0 %1488 }
 0x1bc   : > { %v1847_v49 = vsel %vm10693_vm8, %v1810_v12, %v1489_v28  ;;  %v1703_v26 = vsel %vm10694_vm4, %v1666_v16, %v952_v5  ;;  %v409_v12 = vld [vmem:[%s5835_s24 + $0xe4] sm:$0xff] }
 0x1bd   : > { %1370 = vrot.lane.b32.xlu1 %v443_v29, %s5781_s16  ;;  %973 = vrot.lane.b32.xlu0 %v369_v57, %s5778_s7 }
 0x1be   : > { %5316 = vmatprep.mubr.msk.f32.mxu0 %vm10698_vm9, %v1847_v49  ;;  %v249_v49 = vld [vmem:[%s5835_s24 + $0x68] sm:$0xff] }
 0x1bf   : > { %v1491_v42 = vpop.permute.xlu1 %1490  ;;  %v1094_v61 = vpop.permute.xlu0 %1093  ;;  %v1594_v21 = vsel %vm10692_vm2, %v249_v49, %v6101_v20 }
 0x1c0   : > { %v1848_v8 = vsel %vm10693_vm8, %v1811_v59, %v1491_v42  ;;  %v1631_v3 = vsel %vm10696_vm1, %v1594_v21, %v6252_v2  ;;  %v484_v21 = vld [vmem:[%s5835_s24 + $0xf6] sm:$0xff] }
 0x1c1   : > { %975 = vrot.lane.b32.xlu1 %v370_v37, %s5778_s7  ;;  %1512 = vrot.lane.b32.xlu0 %v478_v39, %s5782_s17  ;;  %v410_v37 = vld [vmem:[%s5835_s24 + $0xec] sm:$0xff]  ;;  %v1667_v39 = vsel %vm10695_vm3, %v1630_v51, %v6401_v32  ;;  %v1668_v4 = vsel %vm10695_vm3, %v1631_v3, %v6399_v33 }
 0x1c2   : > { %5317 = vmatmul.mubr.msk.f32.gmra.mrb[8].mxu0 %vm10698_vm9, %v1848_v8 }
 0x1c3   : > { %v1205_v14 = vpop.permute.xlu1 %1204  ;;  %v1096_v15 = vpop.permute.xlu0 %1095 }
 0x1c4   : > { %v1740_v44 = vsel %vm1728_vm5, %v1703_v26, %v1096_v15  ;;  %v373_v15 = vld [vmem:[%s5835_s24 + $0xe3] sm:$0xff] }
 0x1c5   : > { %1514 = vrot.lane.b32.xlu1 %v479_v7, %s5782_s17  ;;  %1117 = vrot.lane.b32.xlu0 %v405_v31, %s5779_s10  ;;  %v1739_v31 = vsel %vm1728_vm5, %v1702_v58, %v1094_v61  ;;  %v2245_v7 = vlaneseq }
 0x1c6   : > { %v1775_v1 = vsel %vm10700_vm6, %v1739_v31, %v1205_v14  ;;  %v447_v14 = vld [vmem:[%s5835_s24 + $0xed] sm:$0xff] }
 0x1c7   : > { %v1349_v50 = vpop.permute.xlu1 %1348  ;;  %v1207_v38 = vpop.permute.xlu0 %1206  ;;  %v6788_v2 = vshrl.u32 %v2245_v7, 7 }
 0x1c8   : > { %v1812_v55 = vsel %vm10699_vm7, %v1775_v1, %v1349_v50  ;;  %v1776_v40 = vsel %vm10700_vm6, %v1740_v44, %v1207_v38  ;;  %v251_v44 = vld [vmem:[%s5835_s24 + $0x78] sm:$0xff] }
 0x1c9   : > { %1228 = vrot.lane.b32.xlu1 %v407_v30, %s5780_s13  ;;  %1119 = vrot.lane.b32.xlu0 %v406_v60, %s5779_s10  ;;  %v2324_v58 = vadd.s32 8, %v6788_v2  ;;  %v2359_v16 = vadd.s32 19, %v6788_v2  ;;  %v2326_v3 = vadd.s32 24, %v6788_v2 }
 0x1cb   : > { %v1351_v6 = vpop.permute.xlu1 %1350  ;;  %v954_v27 = vpop.permute.xlu0 %953  ;;  %v2360_v1 = vadd.s32 19, %v2324_v58 }
 0x1cc   : > { %v1813_v41 = vsel %vm10699_vm7, %v1776_v40, %v1351_v6  ;;  %v1704_v61 = vsel %vm10694_vm4, %v1667_v39, %v954_v27 }
 0x1cd   : > { %1372 = vrot.lane.b32.xlu1 %v444_v19, %s5781_s16  ;;  %1230 = vrot.lane.b32.xlu0 %v408_v48, %s5780_s13  ;;  %v482_v19 = vld [vmem:[%s5835_s24 + $0xe6] sm:$0xff] }
 0x1cf   : > { %v956_v54 = vpop.permute.xlu1 %955  ;;  %v1493_v63 = vpop.permute.xlu0 %1492 }
 0x1d0   : > { %v1849_v60 = vsel %vm10693_vm8, %v1812_v55, %v1493_v63  ;;  %v1705_v38 = vsel %vm10694_vm4, %v1668_v4, %v956_v54 }
 0x1d1   : > { %1374 = vrot.lane.b32.xlu1 %v445_v34, %s5781_s16  ;;  %977 = vrot.lane.b32.xlu0 %v371_v45, %s5778_s7  ;;  %v250_v34 = vld [vmem:[%s5835_s24 + $0x70] sm:$0xff] }
 0x1d2   : > { %5319 = vmatprep.mubr.msk.f32.mxu0 %vm10698_vm9, %v1849_v60  ;;  %v411_v45 = vld [vmem:[%s5835_s24 + $0xf4] sm:$0xff]  ;;  %v1595_v63 = vsel %vm10692_vm2, %v250_v34, %v6110_v23  ;;  %v6810_v26 = vmul.u32.u64.low 3352169597, %v2360_v1  ;;  %v6811_v60 = vmul.u32.u64.high 3352169597, %v2360_v1, %v6810_v26 }
 0x1d3   : > { %v1495_v13 = vpop.permute.xlu1 %1494  ;;  %v1098_v10 = vpop.permute.xlu0 %1097  ;;  %v1632_v40 = vsel %vm10696_vm1, %v1595_v63, %v6268_v18  ;;  %v10765_v18 = vld [vmem:[#allocation23_spill] sm:$0xff]  ;;  %v10769_v63 = vld [vmem:[#allocation46_spill] sm:$0xff] }
 0x1d4   : > { %v1850_v53 = vsel %vm10693_vm8, %v1813_v41, %v1495_v13  ;;  %v1741_v8 = vsel %vm1728_vm5, %v1704_v61, %v1098_v10  ;;  %v6818_v41 = vmul.u32.u64.low 3352169597, %v2359_v16  ;;  %v6819_v13 = vmul.u32.u64.high 3352169597, %v2359_v16, %v6818_v41  ;;  %v376_v61 = vld [vmem:[%s5835_s24 + $0xfb] sm:$0xff] }
 0x1d5   : > { %979 = vrot.lane.b32.xlu1 %v372_v35, %s5778_s7  ;;  %1516 = vrot.lane.b32.xlu0 %v480_v47, %s5782_s17  ;;  %v448_v35 = vld [vmem:[%s5835_s24 + $0xf5] sm:$0xff]  ;;  %v1669_v23 = vsel %vm10695_vm3, %v1632_v40, %v6409_v62 }
 0x1d6   : > { %5320 = vmatmul.mubr.msk.f32.gmra.mrb[10].mxu0 %vm10698_vm9, %v1850_v53  ;;  %v412_v47 = vld [vmem:[%s5835_s24 + $0xfc] sm:$0xff] }
 0x1d7   : > { %v1209_v29 = vpop.permute.xlu1 %1208  ;;  %v1100_v57 = vpop.permute.xlu0 %1099 }
 0x1d8   : > { %v1777_v32 = vsel %vm10700_vm6, %v1741_v8, %v1209_v29  ;;  %v1742_v11 = vsel %vm1728_vm5, %v1705_v38, %v1100_v57  ;;  %v1596_v29 = vsel %vm10692_vm2, %v251_v44, %v6108_v22  ;;  %v2401_v8 = vshrl.u32 %v6819_v13, 8  ;;  %v255_v13 = vld [vmem:[%s5835_s24 + $0x98] sm:$0xff] }
 0x1d9   : > { %1518 = vrot.lane.b32.xlu1 %v481_v36, %s5782_s17  ;;  %1121 = vrot.lane.b32.xlu0 %v407_v30, %s5779_s10  ;;  %v1633_v0 = vsel %vm10696_vm1, %v1596_v29, %v10765_v18  ;;  %v6859_v38 = vadd.s32 19, %v2326_v3 }
 0x1db   : > { %v1353_v5 = vpop.permute.xlu1 %1352  ;;  %v1211_v28 = vpop.permute.xlu0 %1210 }
 0x1dc   : > { %v1814_v20 = vsel %vm10699_vm7, %v1777_v32, %v1353_v5  ;;  %v1778_v33 = vsel %vm10700_vm6, %v1742_v11, %v1211_v28  ;;  %v375_v5 = vld [vmem:[%s5835_s24 + $0xf3] sm:$0xff] }
 0x1dd   : > { %1232 = vrot.lane.b32.xlu1 %v409_v12, %s5780_s13  ;;  %1123 = vrot.lane.b32.xlu0 %v408_v48, %s5779_s10  ;;  %v10766_v28 = vld [vmem:[#allocation44_spill] sm:$0xff] }
 0x1de   : > { %v1670_v9 = vsel %vm10695_vm3, %v1633_v0, %v10766_v28  ;;  %v10776_v28 = vld [vmem:[#allocation45_spill] sm:$0xff] }
 0x1df   : > { %v1355_v59 = vpop.permute.xlu1 %1354  ;;  %v958_v42 = vpop.permute.xlu0 %957 }
 0x1e0   : > { %v1815_v48 = vsel %vm10699_vm7, %v1778_v33, %v1355_v59  ;;  %v1706_v36 = vsel %vm10694_vm4, %v1669_v23, %v958_v42  ;;  %v2412_v59 = vshrl.u32 %v6811_v60, 8  ;;  %v2325_v33 = vadd.s32 16, %v6788_v2 }
 0x1e1   : > { %1376 = vrot.lane.b32.xlu1 %v446_v52, %s5781_s16  ;;  %1234 = vrot.lane.b32.xlu0 %v410_v37, %s5780_s13 }
 0x1e3   : > { %v960_v30 = vpop.permute.xlu1 %959  ;;  %v1497_v50 = vpop.permute.xlu0 %1496 }
 0x1e4   : > { %v1851_v46 = vsel %vm10693_vm8, %v1814_v20, %v1497_v50  ;;  %v1707_v52 = vsel %vm10694_vm4, %v1670_v9, %v960_v30  ;;  %v2413_v20 = vmul.u32 328, %v2412_v59  ;;  %v485_v30 = vld [vmem:[%s5835_s24 + $0xfe] sm:$0xff]  ;;  %v2402_v50 = vmul.u32 328, %v2401_v8 }
 0x1e5   : > { %1378 = vrot.lane.b32.xlu1 %v447_v14, %s5781_s16  ;;  %981 = vrot.lane.b32.xlu0 %v373_v15, %s5778_s7  ;;  %v2327_v8 = vadd.s32 32, %v6788_v2 }
 0x1e6   : > { %5322 = vmatprep.mubr.msk.f32.mxu0 %vm10698_vm9, %v1851_v46 }
 0x1e7   : > { %v1499_v43 = vpop.permute.xlu1 %1498  ;;  %v1102_v6 = vpop.permute.xlu0 %1101 }
 0x1e8   : > { %v1852_v27 = vsel %vm10693_vm8, %v1815_v48, %v1499_v43  ;;  %v1743_v57 = vsel %vm1728_vm5, %v1706_v36, %v1102_v6  ;;  %v6866_v48 = vld [vmem:[%s5835_s24 + $0x104] sm:$0xff]  ;;  %v2403_v43 = vsub.s32 %v2359_v16, %v2402_v50 }
 0x1e9   : > { %983 = vrot.lane.b32.xlu1 %v374_v24, %s5778_s7  ;;  %1520 = vrot.lane.b32.xlu0 %v482_v19, %s5782_s17  ;;  %v2414_v24 = vsub.s32 %v2360_v1, %v2413_v20  ;;  %v252_v19 = vld [vmem:[%s5835_s24 + $0x80] sm:$0xff]  ;;  %v253_v1 = vld [vmem:[%s5835_s24 + $0x88] sm:$0xff] }
 0x1ea   : > { %5323 = vmatmul.mubr.msk.f32.gmra.mrb[12].mxu0 %vm10698_vm9, %v1852_v27  ;;  %v6869_v6 = vmul.u32.u64.low 3352169597, %v6859_v38  ;;  %v6870_v27 = vmul.u32.u64.high 3352169597, %v6859_v38, %v6869_v6  ;;  %vm2791_vm13 = vcmp.ne.s32.totalorder %v2403_v43, 0  ;;  %vm2827_vm14 = vcmp.lt.s32.totalorder %v2403_v43, 0 }
 0x1eb   : > { %v1213_v31 = vpop.permute.xlu1 %1212  ;;  %v1104_v56 = vpop.permute.xlu0 %1103  ;;  %vm2792_vm11 = vcmp.ne.s32.totalorder %v2414_v24, 0  ;;  %vm2828_vm12 = vcmp.lt.s32.totalorder %v2414_v24, 0  ;;  %v2900_v40 = vadd.s32 328, %v2414_v24  ;;  %v2899_v23 = vadd.s32 328, %v2403_v43  ;;  %vm6908_vm0 = vmand %vm2827_vm14, %vm2791_vm13 }
 0x1ec   : > { %v1779_v62 = vsel %vm10700_vm6, %v1743_v57, %v1213_v31  ;;  %v1744_v39 = vsel %vm1728_vm5, %v1707_v52, %v1104_v56  ;;  %v6872_v31 = vadd.s32 19, %v2325_v33  ;;  %v10767_v56 = vld [vmem:[#allocation4_spill] sm:$0xff]  ;;  %vm6897_vm15 = vmand %vm2828_vm12, %vm2792_vm11 }
 0x1ed   : > { %1522 = vrot.lane.b32.xlu1 %v483_v17, %s5782_s17  ;;  %1125 = vrot.lane.b32.xlu0 %v409_v12, %s5779_s10  ;;  %v449_v12 = vld [vmem:[%s5835_s24 + $0xfd] sm:$0xff]  ;;  %v1597_v34 = vsel %vm10692_vm2, %v252_v19, %v10767_v56  ;;  %v487_v19 = vld [vmem:[%s5835_s24 + $0x10e] sm:$0xff] }
 0x1ee   : > { %v452_v57 = vld [vmem:[%s5835_s24 + $0x115] sm:$0xff] }
 0x1ef   : > { %v1357_v55 = vpop.permute.xlu1 %1356  ;;  %v1215_v54 = vpop.permute.xlu0 %1214 }
 0x1f0   : > { %v1816_v22 = vsel %vm10699_vm7, %v1779_v62, %v1357_v55  ;;  %v1780_v42 = vsel %vm10700_vm6, %v1744_v39, %v1215_v54  ;;  %v450_v55 = vld [vmem:[%s5835_s24 + $0x105] sm:$0xff]  ;;  %v451_v62 = vld [vmem:[%s5835_s24 + $0x10d] sm:$0xff] }
 0x1f1   : > { %1236 = vrot.lane.b32.xlu1 %v411_v45, %s5780_s13  ;;  %1127 = vrot.lane.b32.xlu0 %v410_v37, %s5779_s10  ;;  %v6884_v54 = vld [vmem:[%s5835_s24 + $0x10c] sm:$0xff] }
 0x1f3   : > { %v1359_v10 = vpop.permute.xlu1 %1358  ;;  %v6823_v53 = vpop.permute.xlu0 %961 }
 0x1f4   : > { %v1817_v32 = vsel %vm10699_vm7, %v1780_v42, %v1359_v10  ;;  %v10772_v10 = vld [vmem:[#allocation3_spill] sm:$0xff]  ;;  %v2935_v42 = vsel %vm6908_vm0, %v2899_v23, %v2403_v43 }
 0x1f5   : > { %1380 = vrot.lane.b32.xlu1 %v448_v35, %s5781_s16  ;;  %1238 = vrot.lane.b32.xlu0 %v412_v47, %s5780_s13  ;;  %v1598_v36 = vsel %vm10692_vm2, %v253_v1, %v10772_v10  ;;  %v6942_v50 = vadd.s32 4294967277, %v2935_v42  ;;  %v10778_v23 = vld [vmem:[#allocation27_spill] sm:$0xff] }
 0x1f7   : > { %v6839_v49 = vpop.permute.xlu1 %963  ;;  %v1501_v51 = vpop.permute.xlu0 %1500 }
 0x1f8   : > { %v1853_v37 = vsel %vm10693_vm8, %v1816_v22, %v1501_v51 }
 0x1f9   : > { %1382 = vrot.lane.b32.xlu1 %v449_v12, %s5781_s16  ;;  %985 = vrot.lane.b32.xlu0 %v375_v5, %s5778_s7  ;;  %v377_v12 = vld [vmem:[%s5835_s24 + $0x103] sm:$0xff]  ;;  %v2434_v5 = vshrl.u32 %v6870_v27, 8 }
 0x1fa   : > { %5325 = vmatprep.mubr.msk.f32.mxu0 %vm10698_vm9, %v1853_v37  ;;  %v2936_v37 = vsel %vm6897_vm15, %v2900_v40, %v2414_v24  ;;  %v6950_v24 = vadd.s32 19, %v2327_v8 }
 0x1fb   : > { %v1503_v14 = vpop.permute.xlu1 %1502  ;;  %v1106_v15 = vpop.permute.xlu0 %1105 }
 0x1fc   : > { %v1854_v4 = vsel %vm10693_vm8, %v1817_v32, %v1503_v14  ;;  %v486_v32 = vld [vmem:[%s5835_s24 + $0x106] sm:$0xff]  ;;  %v6939_v14 = vadd.s32 4294967277, %v2936_v37 }
 0x1fd   : > { %987 = vrot.lane.b32.xlu1 %v376_v61, %s5778_s7  ;;  %1524 = vrot.lane.b32.xlu0 %v484_v21, %s5782_s17  ;;  %v2328_v61 = vadd.s32 40, %v6788_v2 }
 0x1fe   : > { %5326 = vmatmul.mubr.msk.f32.gmra.mrb[14].mxu0 %vm10698_vm9, %v1854_v4  ;;  %v3127_v43 = vsub.s32 0, %v6939_v14 }
 0x1ff   : > { %v1217_v46 = vpop.permute.xlu1 %1216  ;;  %v1108_v11 = vpop.permute.xlu0 %1107  ;;  %v6946_v33 = vadd.s32 19, %v2328_v61  ;;  %v2330_v61 = vadd.s32 56, %v6788_v2 }
 0x201   : > { %1526 = vrot.lane.b32.xlu1 %v485_v30, %s5782_s17  ;;  %1129 = vrot.lane.b32.xlu0 %v411_v45, %s5779_s10  ;;  %v10768_v45 = vld [vmem:[#allocation25_spill] sm:$0xff] }
 0x202   : > { %v1634_v16 = vsel %vm10696_vm1, %v1597_v34, %v10768_v45  ;;  %v6958_v34 = vmul.u32.u64.low 3352169597, %v6946_v33  ;;  %v6959_v1 = vmul.u32.u64.high 3352169597, %v6946_v33, %v6958_v34  ;;  %v254_v45 = vld [vmem:[%s5835_s24 + $0x90] sm:$0xff] }
 0x203   : > { %v1361_v58 = vpop.permute.xlu1 %1360  ;;  %v1219_v17 = vpop.permute.xlu0 %1218  ;;  %v1671_v26 = vsel %vm10695_vm3, %v1634_v16, %v10769_v63  ;;  %v6973_v63 = vmin.u32 %v6939_v14, %v3127_v43 }
 0x204   : > { %v1708_v41 = vsel %vm10694_vm4, %v1671_v26, %v6823_v53  ;;  %v10775_v53 = vld [vmem:[#allocation24_spill] sm:$0xff]  ;;  %v2456_v37 = vshrl.u32 %v6959_v1, 8  ;;  %v7056_v1 = vadd.s32 19, %v2330_v61 }
 0x205   : > { %1240 = vrot.lane.b32.xlu1 %v6866_v48, %s5780_s13  ;;  %1131 = vrot.lane.b32.xlu0 %v412_v47, %s5779_s10  ;;  %v6891_v35 = vmul.u32.u64.low 3352169597, %v6872_v31  ;;  %v6892_v47 = vmul.u32.u64.high 3352169597, %v6872_v31, %v6891_v35  ;;  %v1745_v29 = vsel %vm1728_vm5, %v1708_v41, %v1106_v15  ;;  %v1635_v18 = vsel %vm10696_vm1, %v1598_v36, %v10775_v53  ;;  %v6998_v53 = vld [vmem:[%s5835_s24 + $0x11c] sm:$0xff]  ;;  %v10788_v61 = vld [vmem:[#allocation8_spill] sm:$0xff] }
 0x206   : > { %v1781_v0 = vsel %vm10700_vm6, %v1745_v29, %v1217_v46  ;;  %v1672_v9 = vsel %vm10695_vm3, %v1635_v18, %v10776_v28  ;;  %v2435_v15 = vmul.u32 328, %v2434_v5  ;;  %v10777_v35 = vld [vmem:[#allocation6_spill] sm:$0xff]  ;;  %v10782_v28 = vld [vmem:[#allocation5_spill] sm:$0xff] }
 0x207   : > { %v1363_v60 = vpop.permute.xlu1 %1362  ;;  %v6888_v44 = vpop.permute.xlu0 %965  ;;  %v1818_v22 = vsel %vm10699_vm7, %v1781_v0, %v1361_v58  ;;  %v1709_v39 = vsel %vm10694_vm4, %v1672_v9, %v6839_v49  ;;  %v378_v49 = vld [vmem:[%s5835_s24 + $0x10b] sm:$0xff]  ;;  %v2423_v46 = vshrl.u32 %v6892_v47, 8  ;;  %v1599_v47 = vsel %vm10692_vm2, %v254_v45, %v10777_v35 }
 0x208   : > { %v1746_v21 = vsel %vm1728_vm5, %v1709_v39, %v1108_v11  ;;  %v2436_v6 = vsub.s32 %v6859_v38, %v2435_v15  ;;  %v6970_v38 = vld [vmem:[%s5835_s24 + $0x114] sm:$0xff]  ;;  %v1636_v10 = vsel %vm10696_vm1, %v1599_v47, %v10778_v23  ;;  %v1600_v9 = vsel %vm10692_vm2, %v255_v13, %v10782_v28 }
 0x209   : > { %1384 = vrot.lane.b32.xlu1 %v450_v55, %s5781_s16  ;;  %1242 = vrot.lane.b32.xlu0 %v6884_v54, %s5780_s13  ;;  %v1782_v3 = vsel %vm10700_vm6, %v1746_v21, %v1219_v17  ;;  %v3116_v17 = vsub.s32 0, %v6942_v50  ;;  %v2424_v56 = vmul.u32 328, %v2423_v46  ;;  %v10783_v21 = vld [vmem:[#allocation26_spill] sm:$0xff]  ;;  %v2329_v15 = vadd.s32 48, %v6788_v2 }
 0x20a   : > { %v1819_v4 = vsel %vm10699_vm7, %v1782_v3, %v1363_v60  ;;  %v6966_v16 = vmul.u32.u64.low 3352169597, %v6950_v24  ;;  %v6967_v55 = vmul.u32.u64.high 3352169597, %v6950_v24, %v6966_v16  ;;  %vm2794_vm10 = vcmp.ne.s32.totalorder %v2436_v6, 0  ;;  %v379_v3 = vld [vmem:[%s5835_s24 + $0x113] sm:$0xff] }
 0x20b   : > { %v6921_v51 = vpop.permute.xlu1 %967  ;;  %v1505_v52 = vpop.permute.xlu0 %1504  ;;  %vm2830_vm11 = vcmp.lt.s32.totalorder %v2436_v6, 0  ;;  %v6976_v40 = vmin.u32 %v6942_v50, %v3116_v17  ;;  %v2902_v41 = vadd.s32 328, %v2436_v6  ;;  %v453_v16 = vld [vmem:[%s5835_s24 + $0x11d] sm:$0xff] }
 0x20c   : > { %v1855_v59 = vsel %vm10693_vm8, %v1818_v22, %v1505_v52  ;;  %vm6990_vm12 = vmand %vm2830_vm11, %vm2794_vm10  ;;  %v7001_v18 = vmul.u32.u64.low 3817748708, %v6973_v63  ;;  %v7002_v0 = vmul.u32.u64.high 3817748708, %v6973_v63, %v7001_v18  ;;  %v2445_v42 = vshrl.u32 %v6967_v55, 8 }
 0x20d   : > { %1386 = vrot.lane.b32.xlu1 %v451_v62, %s5781_s16  ;;  %989 = vrot.lane.b32.xlu0 %v377_v12, %s5778_s7  ;;  %v2938_v52 = vsel %vm6990_vm12, %v2902_v41, %v2436_v6  ;;  %v380_v18 = vld [vmem:[%s5835_s24 + $0x11b] sm:$0xff] }
 0x20e   : > { %5328 = vmatprep.mubr.msk.f32.mxu0 %vm10698_vm9, %v1855_v59  ;;  %v2446_v34 = vmul.u32 328, %v2445_v42 }
 0x20f   : > { %v1507_v20 = vpop.permute.xlu1 %1506  ;;  %v1110_v30 = vpop.permute.xlu0 %1109 }
 0x210   : > { %v1856_v11 = vsel %vm10693_vm8, %v1819_v4, %v1507_v20  ;;  %v10786_v4 = vld [vmem:[#allocation47_spill] sm:$0xff] }
 0x211   : > { %991 = vrot.lane.b32.xlu1 %v378_v49, %s5778_s7  ;;  %1528 = vrot.lane.b32.xlu0 %v486_v32, %s5782_s17  ;;  %v344_v49 = vld [vmem:[%s5835_s24 + $0x11a] sm:$0xff] }
 0x212   : > { %5329 = vmatmul.mubr.msk.f32.gmra.mrb[16].mxu0 %vm10698_vm9, %v1856_v11  ;;  %v10790_v32 = vld [vmem:[#allocation10_spill] sm:$0xff] }
 0x213   : > { %v1221_v27 = vpop.permute.xlu1 %1220  ;;  %v1112_v58 = vpop.permute.xlu0 %1111 }
 0x215   : > { %1530 = vrot.lane.b32.xlu1 %v487_v19, %s5782_s17  ;;  %1133 = vrot.lane.b32.xlu0 %v6866_v48, %s5779_s10  ;;  %v6979_v48 = vsub.s32 %v6872_v31, %v2424_v56  ;;  %v10781_v31 = vld [vmem:[#allocation48_spill] sm:$0xff]  ;;  %v7045_v19 = vadd.s32 4294967277, %v2938_v52  ;;  %v260_v52 = vld [vmem:[%s5835_s24 + $0xc0] sm:$0xff] }
 0x216   : > { %v1673_v29 = vsel %vm10695_vm3, %v1636_v10, %v10781_v31  ;;  %v7079_v10 = vsub.s32 %v6950_v24, %v2446_v34  ;;  %v7082_v36 = vmul.u32.u64.low 3352169597, %v7056_v1  ;;  %v7083_v31 = vmul.u32.u64.high 3352169597, %v7056_v1, %v7082_v36 }
 0x217   : > { %v1365_v26 = vpop.permute.xlu1 %1364  ;;  %v1223_v60 = vpop.permute.xlu0 %1222  ;;  %vm2793_vm13 = vcmp.ne.s32.totalorder %v6979_v48, 0  ;;  %vm2829_vm14 = vcmp.lt.s32.totalorder %v6979_v48, 0  ;;  %v1710_v22 = vsel %vm10694_vm4, %v1673_v29, %v6888_v44  ;;  %v2901_v59 = vadd.s32 328, %v6979_v48  ;;  %v257_v29 = vld [vmem:[%s5835_s24 + $0xa8] sm:$0xff]  ;;  %v10798_v36 = vld [vmem:[#allocation14_spill] sm:$0xff] }
 0x218   : > { %v1747_v39 = vsel %vm1728_vm5, %v1710_v22, %v1110_v30  ;;  %v1637_v44 = vsel %vm10696_vm1, %v1600_v9, %v10783_v21  ;;  %vm7035_vm15 = vmand %vm2829_vm14, %vm2793_vm13  ;;  %vm2795_vm11 = vcmp.ne.s32.totalorder %v7079_v10, 0  ;;  %vm2831_vm12 = vcmp.lt.s32.totalorder %v7079_v10, 0 }
 0x219   : > { %1244 = vrot.lane.b32.xlu1 %v6970_v38, %s5780_s13  ;;  %1135 = vrot.lane.b32.xlu0 %v6884_v54, %s5779_s10  ;;  %v7007_v54 = vmul.u32.u64.low 3817748708, %v6976_v40  ;;  %v7008_v5 = vmul.u32.u64.high 3817748708, %v6976_v40, %v7007_v54  ;;  %v1783_v8 = vsel %vm10700_vm6, %v1747_v39, %v1221_v27  ;;  %v1674_v20 = vsel %vm10695_vm3, %v1637_v44, %v10786_v4  ;;  %v263_v44 = vld [vmem:[%s5835_s24 + $0xd8] sm:$0xff]  ;;  %v10791_v4 = vld [vmem:[#allocation11_spill] sm:$0xff]  ;;  %vm7167_vm14 = vmand %vm2831_vm12, %vm2795_vm11 }
 0x21a   : > { %v1820_v30 = vsel %vm10699_vm7, %v1783_v8, %v1365_v26  ;;  %v1711_v43 = vsel %vm10694_vm4, %v1674_v20, %v6921_v51  ;;  %v2457_v27 = vmul.u32 328, %v2456_v37  ;;  %v2937_v56 = vsel %vm7035_vm15, %v2901_v59, %v6979_v48  ;;  %v488_v51 = vld [vmem:[%s5835_s24 + $0x116] sm:$0xff]  ;;  %v10787_v59 = vld [vmem:[#allocation7_spill] sm:$0xff] }
 0x21b   : > { %v1367_v62 = vpop.permute.xlu1 %1366  ;;  %v7004_v12 = vpop.permute.xlu0 %969  ;;  %v1748_v17 = vsel %vm1728_vm5, %v1711_v43, %v1112_v58  ;;  %v7062_v58 = vadd.s32 19, %v2329_v15  ;;  %v3132_v48 = vshrl.u32 %v7002_v0, 4  ;;  %v3121_v41 = vshrl.u32 %v7008_v5, 4  ;;  %v258_v54 = vld [vmem:[%s5835_s24 + $0xb0] sm:$0xff]  ;;  %v261_v5 = vld [vmem:[%s5835_s24 + $0xc8] sm:$0xff] }
 0x21c   : > { %v1784_v45 = vsel %vm10700_vm6, %v1748_v17, %v1223_v60  ;;  %v3149_v60 = vsub.s32 0, %v7045_v19  ;;  %v7071_v13 = vadd.s32 4294967277, %v2937_v56  ;;  %v7074_v23 = vsub.s32 %v6946_v33, %v2457_v27  ;;  %v262_v8 = vld [vmem:[%s5835_s24 + $0xd0] sm:$0xff] }
 0x21d   : > { %1388 = vrot.lane.b32.xlu1 %v452_v57, %s5781_s16  ;;  %1246 = vrot.lane.b32.xlu0 %v6998_v53, %s5780_s13  ;;  %v1821_v55 = vsel %vm10699_vm7, %v1784_v45, %v1367_v62  ;;  %v256_v57 = vld [vmem:[%s5835_s24 + $0xa0] sm:$0xff]  ;;  %v7090_v33 = vmul.u32.u64.low 3352169597, %v7062_v58  ;;  %v7091_v0 = vmul.u32.u64.high 3352169597, %v7062_v58, %v7090_v33  ;;  %v259_v62 = vld [vmem:[%s5835_s24 + $0xb8] sm:$0xff]  ;;  %v3133_v9 = vmul.u32 18, %v3132_v48 }
 0x21e   : > { %v7101_v22 = vmin.u32 %v7045_v19, %v3149_v60  ;;  %v3122_v37 = vmul.u32 18, %v3121_v41  ;;  %v3138_v39 = vsub.s32 0, %v7071_v13  ;;  %vm2796_vm0 = vcmp.ne.s32.totalorder %v7074_v23, 0  ;;  %v269_v41 = vld [vmem:[%s5835_s24 + $0x108] sm:$0xff] }
 0x21f   : > { %v7043_v46 = vpop.permute.xlu1 %971  ;;  %v1509_v11 = vpop.permute.xlu0 %1508  ;;  %vm2832_vm10 = vcmp.lt.s32.totalorder %v7074_v23, 0  ;;  %v1602_v42 = vsel %vm10692_vm2, %v257_v29, %v10787_v59  ;;  %v1601_v21 = vsel %vm10692_vm2, %v256_v57, %v10788_v61  ;;  %v7124_v15 = vsel %vm10692_vm2, %v258_v54, %v10790_v32  ;;  %v10799_v57 = vld [vmem:[#allocation15_spill] sm:$0xff]  ;;  %v10801_v54 = vld [vmem:[#allocation17_spill] sm:$0xff]  ;;  %v10803_v61 = vld [vmem:[#allocation50_spill] sm:$0xff] }
 0x220   : > { %v1857_v6 = vsel %vm10693_vm8, %v1820_v30, %v1509_v11  ;;  %v7128_v20 = vsel %vm10692_vm2, %v261_v5, %v10791_v4  ;;  %v265_v30 = vld [vmem:[%s5835_s24 + $0xe8] sm:$0xff]  ;;  %v489_v11 = vld [vmem:[%s5835_s24 + $0x11e] sm:$0xff]  ;;  %v2904_v43 = vadd.s32 328, %v7074_v23  ;;  %v3134_v56 = vsub.s32 %v6973_v63, %v3133_v9  ;;  %vm7146_vm13 = vmand %vm2832_vm10, %vm2796_vm0 }
 0x221   : > { %993 = vrot.lane.b32.xlu1 %v379_v3, %s5778_s7  ;;  %851 = vrot.lane.b32.xlu0 %v344_v49, %s5777_s27  ;;  %v10789_v3 = vld [vmem:[#allocation9_spill] sm:$0xff]  ;;  %v7139_v34 = vmul.u32.u64.low 3817748708, %v7101_v22  ;;  %v7140_v45 = vmul.u32.u64.high 3817748708, %v7101_v22, %v7139_v34  ;;  %v3123_v60 = vsub.s32 %v6976_v40, %v3122_v37  ;;  %v7173_v29 = vsel %vm10692_vm2, %v262_v8, %v10798_v36  ;;  %v10800_v40 = vld [vmem:[#allocation16_spill] sm:$0xff]  ;;  %v345_v37 = vld [vmem:[%s5835_s24 + $0x122] sm:$0xff] }
 0x222   : > { %5331 = vmatprep.mubr.msk.f32.mxu0 %vm10698_vm9, %v1857_v6  ;;  %v7120_v49 = vsel %vm10692_vm2, %v259_v62, %v10789_v3  ;;  %v267_v6 = vld [vmem:[%s5835_s24 + $0xf8] sm:$0xff]  ;;  %v2478_v62 = vshrl.u32 %v7083_v31, 8  ;;  %v2940_v59 = vsel %vm7146_vm13, %v2904_v43, %v7074_v23  ;;  %vm3126_vm15 = vcmp.lt.s32.totalorder %v6939_v14, 0  ;;  %v266_v32 = vld [vmem:[%s5835_s24 + $0xf0] sm:$0xff]  ;;  %v454_v34 = vld [vmem:[%s5835_s24 + $0x125] sm:$0xff] }
 0x223   : > { %v1511_v26 = vpop.permute.xlu1 %1510  ;;  %v7065_v35 = vpop.permute.xlu0 %1113  ;;  %v10795_v63 = vld [vmem:[#allocation13_spill] sm:$0xff]  ;;  %v7189_v5 = vsel %vm10692_vm2, %v267_v6, %v10801_v54  ;;  %vm3115_vm0 = vcmp.lt.s32.totalorder %v6942_v50, 0 }
 0x224   : > { %v1858_v47 = vsel %vm10693_vm8, %v1821_v55, %v1511_v26  ;;  %v10794_v55 = vld [vmem:[#allocation12_spill] sm:$0xff]  ;;  %v7157_v48 = vsel %vm10692_vm2, %v263_v44, %v10795_v63  ;;  %v10802_v9 = vld [vmem:[#allocation29_spill] sm:$0xff] }
 0x225   : > { %1532 = vrot.lane.b32.xlu1 %v488_v51, %s5782_s17  ;;  %1390 = vrot.lane.b32.xlu0 %v453_v16, %s5781_s16  ;;  %v2903_v16 = vadd.s32 328, %v7079_v10  ;;  %v7153_v26 = vsel %vm10692_vm2, %v260_v52, %v10794_v55  ;;  %v1638_v52 = vsel %vm10696_vm1, %v1601_v21, %v10802_v9  ;;  %v3135_v21 = vsub.s32 0, %v3134_v56  ;;  %v419_v51 = vld [vmem:[%s5835_s24 + $0x12c] sm:$0xff]  ;;  %v10805_v55 = vld [vmem:[#allocation18_spill] sm:$0xff]  ;;  %v10806_v36 = vld [vmem:[#allocation49_spill] sm:$0xff] }
 0x226   : > { %5332 = vmatmul.mubr.msk.f32.gmra.mrb[18].mxu0 %vm10698_vm9, %v1858_v47  ;;  %v7161_v47 = vmin.u32 %v7071_v13, %v3138_v39  ;;  %v7195_v39 = vld [vmem:[%s5835_s24 + $0x124] sm:$0xff]  ;;  %v1675_v44 = vsel %vm10695_vm3, %v1638_v52, %v10803_v61  ;;  %v7234_v63 = vsel %vm10692_vm2, %v266_v32, %v10805_v55 }
 0x227   : > { %v7096_v24 = vpop.permute.xlu1 %1224  ;;  %v7098_v28 = vpop.permute.xlu0 %1115  ;;  %v2939_v3 = vsel %vm7167_vm14, %v2903_v16, %v7079_v10  ;;  %v1712_v23 = vsel %vm10694_vm4, %v1675_v44, %v7004_v12  ;;  %v7222_v10 = vadd.s32 4294967277, %v2940_v59  ;;  %v10804_v12 = vld [vmem:[#allocation28_spill] sm:$0xff]  ;;  %v7248_v52 = vsel %vm3126_vm15, %v3135_v21, %v3134_v56  ;;  %v10807_v56 = vld [vmem:[#allocation19_spill] sm:$0xff] }
 0x228   : > { %v1639_v43 = vsel %vm10696_vm1, %v1602_v42, %v10804_v12  ;;  %v7230_v16 = vadd.s32 4294967277, %v2939_v3  ;;  %v2332_v59 = vadd.s32 72, %v6788_v2  ;;  %v346_v61 = vld [vmem:[%s5835_s24 + $0x12a] sm:$0x3f]  ;;  %vm3512_vm10 = vcmp.ne.s32.totalorder %v7248_v52, 0  ;;  %v10820_v12 = vld [vmem:[#allocation52_spill] sm:$0xff] }
 0x229   : > { %1137 = vrot.lane.b32.xlu1 %v6970_v38, %s5779_s10  ;;  %995 = vrot.lane.b32.xlu0 %v380_v18, %s5778_s7  ;;  %v264_v38 = vld [vmem:[%s5835_s24 + $0xe0] sm:$0xff]  ;;  %v7177_v18 = vsel %vm10692_vm2, %v265_v30, %v10799_v57  ;;  %v7213_v4 = vmul.u32.u64.low 3817748708, %v7161_v47  ;;  %v7214_v30 = vmul.u32.u64.high 3817748708, %v7161_v47, %v7213_v4  ;;  %v1676_v57 = vsel %vm10695_vm3, %v1639_v43, %v10806_v36 }
 0x22a   : > { %v7181_v33 = vsel %vm10692_vm2, %v264_v38, %v10800_v40  ;;  %v1749_v38 = vsel %vm1728_vm5, %v1712_v23, %v7065_v35  ;;  %v1713_v54 = vsel %vm10694_vm4, %v1676_v57, %v7043_v46  ;;  %v3160_v44 = vsub.s32 0, %v7230_v16  ;;  %v10808_v4 = vld [vmem:[#allocation30_spill] sm:$0xff] }
 0x22b   : > { %v1369_v27 = vpop.permute.xlu1 %1368  ;;  %v7135_v17 = vpop.permute.xlu0 %1226  ;;  %v1785_v6 = vsel %vm10700_vm6, %v1749_v38, %v7096_v24  ;;  %v3154_v24 = vshrl.u32 %v7140_v45, 4  ;;  %v3171_v45 = vsub.s32 0, %v7222_v10  ;;  %vm3548_vm11 = vcmp.lt.s32.totalorder %v7248_v52, 0 }
 0x22c   : > { %v1822_v40 = vsel %vm10699_vm7, %v1785_v6, %v1369_v27  ;;  %v1750_v27 = vsel %vm1728_vm5, %v1713_v54, %v7098_v28  ;;  %v381_v28 = vld [vmem:[%s5835_s24 + $0x123] sm:$0xff]  ;;  %v1641_v38 = vsel %vm10696_vm1, %v7120_v49, %v10808_v4  ;;  %v7309_v43 = vmin.u32 %v7230_v16, %v3160_v44 }
 0x22d   : > { %1139 = vrot.lane.b32.xlu1 %v6998_v53, %s5779_s10  ;;  %1534 = vrot.lane.b32.xlu0 %v489_v11, %s5782_s17  ;;  %v2467_v53 = vshrl.u32 %v7091_v0, 8  ;;  %v3124_v0 = vsub.s32 0, %v3123_v60  ;;  %v2479_v11 = vmul.u32 328, %v2478_v62  ;;  %v7330_v36 = vand.u32 127, %v2245_v7 }
 0x22f   : > { %v1371_v31 = vpop.permute.xlu1 %1370  ;;  %v7203_v8 = vpop.permute.xlu0 %973  ;;  %v2468_v35 = vmul.u32 328, %v2467_v53  ;;  %v7260_v46 = vsub.s32 %v7056_v1, %v2479_v11  ;;  %v7265_v53 = vsel %vm10692_vm2, %v269_v41, %v10807_v56  ;;  %v455_v11 = vld [vmem:[%s5835_s24 + $0x12d] sm:$0xff] }
 0x230   : > { %v10818_v56 = vld [vmem:[#allocation32_spill] sm:$0xff] }
 0x231   : > { %853 = vrot.lane.b32.xlu1 %v345_v37, %s5777_s27  ;;  %1248 = vrot.lane.b32.xlu0 %v7195_v39, %s5780_s13  ;;  %v7252_v37 = vsel %vm3115_vm0, %v3124_v0, %v3123_v60  ;;  %v1786_v60 = vsel %vm10700_vm6, %v1750_v27, %v7135_v17  ;;  %v7274_v21 = vsub.s32 %v7062_v58, %v2468_v35  ;;  %v3155_v17 = vmul.u32 18, %v3154_v24  ;;  %vm7304_vm0 = vmand %vm3548_vm11, %vm3512_vm10 }
 0x232   : > { %v1823_v1 = vsel %vm10699_vm7, %v1786_v60, %v1371_v31  ;;  %vm3511_vm12 = vcmp.ne.s32.totalorder %v7252_v37, 0  ;;  %vm3547_vm13 = vcmp.lt.s32.totalorder %v7252_v37, 0  ;;  %v3143_v58 = vshrl.u32 %v7214_v30, 4  ;;  %v490_v30 = vld [vmem:[%s5835_s24 + $0x126] sm:$0xff] }
 0x233   : > { %v7240_v62 = vpop.permute.xlu1 %975  ;;  %v1513_v42 = vpop.permute.xlu0 %1512  ;;  %v7288_v31 = vmin.u32 %v7222_v10, %v3171_v45  ;;  %vm2798_vm14 = vcmp.ne.s32.totalorder %v7260_v46, 0  ;;  %vm2834_vm15 = vcmp.lt.s32.totalorder %v7260_v46, 0  ;;  %v7292_v0 = vadd.s32 19, %v2332_v59  ;;  %vm7322_vm10 = vmand %vm3547_vm13, %vm3511_vm12  ;;  %v10817_v45 = vld [vmem:[#allocation31_spill] sm:$0xff] }
 0x234   : > { %v1859_v9 = vsel %vm10693_vm8, %v1822_v40, %v1513_v42  ;;  %vm2797_vm2 = vcmp.ne.s32.totalorder %v7274_v21, 0  ;;  %v3619_v35 = vadd.s32 18, %v7252_v37  ;;  %v3156_v55 = vsub.s32 %v7101_v22, %v3155_v17  ;;  %vm7336_vm11 = vmand %vm2834_vm15, %vm2798_vm14 }
 0x235   : > { %1392 = vrot.lane.b32.xlu1 %v454_v34, %s5781_s16  ;;  %1250 = vrot.lane.b32.xlu0 %v419_v51, %s5780_s13  ;;  %v3620_v34 = vadd.s32 18, %v7248_v52  ;;  %v2906_v41 = vadd.s32 328, %v7260_v46  ;;  %v3144_v57 = vmul.u32 18, %v3143_v58  ;;  %v2905_v42 = vadd.s32 328, %v7274_v21 }
 0x236   : > { %5334 = vmatprep.mubr.msk.f32.mxu0 %vm10698_vm9, %v1859_v9  ;;  %v2331_v24 = vadd.s32 64, %v6788_v2  ;;  %v7345_v7 = vmul.u32.u64.low 3817748708, %v7288_v31  ;;  %v7346_v22 = vmul.u32.u64.high 3817748708, %v7288_v31, %v7345_v7  ;;  %v1640_v59 = vsel %vm10696_vm1, %v7124_v15, %v10817_v45 }
 0x237   : > { %v1515_v3 = vpop.permute.xlu1 %1514  ;;  %v7277_v32 = vpop.permute.xlu0 %1117  ;;  %v7357_v9 = vmul.u32.u64.low 3352169597, %v7292_v0  ;;  %v7358_v27 = vmul.u32.u64.high 3352169597, %v7292_v0, %v7357_v9  ;;  %v7366_v60 = vsel %vm10696_vm1, %v7128_v20, %v10818_v56  ;;  %v3656_v17 = vsel %vm7304_vm0, %v3620_v34, %v7248_v52  ;;  %v10819_v52 = vld [vmem:[#allocation51_spill] sm:$0xff] }
 0x238   : > { %v1860_v23 = vsel %vm10693_vm8, %v1823_v1, %v1515_v3  ;;  %vm2833_vm8 = vcmp.lt.s32.totalorder %v7274_v21, 0  ;;  %v3655_v15 = vsel %vm7322_vm10, %v3619_v35, %v7252_v37  ;;  %v3157_v20 = vsub.s32 0, %v3156_v55 }
 0x239   : > { %997 = vrot.lane.b32.xlu1 %v381_v28, %s5778_s7  ;;  %855 = vrot.lane.b32.xlu0 %v346_v61, %s5777_s27  ;;  %vm7352_vm12 = vmand %vm2833_vm8, %vm2797_vm2  ;;  %v382_v28 = vld [vmem:[%s5835_s24 + $0x12b] sm:$0x3f]  ;;  %v7370_v61 = vmul.u32.u64.low 3817748708, %v7309_v43  ;;  %v7371_v44 = vmul.u32.u64.high 3817748708, %v7309_v43, %v7370_v61  ;;  %vm3148_vm2 = vcmp.lt.s32.totalorder %v7045_v19, 0  ;;  %v3145_v58 = vsub.s32 %v7161_v47, %v3144_v57  ;;  %s5785_s27 = smov 48  }
 0x23a   : > { %5335 = vmatmul.mubr.msk.f32.gmra.mrb[20].mxu0 %vm10698_vm9, %v1860_v23  ;;  %v2942_v23 = vsel %vm7336_vm11, %v2906_v41, %v7260_v46  ;;  %v2941_v4 = vsel %vm7352_vm12, %v2905_v42, %v7274_v21  ;;  %v1677_v37 = vsel %vm10695_vm3, %v1640_v59, %v10820_v12  ;;  %vm10697_vm8 = vcmp.lt.s32.totalorder %v7330_v36, 16  ;;  %v418_v47 = vld [vmem:[%s5835_s24 + $0x12c] sm:$0x3f]  ;;  %v420_v61 = vld [vmem:[%s5835_s24 + $0x134] sm:$0xff] }
 0x23b   : > { %v7313_v49 = vpop.permute.xlu1 %1228  ;;  %v7315_v6 = vpop.permute.xlu0 %1119  ;;  %vm3008_vm13 = vcmp.ge.s32.totalorder %v6939_v14, 0  ;;  %vm3044_vm14 = vcmp.lt.s32.totalorder %v6939_v14, 286  ;;  %v491_v46 = vld [vmem:[%s5835_s24 + $0x12e] sm:$0xff]  ;;  %vm3007_vm15 = vcmp.ge.s32.totalorder %v6942_v50, 0  ;;  %vm3043_vm0 = vcmp.lt.s32.totalorder %v6942_v50, 286 }
 0x23c   : > { %v7405_v21 = vadd.s32 4294967277, %v2942_v23  ;;  %vm7414_vm10 = vcmp.lt.s32.totalorder %v3656_v17, 16  ;;  %vm7418_vm11 = vcmp.lt.s32.totalorder %v3655_v15, 16  ;;  %v7424_v41 = vsel %vm3148_vm2, %v3157_v20, %v3156_v55  ;;  %vm7440_vm12 = vmand %vm3008_vm13, %vm3044_vm14 }
 0x23d   : > { %1536 = vrot.lane.b32.xlu1 %v490_v30, %s5782_s17  ;;  %1394 = vrot.lane.b32.xlu0 %v455_v11, %s5781_s16  ;;  %v7389_v30 = vadd.s32 19, %v2331_v24  ;;  %v1678_v11 = vsel %vm10695_vm3, %v1641_v38, %v10819_v52  ;;  %v7426_v57 = vadd.s32 4294967277, %v2941_v4  ;;  %v1714_v40 = vsel %vm10694_vm4, %v1677_v37, %v7203_v8  ;;  %vm7456_vm13 = vmand %vm3007_vm15, %vm3043_vm0 }
 0x23e   : > { %v3146_v42 = vsub.s32 0, %v3145_v58  ;;  %v1751_v54 = vsel %vm1728_vm5, %v1714_v40, %v7277_v32  ;;  %vm3137_vm2 = vcmp.lt.s32.totalorder %v7071_v13, 0  ;;  %v3176_v8 = vshrl.u32 %v7346_v22, 4  ;;  %vm3728_vm15 = vmand %vm7440_vm12, %vm7414_vm10 }
 0x23f   : > { %v1373_v1 = vpop.permute.xlu1 %1372  ;;  %v7373_v3 = vpop.permute.xlu0 %1230  ;;  %v7431_v24 = vmul.u32.u64.low 3352169597, %v7389_v30  ;;  %v7432_v7 = vmul.u32.u64.high 3352169597, %v7389_v30, %v7431_v24  ;;  %v2500_v45 = vshrl.u32 %v7358_v27, 8  ;;  %v1787_v32 = vsel %vm10700_vm6, %v1751_v54, %v7313_v49 }
 0x240   : > { %v3165_v22 = vshrl.u32 %v7371_v44, 4  ;;  %v3193_v27 = vsub.s32 0, %v7405_v21  ;;  %v1824_v17 = vsel %vm10699_vm7, %v1787_v32, %v1373_v1  ;;  %vm3514_vm14 = vcmp.ne.s32.totalorder %v7424_v41, 0 }
 0x241   : > { %1141 = vrot.lane.b32.xlu1 %v7195_v39, %s5779_s10  ;;  %999 = vrot.lane.b32.xlu0 %v382_v28, %s5778_s7  ;;  %v7412_v39 = vld [vmem:[%s10688_s2] ss:$0 sm:$0xff]  ;;  %v3182_v50 = vsub.s32 0, %v7426_v57  ;;  %v1715_v23 = vsel %vm10694_vm4, %v1678_v11, %v7240_v62  ;;  %vm10829_vm0 = vcmask 261120   ;;  %v7479_v1 = vsel %vm3137_vm2, %v3146_v42, %v3145_v58  ;;  %vm3727_vm4 = vmand %vm7456_vm13, %vm7418_vm11 }
 0x242   : > { %v421_v28 = vld [vmem:[%s5835_s24 + $0x13c] sm:$0x3f]  ;;  %v1752_v52 = vsel %vm1728_vm5, %v1715_v23, %v7315_v6  ;;  %v3177_v62 = vmul.u32 18, %v3176_v8  ;;  %v2501_v11 = vmul.u32 328, %v2500_v45  ;;  %v7497_v40 = vmin.u32 %v7405_v21, %v3193_v27  ;;  %vm10830_vm10 = vmmov %vm10829_vm0 }
 0x243   : > { %v1375_v38 = vpop.permute.xlu1 %1374  ;;  %v7407_v34 = vpop.permute.xlu0 %977  ;;  %v1788_v37 = vsel %vm10700_vm6, %v1752_v52, %v7373_v3  ;;  %v457_v6 = vld [vmem:[%s5835_s24 + $0x13d] sm:$0x3f]  ;;  %v7510_v8 = vmin.u32 %v7426_v57, %v3182_v50  ;;  %v2489_v55 = vshrl.u32 %v7432_v7, 8  ;;  %v2334_v45 = vadd.s32 88, %v6788_v2 }
 0x244   : > { %v1825_v42 = vsel %vm10699_vm7, %v1788_v37, %v1375_v38  ;;  %vm3550_vm12 = vcmp.lt.s32.totalorder %v7424_v41, 0  ;;  %v3178_v32 = vsub.s32 %v7288_v31, %v3177_v62  ;;  %v7527_v35 = vsub.s32 %v7292_v0, %v2501_v11  ;;  %v493_v7 = vld [vmem:[%s5835_s24 + $0x13e] sm:$0x3f] }
 0x245   : > { %v5306_v9 = vpop.f32.mrb[0].mxu0  ;;  %1143 = vrot.lane.b32.xlu1 %v418_v47, %s5779_s10  ;;  %1538 = vrot.lane.b32.xlu0 %v491_v46, %s5782_s17  ;;  %v456_v47 = vld [vmem:[%s5835_s24 + $0x135] sm:$0xff]  ;;  %v3166_v46 = vmul.u32 18, %v3165_v22  ;;  %v3622_v56 = vadd.s32 18, %v7424_v41  ;;  %vm3549_vm11 = vcmp.lt.s32.totalorder %v7479_v1, 0  ;;  %vm7554_vm2 = vmand %vm3550_vm12, %vm3514_vm14  ;;  %v3621_v50 = vadd.s32 18, %v7479_v1 }
 0x246   : > { %v2072_v59 = vadd.f32 %v5306_v9, %v7412_v39  ;;  %v2066_v14 = vpop.f32.mrb[1].mxu0  ;;  %v7540_v31 = vmul.u32.u64.low 3817748708, %v7497_v40  ;;  %v7541_v0 = vmul.u32.u64.high 3817748708, %v7497_v40, %v7540_v31  ;;  %v2490_v23 = vmul.u32 328, %v2489_v55  ;;  %v10837_v11 = vld [vmem:[#allocation54_spill] sm:$0xff] }
 0x247   : > { %v2067_v49 = vadd.f32 %v7412_v39, %v2066_v14  ;;  %v7466_v15 = vpop.permute.xlu1 %979  ;;  %v1517_v20 = vpop.permute.xlu0 %1516  ;;  %v492_v14 = vld [vmem:[%s5835_s24 + $0x136] sm:$0xff]  ;;  %vm2836_vm14 = vcmp.lt.s32.totalorder %v7527_v35, 0  ;;  %vm3159_vm12 = vcmp.lt.s32.totalorder %v7230_v16, 0 }
 0x248   : > { %v2249_v4 = vmax.f32 %v2072_v59, 0.0  ;;  %v1861_v44 = vsel %vm10829_vm0, %v1824_v17, %v1517_v20  ;;  %v7544_v27 = vmul.u32.u64.low 3817748708, %v7510_v8  ;;  %v7545_v17 = vmul.u32.u64.high 3817748708, %v7510_v8, %v7544_v27 }
 0x249   : > { %v2248_v12 = vmax.f32 %v2067_v49, 0.0  ;;  %1254 = vrot.lane.b32.xlu1 %v421_v28, %s5780_s13  ;;  %1252 = vrot.lane.b32.xlu0 %v420_v61, %s5780_s13  ;;  %v3167_v28 = vsub.s32 %v7309_v43, %v3166_v46  ;;  %vm3170_vm0 = vcmp.lt.s32.totalorder %v7222_v10, 0  ;;  %v3658_v46 = vsel %vm7554_vm2, %v3622_v56, %v7424_v41 }
 0x24a   : > { %v2287_v58 = vsel %vm10697_vm8, %v2249_v4, %v2072_v59  ;;  %5337 = vmatprep.mubr.msk.f32.mxu0 %vm10698_vm9, %v1861_v44  ;;  %v2333_v59 = vadd.s32 80, %v6788_v2  ;;  %v7559_v4 = vadd.s32 19, %v2334_v45  ;;  %vm7608_vm2 = vcmp.lt.s32.totalorder %v3658_v46, 16 }
 0x24b   : > { %v3836_v24 = vsel %vm3728_vm15, %v2287_v58, 0.0  ;;  %v2286_v3 = vsel %vm10697_vm8, %v2248_v12, %v2067_v49  ;;  %v1519_v54 = vpop.permute.xlu1 %1518  ;;  %v7507_v9 = vpop.permute.xlu0 %1121  ;;  %v10831_v49 = vld [vmem:[#allocation33_spill] sm:$0xff]  ;;  %vm2800_vm15 = vcmp.ne.s32.totalorder %v7527_v35, 0  ;;  %v3168_v58 = vsub.s32 0, %v3167_v28 }
 0x24c   : > { %3872 = vst.msk [vmem:[#allocation2 + $0x1b] sm:$0xff] %vm10700_vm6, %v3836_v24  ;;  %v3835_v38 = vsel %vm3727_vm4, %v2286_v3, 0.0  ;;  %v1862_v51 = vsel %vm10830_vm10, %v1825_v42, %v1519_v54  ;;  %vm3513_vm4 = vcmp.ne.s32.totalorder %v7479_v1, 0  ;;  %v1642_v20 = vsel %vm10696_vm1, %v7153_v26, %v10831_v49  ;;  %v10836_v12 = vld [vmem:[#allocation53_spill] sm:$0xff] }
 0x24d   : > { %3871 = vst.msk [vmem:[#allocation2 + $0x13] sm:$0xff] %vm10700_vm6, %v3835_v38  ;;  %1398 = vrot.lane.b32.xlu1 %v457_v6, %s5781_s16  ;;  %1396 = vrot.lane.b32.xlu0 %v456_v47, %s5781_s16  ;;  %vm7563_vm13 = vmand %vm3549_vm11, %vm3513_vm4  ;;  %v3179_v26 = vsub.s32 0, %v3178_v32  ;;  %v7569_v52 = vadd.s32 19, %v2333_v59  ;;  %v1680_v62 = vsel %vm10695_vm3, %v7366_v60, %v10836_v12  ;;  %v1679_v37 = vsel %vm10695_vm3, %v1642_v20, %v10837_v11 }
 0x24e   : > { %5338 = vmatmul.mubr.msk.f32.gmra.mrb[22].mxu0 %vm10698_vm9, %v1862_v51  ;;  %vm3010_vm10 = vcmp.ge.s32.totalorder %v7045_v19, 0  ;;  %v2908_v42 = vadd.s32 328, %v7527_v35  ;;  %v3657_v60 = vsel %vm7563_vm13, %v3621_v50, %v7479_v1  ;;  %vm7590_vm4 = vmand %vm2836_vm14, %vm2800_vm15  ;;  %v7595_v3 = vsub.s32 %v7389_v30, %v2490_v23 }
 0x24f   : > { %v1233_v61 = vpop.permute.xlu1 %1232  ;;  %v7537_v22 = vpop.permute.xlu0 %1123  ;;  %v7598_v41 = vmul.u32.u64.low 3352169597, %v7559_v4  ;;  %v7599_v54 = vmul.u32.u64.high 3352169597, %v7559_v4, %v7598_v41  ;;  %vm3046_vm11 = vcmp.lt.s32.totalorder %v7045_v19, 286  ;;  %v7602_v38 = vsel %vm3170_vm0, %v3179_v26, %v3178_v32 }
 0x250   : > { %v7605_v1 = vmul.u32.u64.low 3352169597, %v7569_v52  ;;  %v7606_v51 = vmul.u32.u64.high 3352169597, %v7569_v52, %v7605_v1  ;;  %vm3009_vm13 = vcmp.ge.s32.totalorder %v7071_v13, 0  ;;  %vm3045_vm15 = vcmp.lt.s32.totalorder %v7071_v13, 286  ;;  %v268_v41 = vld [vmem:[%s5835_s24 + $0x100] sm:$0xff] }
 0x251   : > { %1542 = vrot.lane.b32.xlu1 %v493_v7, %s5782_s17  ;;  %1540 = vrot.lane.b32.xlu0 %v492_v14, %s5782_s17  ;;  %v7614_v30 = vsel %vm3159_vm12, %v3168_v58, %v3167_v28  ;;  %vm7618_vm14 = vcmp.lt.s32.totalorder %v3657_v60, 16  ;;  %v3198_v7 = vshrl.u32 %v7541_v0, 4  ;;  %v3187_v14 = vshrl.u32 %v7545_v17, 4  ;;  %vm7652_vm12 = vmand %vm3009_vm13, %vm3045_vm15 }
 0x252   : > { %v2944_v56 = vsel %vm7590_vm4, %v2908_v42, %v7527_v35  ;;  %vm10844_vm0 = vcmask 130048   ;;  %vm2799_vm1 = vcmp.ne.s32.totalorder %v7595_v3, 0  ;;  %vm2835_vm8 = vcmp.lt.s32.totalorder %v7595_v3, 0  ;;  %vm7639_vm4 = vmand %vm3010_vm10, %vm3046_vm11 }
 0x253   : > { %v1377_v6 = vpop.permute.xlu1 %1376  ;;  %v1235_v47 = vpop.permute.xlu0 %1234  ;;  %v1716_v31 = vsel %vm10844_vm0, %v1679_v37, %v7407_v34  ;;  %vm3515_vm0 = vcmp.ne.s32.totalorder %v7614_v30, 0  ;;  %vm3551_vm3 = vcmp.lt.s32.totalorder %v7614_v30, 0  ;;  %v2336_v34 = vadd.s32 104, %v6788_v2  ;;  %vm7667_vm10 = vmand %vm2835_vm8, %vm2799_vm1 }
 0x254   : > { %v1753_v28 = vsel %vm1728_vm5, %v1716_v31, %v7507_v9  ;;  %v7656_v49 = vadd.s32 4294967277, %v2944_v56  ;;  %v2907_v20 = vadd.s32 328, %v7595_v3  ;;  %v3199_v44 = vmul.u32 18, %v3198_v7  ;;  %vm3730_vm13 = vmand %vm7639_vm4, %vm7608_vm2 }
 0x255   : > { %v1789_v27 = vsel %vm10700_vm6, %v1753_v28, %v1233_v61  ;;  %v3188_v26 = vmul.u32 18, %v3187_v14  ;;  %vm10851_vm11 = vcmask 130048   ;;  %vm10852_vm15 = vcmask 261120   ;;  %vm3729_vm1 = vmand %vm7652_vm12, %vm7618_vm14 }
 0x256   : > { %v1826_v43 = vsel %vm10699_vm7, %v1789_v27, %v1377_v6  ;;  %v1717_v12 = vsel %vm10851_vm11, %v1680_v62, %v7466_v15  ;;  %v2522_v58 = vshrl.u32 %v7599_v54, 8  ;;  %v2511_v15 = vshrl.u32 %v7606_v51, 8  ;;  %v271_v54 = vld [vmem:[%s5835_s24 + $0x118] sm:$0x3f] }
 0x257   : > { %v1379_v45 = vpop.permute.xlu1 %1378  ;;  %v7616_v59 = vpop.permute.xlu0 %981  ;;  %v1754_v6 = vsel %vm1728_vm5, %v1717_v12, %v7537_v22  ;;  %v7687_v62 = vadd.s32 19, %v2336_v34  ;;  %vm10853_vm8 = vcmp.lt.s32.totalorder %v7330_v36, 16  ;;  %v3215_v24 = vsub.s32 0, %v7656_v49  ;;  %v10856_v34 = vld [vmem:[#allocation20_spill] sm:$0xff]  ;;  %v10858_v27 = vld [vmem:[#allocation21_spill] sm:$0xff] }
 0x258   : > { %v1790_v42 = vsel %vm10700_vm6, %v1754_v6, %v1235_v47  ;;  %v2943_v22 = vsel %vm7667_vm10, %v2907_v20, %v7595_v3  ;;  %vm10854_vm11 = vmmov %vm10853_vm8  ;;  %v3200_v56 = vsub.s32 %v7497_v40, %v3199_v44  ;;  %v2335_v31 = vadd.s32 96, %v6788_v2  ;;  %v10860_v20 = vld [vmem:[#allocation34_spill] sm:$0xff] }
 0x259   : > { %v5309_v0 = vpop.f32.mrb[2].mxu0  ;;  %v1827_v1 = vsel %vm10699_vm7, %v1790_v42, %v1379_v45  ;;  %vm10855_vm10 = vmmov %vm10852_vm15  ;;  %v2523_v45 = vmul.u32 328, %v2522_v58  ;;  %v7719_v28 = vadd.s32 4294967277, %v2943_v22  ;;  %v2512_v40 = vmul.u32 328, %v2511_v15  ;;  %v10872_v15 = vld [vmem:[#allocation56_spill] sm:$0xff] }
 0x25a   : > { %v2082_v17 = vadd.f32 %v5309_v0, %v7412_v39  ;;  %v2076_v9 = vpop.f32.mrb[3].mxu0  ;;  %v7722_v0 = vmul.u32.u64.low 3352169597, %v7687_v62  ;;  %v7723_v35 = vmul.u32.u64.high 3352169597, %v7687_v62, %v7722_v0  ;;  %vm10857_vm2 = vcmask 31744  }
 0x25b   : > { %v2077_v50 = vadd.f32 %v7412_v39, %v2076_v9  ;;  %v7661_v61 = vpop.permute.xlu1 %983  ;;  %v1521_v23 = vpop.permute.xlu0 %1520  ;;  %v7727_v32 = vsel %vm10857_vm2, %v268_v41, %v10856_v34  ;;  %vm10859_vm14 = vmmov %vm10857_vm2  ;;  %v3624_v9 = vadd.s32 18, %v7602_v38  ;;  %v7735_v19 = vmin.u32 %v7656_v49, %v3215_v24 }
 0x25c   : > { %v2251_v11 = vmax.f32 %v2082_v17, 0.0  ;;  %v1863_v37 = vsel %vm10852_vm15, %v1826_v43, %v1521_v23  ;;  %vm10861_vm12 = vcmask 64512   ;;  %vm10862_vm4 = vcmp.ne.s32.totalorder %v7602_v38, 0 }
 0x25d   : > { %v2250_v46 = vmax.f32 %v2077_v50, 0.0  ;;  %5340 = vmatprep.mubr.msk.f32.mxu0 %vm10698_vm9, %v1863_v37  ;;  %v1645_v43 = vsel %vm10861_vm12, %v7157_v48, %v10860_v20  ;;  %v3623_v13 = vadd.s32 18, %v7614_v30  ;;  %v3201_v12 = vsub.s32 0, %v3200_v56  ;;  %v10866_v37 = vld [vmem:[#allocation35_spill] sm:$0xff] }
 0x25e   : > { %v2289_v60 = vsel %vm10853_vm8, %v2251_v11, %v2082_v17  ;;  %v7731_v17 = vsel %vm10859_vm14, %v271_v54, %v10858_v27  ;;  %v3189_v11 = vsub.s32 %v7510_v8, %v3188_v26  ;;  %vm7759_vm8 = vmand %vm3551_vm3, %vm3515_vm0  ;;  %v7765_v6 = vsub.s32 %v7559_v4, %v2523_v45  ;;  %v10870_v8 = vld [vmem:[#allocation55_spill] sm:$0xff] }
 0x25f   : > { %v3838_v51 = vsel %vm3730_vm13, %v2289_v60, 0.0  ;;  %v2288_v47 = vsel %vm10854_vm11, %v2250_v46, %v2077_v50  ;;  %v1523_v7 = vpop.permute.xlu1 %1522  ;;  %v7706_v14 = vpop.permute.xlu0 %1125  ;;  %vm10863_vm13 = vcmp.lt.s32.totalorder %v7602_v38, 0  ;;  %vm3192_vm11 = vcmp.lt.s32.totalorder %v7405_v21, 0 }
 0x260   : > { %3874 = vst.msk [vmem:[#allocation2 + $0x2b] sm:$0xff] %vm10700_vm6, %v3838_v51  ;;  %v3837_v3 = vsel %vm3729_vm1, %v2288_v47, 0.0  ;;  %v1864_v55 = vsel %vm10855_vm10, %v1827_v1, %v1523_v7  ;;  %vm7746_vm15 = vmand %vm10863_vm13, %vm10862_vm4  ;;  %v7767_v46 = vadd.s32 19, %v2335_v31  ;;  %vm10871_vm10 = vcmask 97280   ;;  %v10897_v31 = vld [vmem:[#allocation22_spill] sm:$0xff] }
 0x261   : > { %3873 = vst.msk [vmem:[#allocation2 + $0x23] sm:$0xff] %vm10700_vm6, %v3837_v3  ;;  %5341 = vmatmul.mubr.msk.f32.gmra.mrb[24].mxu0 %vm10698_vm9, %v1864_v55  ;;  %vm10867_vm1 = vmmov %vm10861_vm12  ;;  %v1682_v26 = vsel %vm10871_vm10, %v1645_v43, %v10870_v8  ;;  %v3204_v42 = vsub.s32 0, %v7719_v28  ;;  %v7775_v60 = vsub.s32 %v7569_v52, %v2512_v40  ;;  %vm3012_vm3 = vcmp.ge.s32.totalorder %v7222_v10, 0  ;;  %v10899_v43 = vld [vmem:[#allocation36_spill] sm:$0xff] }
 0x262   : > { %v1644_v48 = vsel %vm10867_vm1, %v7173_v29, %v10866_v37  ;;  %vm10873_vm2 = vmmov %vm10871_vm10  ;;  %v3660_v4 = vsel %vm7746_vm15, %v3624_v9, %v7602_v38  ;;  %v7782_v24 = vmul.u32.u64.low 3817748708, %v7735_v19  ;;  %v7783_v22 = vmul.u32.u64.high 3817748708, %v7735_v19, %v7782_v24 }
 0x263   : > { %v1237_v50 = vpop.permute.xlu1 %1236  ;;  %v7740_v23 = vpop.permute.xlu0 %1127  ;;  %v1681_v29 = vsel %vm10873_vm2, %v1644_v48, %v10872_v15  ;;  %v3659_v1 = vsel %vm7759_vm8, %v3623_v13, %v7614_v30  ;;  %v7788_v51 = vsel %vm3192_vm11, %v3201_v12, %v3200_v56  ;;  %vm3181_vm0 = vcmp.lt.s32.totalorder %v7426_v57, 0 }
 0x264   : > { %v3190_v52 = vsub.s32 0, %v3189_v11  ;;  %vm2802_vm14 = vcmp.ne.s32.totalorder %v7765_v6, 0  ;;  %vm2838_vm12 = vcmp.lt.s32.totalorder %v7765_v6, 0  ;;  %v7798_v7 = vmin.u32 %v7719_v28, %v3204_v42 }
 0x265   : > { %v7794_v38 = vmul.u32.u64.low 3352169597, %v7767_v46  ;;  %v7795_v47 = vmul.u32.u64.high 3352169597, %v7767_v46, %v7794_v38  ;;  %vm2801_vm4 = vcmp.ne.s32.totalorder %v7775_v60, 0  ;;  %vm2837_vm13 = vcmp.lt.s32.totalorder %v7775_v60, 0  ;;  %vm7821_vm2 = vmand %vm2838_vm12, %vm2802_vm14 }
 0x266   : > { %v2544_v30 = vshrl.u32 %v7723_v35, 8  ;;  %vm3048_vm15 = vcmp.lt.s32.totalorder %v7222_v10, 286  ;;  %vm3047_vm8 = vcmp.lt.s32.totalorder %v7230_v16, 286  ;;  %v2338_v56 = vadd.s32 120, %v6788_v2  ;;  %vm7839_vm14 = vmand %vm2837_vm13, %vm2801_vm4 }
 0x267   : > { %v1381_v41 = vpop.permute.xlu1 %1380  ;;  %v1239_v54 = vpop.permute.xlu0 %1238  ;;  %vm7809_vm11 = vcmp.lt.s32.totalorder %v3660_v4, 16  ;;  %vm7813_vm10 = vcmp.lt.s32.totalorder %v3659_v1, 16  ;;  %v2910_v0 = vadd.s32 328, %v7765_v6  ;;  %v2909_v35 = vadd.s32 328, %v7775_v60 }
 0x268   : > { %vm10880_vm9 = vcmask 130048   ;;  %vm3518_vm7 = vcmp.ne.s32.totalorder %v7788_v51, 0  ;;  %vm3554_vm1 = vcmp.lt.s32.totalorder %v7788_v51, 0  ;;  %v7833_v27 = vsel %vm3181_vm0, %v3190_v52, %v3189_v11 }
 0x269   : > { %v1718_v34 = vsel %vm10880_vm9, %v1681_v29, %v7616_v59  ;;  %vm7849_vm9 = vmand %vm3012_vm3, %vm3048_vm15  ;;  %v7854_v44 = vmul.u32.u64.low 3817748708, %v7798_v7  ;;  %v7855_v13 = vmul.u32.u64.high 3817748708, %v7798_v7, %v7854_v44  ;;  %v2545_v12 = vmul.u32 328, %v2544_v30 }
 0x26a   : > { %v1755_v20 = vsel %vm1728_vm5, %v1718_v34, %v7706_v14  ;;  %vm10885_vm0 = vcmp.ge.s32.totalorder %v7230_v16, 0  ;;  %v3220_v14 = vshrl.u32 %v7783_v22, 4  ;;  %v7868_v58 = vadd.s32 19, %v2338_v56  ;;  %vm3732_vm13 = vmand %vm7849_vm9, %vm7809_vm11 }
 0x26b   : > { %v1383_v3 = vpop.permute.xlu1 %1382  ;;  %v7807_v55 = vpop.permute.xlu0 %985  ;;  %v1791_v11 = vsel %vm10700_vm6, %v1755_v20, %v1237_v50  ;;  %vm7863_vm12 = vmand %vm10885_vm0, %vm3047_vm8  ;;  %vm10888_vm3 = vcmask 228352   ;;  %v2946_v42 = vsel %vm7821_vm2, %v2910_v0, %v7765_v6  ;;  %v2945_v16 = vsel %vm7839_vm14, %v2909_v35, %v7775_v60 }
 0x26c   : > { %v1828_v8 = vsel %vm10888_vm3, %v1791_v11, %v1381_v41  ;;  %vm10889_vm4 = vcmask 130048   ;;  %vm10890_vm15 = vcmask 261120   ;;  %v2533_v41 = vshrl.u32 %v7795_v47, 8  ;;  %vm3731_vm8 = vmand %vm7863_vm12, %vm7813_vm10  ;;  %v270_v47 = vld [vmem:[%s5835_s24 + $0x110] sm:$0xff] }
 0x26d   : > { %v5312_v59 = vpop.f32.mrb[4].mxu0  ;;  %v1719_v4 = vsel %vm10889_vm4, %v1682_v26, %v7661_v61  ;;  %vm10891_vm2 = vcmask 293888   ;;  %v7896_v61 = vsub.s32 %v7687_v62, %v2545_v12  ;;  %v2337_v26 = vadd.s32 112, %v6788_v2  ;;  %vm10893_vm14 = vmmov %vm10888_vm3 }
 0x26e   : > { %v2092_v37 = vadd.f32 %v5312_v59, %v7412_v39  ;;  %v2086_v48 = vpop.f32.mrb[5].mxu0  ;;  %v1756_v6 = vsel %vm1728_vm5, %v1719_v4, %v7740_v23  ;;  %vm10892_vm11 = vcmp.lt.s32.totalorder %v7330_v36, 16  ;;  %v3221_v0 = vmul.u32 18, %v3220_v14  ;;  %vm10895_vm0 = vmmov %vm10890_vm15 }
 0x26f   : > { %v2087_v15 = vadd.f32 %v7412_v39, %v2086_v48  ;;  %v7872_v50 = vpop.permute.xlu1 %987  ;;  %v1525_v29 = vpop.permute.xlu0 %1524  ;;  %v1792_v60 = vsel %vm10700_vm6, %v1756_v6, %v1239_v54  ;;  %v7903_v23 = vmul.u32.u64.low 3352169597, %v7868_v58  ;;  %v7904_v38 = vmul.u32.u64.high 3352169597, %v7868_v58, %v7903_v23  ;;  %vm10894_vm9 = vmmov %vm10892_vm11 }
 0x270   : > { %v2253_v24 = vmax.f32 %v2092_v37, 0.0  ;;  %v1865_v22 = vsel %vm10890_vm15, %v1828_v8, %v1525_v29  ;;  %v1829_v30 = vsel %vm10893_vm14, %v1792_v60, %v1383_v3  ;;  %v7919_v34 = vadd.s32 4294967277, %v2946_v42  ;;  %vm10896_vm3 = vmmov %vm10891_vm2  ;;  %v10903_v8 = vld [vmem:[#allocation37_spill] sm:$0xff] }
 0x271   : > { %v2252_v1 = vmax.f32 %v2087_v15, 0.0  ;;  %5343 = vmatprep.mubr.msk.f32.mxu0 %vm10891_vm2, %v1865_v22  ;;  %v2534_v3 = vmul.u32 328, %v2533_v41  ;;  %vm3517_vm4 = vcmp.ne.s32.totalorder %v7833_v27, 0  ;;  %v7925_v9 = vadd.s32 4294967277, %v2945_v16  ;;  %vm7944_vm2 = vmand %vm3554_vm1, %vm3518_vm7 }
 0x272   : > { %v2291_v52 = vsel %vm10892_vm11, %v2253_v24, %v2092_v37  ;;  %v7927_v20 = vadd.s32 19, %v2337_v26  ;;  %vm10898_vm10 = vcmask 31744   ;;  %vm10900_vm12 = vcmask 64512  }
 0x273   : > { %v3840_v56 = vsel %vm3732_vm13, %v2291_v52, 0.0  ;;  %v2290_v45 = vsel %vm10894_vm9, %v2252_v1, %v2087_v15  ;;  %v1527_v62 = vpop.permute.xlu1 %1526  ;;  %v7910_v40 = vpop.permute.xlu0 %1129  ;;  %vm3553_vm13 = vcmp.lt.s32.totalorder %v7833_v27, 0  ;;  %v7931_v59 = vsel %vm10898_vm10, %v270_v47, %v10897_v31  ;;  %vm10904_vm11 = vmmov %vm10900_vm12  ;;  %v10913_v1 = vld [vmem:[#allocation58_spill] sm:$0xff] }
 0x274   : > { %3876 = vst.msk [vmem:[#allocation2 + $0x3b] sm:$0xff] %vm10700_vm6, %v3840_v56  ;;  %v3839_v54 = vsel %vm3731_vm8, %v2290_v45, 0.0  ;;  %v1866_v35 = vsel %vm10895_vm0, %v1829_v30, %v1527_v62  ;;  %v1647_v44 = vsel %vm10900_vm12, %v7177_v18, %v10899_v43  ;;  %vm2804_vm15 = vcmp.ne.s32.totalorder %v7896_v61, 0  ;;  %vm7959_vm7 = vmand %vm3553_vm13, %vm3517_vm4  ;;  %v10934_v43 = vld [vmem:[#allocation39_spill] sm:$0xff] }
 0x275   : > { %3875 = vst.msk [vmem:[#allocation2 + $0x33] sm:$0xff] %vm10700_vm6, %v3839_v54  ;;  %5344 = vmatmul.mubr.msk.f32.gmra.mrb[26].mxu0 %vm10896_vm3, %v1866_v35  ;;  %vm2840_vm8 = vcmp.lt.s32.totalorder %v7896_v61, 0  ;;  %v3626_v48 = vadd.s32 18, %v7788_v51  ;;  %v3625_v10 = vadd.s32 18, %v7833_v27  ;;  %v3222_v18 = vsub.s32 %v7735_v19, %v3221_v0  ;;  %vm10908_vm1 = vmmov %vm10904_vm11 }
 0x276   : > { %v3209_v14 = vshrl.u32 %v7855_v13, 4  ;;  %v1646_v15 = vsel %vm10904_vm11, %v7181_v33, %v10903_v8  ;;  %v3237_v42 = vsub.s32 0, %v7919_v34  ;;  %v2912_v16 = vadd.s32 328, %v7896_v61  ;;  %v10907_v13 = vld [vmem:[#allocation38_spill] sm:$0xff]  ;;  %vm7978_vm14 = vmand %vm2840_vm8, %vm2804_vm15 }
 0x277   : > { %v1241_v12 = vpop.permute.xlu1 %1240  ;;  %v7938_v11 = vpop.permute.xlu0 %1131  ;;  %v7966_v19 = vsub.s32 %v7767_v46, %v2534_v3  ;;  %v7971_v4 = vsel %vm10908_vm1, %v7189_v5, %v10907_v13  ;;  %v3226_v33 = vsub.s32 0, %v7925_v9  ;;  %v10911_v46 = vld [vmem:[#allocation57_spill] sm:$0xff]  ;;  %vm10912_vm9 = vcmask 97280  }
 0x278   : > { %v7983_v22 = vmul.u32.u64.low 3352169597, %v7927_v20  ;;  %v7984_v41 = vmul.u32.u64.high 3352169597, %v7927_v20, %v7983_v22  ;;  %v1684_v6 = vsel %vm10912_vm9, %v1647_v44, %v10911_v46  ;;  %vm10914_vm0 = vmmov %vm10912_vm9  ;;  %vm3014_vm3 = vcmp.ge.s32.totalorder %v7405_v21, 0 }
 0x279   : > { %v1683_v5 = vsel %vm10914_vm0, %v1646_v15, %v10913_v1  ;;  %v2566_v26 = vshrl.u32 %v7904_v38, 8  ;;  %v3662_v23 = vsel %vm7944_vm2, %v3626_v48, %v7788_v51  ;;  %v3661_v47 = vsel %vm7959_vm7, %v3625_v10, %v7833_v27 }
 0x27a   : > { %v3223_v30 = vsub.s32 0, %v3222_v18  ;;  %v3210_v56 = vmul.u32 18, %v3209_v14  ;;  %v7999_v45 = vmin.u32 %v7919_v34, %v3237_v42  ;;  %v2948_v62 = vsel %vm7978_vm14, %v2912_v16, %v7896_v61 }
 0x27b   : > { %v1385_v60 = vpop.permute.xlu1 %1384  ;;  %v1243_v52 = vpop.permute.xlu0 %1242  ;;  %vm2803_vm4 = vcmp.ne.s32.totalorder %v7966_v19, 0  ;;  %vm2839_vm13 = vcmp.lt.s32.totalorder %v7966_v19, 0  ;;  %vm3050_vm10 = vcmp.lt.s32.totalorder %v7405_v21, 286  ;;  %vm3013_vm12 = vcmp.ge.s32.totalorder %v7426_v57, 0 }
 0x27c   : > { %vm3214_vm15 = vcmp.lt.s32.totalorder %v7656_v49, 0  ;;  %v8010_v51 = vmin.u32 %v7925_v9, %v3226_v33  ;;  %vm8012_vm8 = vcmp.lt.s32.totalorder %v3662_v23, 16  ;;  %vm3049_vm2 = vcmp.lt.s32.totalorder %v7426_v57, 286  ;;  %vm8032_vm1 = vmand %vm2839_vm13, %vm2803_vm4 }
 0x27d   : > { %v2911_v61 = vadd.s32 328, %v7966_v19  ;;  %v2567_v38 = vmul.u32 328, %v2566_v26  ;;  %vm8020_vm11 = vcmp.lt.s32.totalorder %v3661_v47, 16  ;;  %vm3203_vm7 = vcmp.lt.s32.totalorder %v7719_v28, 0  ;;  %vm8050_vm9 = vmand %vm3014_vm3, %vm3050_vm10 }
 0x27e   : > { %v3211_v3 = vsub.s32 %v7798_v7, %v3210_v56  ;;  %v8026_v31 = vadd.s32 4294967277, %v2948_v62  ;;  %vm10921_vm14 = vcmask 130048   ;;  %v8038_v37 = vsel %vm3214_vm15, %v3223_v30, %v3222_v18  ;;  %vm8065_vm0 = vmand %vm3013_vm12, %vm3049_vm2 }
 0x27f   : > { %v1387_v0 = vpop.permute.xlu1 %1386  ;;  %v8018_v54 = vpop.permute.xlu0 %989  ;;  %v1720_v44 = vsel %vm10921_vm14, %v1683_v5, %v7807_v55  ;;  %v8041_v48 = vmul.u32.u64.low 3817748708, %v7999_v45  ;;  %v8042_v10 = vmul.u32.u64.high 3817748708, %v7999_v45, %v8041_v48  ;;  %v2555_v15 = vshrl.u32 %v7984_v41, 8  ;;  %vm10927_vm4 = vmmov %vm10921_vm14 }
 0x280   : > { %v1757_v7 = vsel %vm1728_vm5, %v1720_v44, %v7910_v40  ;;  %v8055_v55 = vmul.u32.u64.low 3817748708, %v8010_v51  ;;  %v8056_v18 = vmul.u32.u64.high 3817748708, %v8010_v51, %v8055_v55  ;;  %v2947_v16 = vsel %vm8032_vm1, %v2911_v61, %v7966_v19  ;;  %vm3734_vm13 = vmand %vm8050_vm9, %vm8012_vm8 }
 0x281   : > { %v5315_v14 = vpop.f32.mrb[6].mxu0  ;;  %v1793_v29 = vsel %vm10700_vm6, %v1757_v7, %v1241_v12  ;;  %v8073_v13 = vsub.s32 %v7868_v58, %v2567_v38  ;;  %vm10926_vm3 = vcmask 228352   ;;  %v3212_v41 = vsub.s32 0, %v3211_v3  ;;  %vm3733_vm12 = vmand %vm8065_vm0, %vm8020_vm11 }
 0x282   : > { %v2102_v42 = vadd.f32 %v5315_v14, %v7412_v39  ;;  %v2096_v40 = vpop.f32.mrb[7].mxu0  ;;  %v1830_v12 = vsel %vm10926_vm3, %v1793_v29, %v1385_v60  ;;  %v3259_v57 = vsub.s32 0, %v8026_v31  ;;  %v1721_v46 = vsel %vm10927_vm4, %v1684_v6, %v7872_v50  ;;  %vm10931_vm14 = vmmov %vm10926_vm3 }
 0x283   : > { %v2097_v33 = vadd.f32 %v7412_v39, %v2096_v40  ;;  %v8077_v24 = vpop.permute.xlu1 %991  ;;  %v1529_v22 = vpop.permute.xlu0 %1528  ;;  %vm10928_vm10 = vcmask 261120   ;;  %v2340_v19 = vadd.s32 136, %v6788_v2  ;;  %v1758_v5 = vsel %vm1728_vm5, %v1721_v46, %v7938_v11  ;;  %v10945_v46 = vld [vmem:[#allocation42_spill] sm:$0xff] }
 0x284   : > { %v2255_v1 = vmax.f32 %v2102_v42, 0.0  ;;  %v1867_v58 = vsel %vm10928_vm10, %v1830_v12, %v1529_v22  ;;  %vm10929_vm15 = vcmask 293888   ;;  %v8095_v50 = vadd.s32 4294967277, %v2947_v16  ;;  %vm10933_vm3 = vmmov %vm10928_vm10 }
 0x285   : > { %v2254_v26 = vmax.f32 %v2097_v33, 0.0  ;;  %5346 = vmatprep.mubr.msk.f32.mxu0 %vm10929_vm15, %v1867_v58  ;;  %v2556_v6 = vmul.u32 328, %v2555_v15  ;;  %v1794_v60 = vsel %vm10700_vm6, %v1758_v5, %v1243_v52  ;;  %vm10930_vm8 = vcmp.lt.s32.totalorder %v7330_v36, 16 }
 0x286   : > { %v2293_v23 = vsel %vm10930_vm8, %v2255_v1, %v2102_v42  ;;  %vm2806_vm2 = vcmp.ne.s32.totalorder %v8073_v13, 0  ;;  %vm2842_vm1 = vcmp.lt.s32.totalorder %v8073_v13, 0  ;;  %v1831_v11 = vsel %vm10931_vm14, %v1794_v60, %v1387_v0  ;;  %vm10932_vm9 = vmmov %vm10930_vm8  ;;  %v10951_v60 = vld [vmem:[#allocation60_spill] sm:$0xff] }
 0x287   : > { %v3842_v47 = vsel %vm3734_vm13, %v2293_v23, 0.0  ;;  %v2292_v30 = vsel %vm10932_vm9, %v2254_v26, %v2097_v33  ;;  %v1531_v56 = vpop.permute.xlu1 %1530  ;;  %v8105_v62 = vpop.permute.xlu0 %1133  ;;  %v8109_v27 = vsel %vm3203_vm7, %v3212_v41, %v3211_v3  ;;  %v2914_v38 = vadd.s32 328, %v8073_v13  ;;  %vm10936_vm7 = vmmov %vm10929_vm15  ;;  %v10943_v41 = vld [vmem:[#allocation41_spill] sm:$0xff] }
 0x288   : > { %3878 = vst.msk [vmem:[#allocation2 + $0x4b] sm:$0xff] %vm10700_vm6, %v3842_v47  ;;  %v3841_v52 = vsel %vm3733_vm12, %v2292_v30, 0.0  ;;  %v1868_v61 = vsel %vm10933_vm3, %v1831_v11, %v1531_v56  ;;  %v8119_v0 = vadd.s32 19, %v2340_v19  ;;  %vm10935_vm4 = vcmask 64512   ;;  %vm8131_vm11 = vmand %vm2842_vm1, %vm2806_vm2 }
 0x289   : > { %v1648_v44 = vsel %vm10935_vm4, %v7234_v63, %v10934_v43  ;;  %3877 = vst.msk [vmem:[#allocation2 + $0x43] sm:$0xff] %vm10700_vm6, %v3841_v52  ;;  %5347 = vmatmul.mubr.msk.f32.gmra.mrb[28].mxu0 %vm10936_vm7, %v1868_v61  ;;  %v3242_v3 = vshrl.u32 %v8042_v10, 4  ;;  %v8136_v48 = vsub.s32 %v7927_v20, %v2556_v6  ;;  %v2339_v7 = vadd.s32 128, %v6788_v2  ;;  %v10939_v63 = vld [vmem:[#allocation40_spill] sm:$0xff]  ;;  %vm10940_vm0 = vmmov %vm10935_vm4  ;;  %v10949_v6 = vld [vmem:[#allocation59_spill] sm:$0xff] }
 0x28a   : > { %v8142_v14 = vsel %vm10940_vm0, %v7265_v53, %v10939_v63  ;;  %vm3520_vm13 = vcmp.ne.s32.totalorder %v8038_v37, 0  ;;  %v8146_v10 = vmin.u32 %v8026_v31, %v3259_v57  ;;  %v3248_v8 = vsub.s32 0, %v8095_v50  ;;  %vm10944_vm14 = vmmov %vm10940_vm0 }
 0x28b   : > { %v1245_v55 = vpop.permute.xlu1 %1244  ;;  %v8149_v15 = vpop.permute.xlu0 %1135  ;;  %vm3556_vm10 = vcmp.lt.s32.totalorder %v8038_v37, 0  ;;  %v3628_v20 = vadd.s32 18, %v8038_v37  ;;  %vm3519_vm12 = vcmp.ne.s32.totalorder %v8109_v27, 0  ;;  %vm3555_vm15 = vcmp.lt.s32.totalorder %v8109_v27, 0  ;;  %vm10946_vm9 = vmmov %vm10940_vm0 }
 0x28c   : > { %v3231_v53 = vshrl.u32 %v8056_v18, 4  ;;  %v2950_v29 = vsel %vm8131_vm11, %v2914_v38, %v8073_v13  ;;  %v8160_v42 = vmul.u32.u64.low 3352169597, %v8119_v0  ;;  %v8161_v40 = vmul.u32.u64.high 3352169597, %v8119_v0, %v8160_v42  ;;  %vm8169_vm1 = vmand %vm3556_vm10, %vm3520_vm13 }
 0x28d   : > { %v3243_v21 = vmul.u32 18, %v3242_v3  ;;  %vm2805_vm8 = vcmp.ne.s32.totalorder %v8136_v48, 0  ;;  %vm2841_vm2 = vcmp.lt.s32.totalorder %v8136_v48, 0  ;;  %v8165_v16 = vadd.s32 19, %v2339_v7  ;;  %vm8197_vm3 = vmand %vm3555_vm15, %vm3519_vm12 }
 0x28e   : > { %v3627_v18 = vadd.s32 18, %v8109_v27  ;;  %v8175_v13 = vmul.u32.u64.low 3817748708, %v8146_v10  ;;  %v8176_v33 = vmul.u32.u64.high 3817748708, %v8146_v10, %v8175_v13  ;;  %v8179_v22 = vmin.u32 %v8095_v50, %v3248_v8  ;;  %vm8216_vm0 = vmand %vm2841_vm2, %vm2805_vm8 }
 0x28f   : > { %v8184_v57 = vsel %vm10944_vm14, %v7727_v32, %v10943_v41  ;;  %v8189_v1 = vsel %vm10946_vm9, %v7731_v17, %v10945_v46  ;;  %v1389_v58 = vpop.permute.xlu1 %1388  ;;  %v8191_v19 = vpop.permute.xlu0 %1246  ;;  %v8201_v26 = vadd.s32 4294967277, %v2950_v29  ;;  %v2913_v32 = vadd.s32 328, %v8136_v48 }
 0x290   : > { %vm10950_vm4 = vcmask 97280   ;;  %vm3016_vm11 = vcmp.ge.s32.totalorder %v7656_v49, 0  ;;  %v3232_v11 = vmul.u32 18, %v3231_v53  ;;  %v3664_v30 = vsel %vm8169_vm1, %v3628_v20, %v8038_v37 }
 0x291   : > { %v8207_v17 = vsel %vm10950_vm4, %v7971_v4, %v10949_v6  ;;  %vm10952_vm7 = vmmov %vm10950_vm4  ;;  %v3244_v4 = vsub.s32 %v7999_v45, %v3243_v21  ;;  %v8225_v56 = vmul.u32.u64.low 3352169597, %v8165_v16  ;;  %v8226_v52 = vmul.u32.u64.high 3352169597, %v8165_v16, %v8225_v56 }
 0x292   : > { %v1685_v23 = vsel %vm10952_vm7, %v1648_v44, %v10951_v60  ;;  %vm3052_vm13 = vcmp.lt.s32.totalorder %v7656_v49, 286  ;;  %v3663_v61 = vsel %vm8197_vm3, %v3627_v18, %v8109_v27  ;;  %vm3015_vm10 = vcmp.ge.s32.totalorder %v7719_v28, 0  ;;  %v4816_v49 = vld [vmem:[%s10689_s3 + $0x48] sm:$0xff] }
 0x293   : > { %v8233_v38 = vmul.u32.u64.low 3817748708, %v8179_v22  ;;  %v8234_v43 = vmul.u32.u64.high 3817748708, %v8179_v22, %v8233_v38  ;;  %v8236_v44 = vpop.permute.xlu1 %993  ;;  %v8238_v3 = vpop.permute.xlu0 %851  ;;  %vm3051_vm12 = vcmp.lt.s32.totalorder %v7719_v28, 286  ;;  %v3281_v45 = vsub.s32 0, %v8201_v26  ;;  %vm8260_vm2 = vmand %vm3016_vm11, %vm3052_vm13 }
 0x294   : > { %v2949_v37 = vsel %vm8216_vm0, %v2913_v32, %v8136_v48  ;;  %vm10955_vm15 = vcmask 130048   ;;  %vm8248_vm8 = vcmp.lt.s32.totalorder %v3664_v30, 16  ;;  %v3233_v7 = vsub.s32 %v8010_v51, %v3232_v11  ;;  %vm8275_vm9 = vmand %vm3015_vm10, %vm3051_vm12 }
 0x295   : > { %v1722_v27 = vsel %vm10955_vm15, %v1685_v23, %v8018_v54  ;;  %v2588_v63 = vshrl.u32 %v8161_v40, 8  ;;  %v5318_v20 = vpop.f32.mrb[8].mxu0  ;;  %vm8264_vm1 = vcmp.lt.s32.totalorder %v3663_v61, 16  ;;  %vm3236_vm14 = vcmp.lt.s32.totalorder %v7919_v34, 0  ;;  %vm3736_vm7 = vmand %vm8260_vm2, %vm8248_vm8 }
 0x296   : > { %v1759_v8 = vsel %vm1728_vm5, %v1722_v27, %v8105_v62  ;;  %v3245_v51 = vsub.s32 0, %v3244_v4  ;;  %v2112_v62 = vadd.f32 %v5318_v20, %v7412_v39  ;;  %v2106_v29 = vpop.f32.mrb[9].mxu0  ;;  %v3264_v42 = vshrl.u32 %v8176_v33, 4  ;;  %vm3735_vm0 = vmand %vm8275_vm9, %vm8264_vm1 }
 0x297   : > { %v1795_v53 = vsel %vm10700_vm6, %v1759_v8, %v1245_v55  ;;  %v8280_v40 = vadd.s32 4294967277, %v2949_v37  ;;  %vm10964_vm3 = vcmask 228352   ;;  %v2107_v12 = vadd.f32 %v7412_v39, %v2106_v29  ;;  %v1533_v55 = vpop.permute.xlu1 %1532  ;;  %v1391_v18 = vpop.permute.xlu0 %1390 }
 0x298   : > { %v1832_v21 = vsel %vm10964_vm3, %v1795_v53, %v1389_v58  ;;  %vm3225_vm4 = vcmp.lt.s32.totalorder %v7925_v9, 0  ;;  %v8286_v13 = vmin.u32 %v8201_v26, %v3281_v45  ;;  %v2257_v28 = vmax.f32 %v2112_v62, 0.0  ;;  %vm10969_vm1 = vmmov %vm10964_vm3 }
 0x299   : > { %vm10965_vm11 = vcmask 261120   ;;  %v3234_v41 = vsub.s32 0, %v3233_v7  ;;  %v2589_v46 = vmul.u32 328, %v2588_v63  ;;  %v2256_v58 = vmax.f32 %v2107_v12, 0.0 }
 0x29a   : > { %v1869_v33 = vsel %vm10965_vm11, %v1832_v21, %v1533_v55  ;;  %vm10966_vm13 = vcmask 293888   ;;  %v8300_v39 = vsel %vm3236_vm14, %v3245_v51, %v3244_v4  ;;  %v2577_v5 = vshrl.u32 %v8226_v52, 8  ;;  %vm10970_vm9 = vmmov %vm10965_vm11 }
 0x29b   : > { %5349 = vmatprep.mubr.msk.f32.mxu0 %vm10966_vm13, %v1869_v33  ;;  %v2342_v32 = vadd.s32 152, %v6788_v2  ;;  %vm10967_vm10 = vcmp.lt.s32.totalorder %v7330_v36, 16  ;;  %v3265_v60 = vmul.u32 18, %v3264_v42  ;;  %v3253_v23 = vshrl.u32 %v8234_v43, 4  ;;  %v8310_v56 = vpop.permute.xlu1 %1137  ;;  %v8312_v4 = vpop.permute.xlu0 %995 }
 0x29c   : > { %v2295_v6 = vsel %vm10967_vm10, %v2257_v28, %v2112_v62  ;;  %v3270_v11 = vsub.s32 0, %v8280_v40  ;;  %vm10968_vm12 = vmmov %vm10967_vm10  ;;  %v8315_v52 = vmul.u32.u64.low 3817748708, %v8286_v13  ;;  %v8316_v61 = vmul.u32.u64.high 3817748708, %v8286_v13, %v8315_v52 }
 0x29d   : > { %v3844_v47 = vsel %vm3736_vm7, %v2295_v6, 0.0  ;;  %v2294_v30 = vsel %vm10968_vm12, %v2256_v58, %v2107_v12  ;;  %v1723_v38 = vsel %vm10955_vm15, %v8207_v17, %v8077_v24  ;;  %v8329_v45 = vsel %vm3225_vm4, %v3234_v41, %v3233_v7  ;;  %vm10971_vm7 = vmmov %vm10966_vm13  ;;  %v4807_v41 = vld [vmem:[%s10689_s3] sm:$0xff] }
 0x29e   : > { %3880 = vst.msk [vmem:[#allocation2 + $0x5b] sm:$0xff] %vm10700_vm6, %v3844_v47  ;;  %v3843_v43 = vsel %vm3735_vm0, %v2294_v30, 0.0  ;;  %v8332_v37 = vsub.s32 %v8119_v0, %v2589_v46  ;;  %v1760_v27 = vsel %vm1728_vm5, %v1723_v38, %v8149_v15  ;;  %vm3522_vm8 = vcmp.ne.s32.totalorder %v8300_v39, 0  ;;  %v4808_v46 = vld [vmem:[%s10689_s3 + $0x8] sm:$0xff]  ;;  %v4810_v38 = vld [vmem:[%s10689_s3 + $0x18] sm:$0xff] }
 0x29f   : > { %3879 = vst.msk [vmem:[#allocation2 + $0x53] sm:$0xff] %vm10700_vm6, %v3843_v43  ;;  %v2578_v24 = vmul.u32 328, %v2577_v5  ;;  %v8338_v17 = vadd.s32 19, %v2342_v32  ;;  %v1796_v35 = vsel %vm10700_vm6, %v1760_v27, %v8191_v19  ;;  %vm3558_vm2 = vcmp.lt.s32.totalorder %v8300_v39, 0  ;;  %v8350_v63 = vpop.permute.xlu1 %1139  ;;  %v1535_v8 = vpop.permute.xlu0 %1534 }
 0x2a0   : > { %v8344_v7 = vadd.s32 18, %v8300_v39  ;;  %v8347_v0 = vmin.u32 %v8280_v40, %v3270_v11  ;;  %v1833_v15 = vsel %vm10969_vm1, %v1796_v35, %v1391_v18  ;;  %vm3521_vm14 = vcmp.ne.s32.totalorder %v8329_v45, 0  ;;  %vm8376_vm13 = vmand %vm3558_vm2, %vm3522_vm8  ;;  %v10982_v35 = vld [vmem:[#allocation61_spill] sm:$0xff] }
 0x2a1   : > { %v3266_v20 = vsub.s32 %v8146_v10, %v3265_v60  ;;  %v3254_v48 = vmul.u32 18, %v3253_v23  ;;  %v1870_v19 = vsel %vm10970_vm9, %v1833_v15, %v1535_v8  ;;  %vm2808_vm3 = vcmp.ne.s32.totalorder %v8332_v37, 0  ;;  %v10972_v10 = vld [vmem:[#allocation43_spill] sm:$0xff] }
 0x2a2   : > { %vm2844_vm4 = vcmp.lt.s32.totalorder %v8332_v37, 0  ;;  %v2341_v54 = vadd.s32 144, %v6788_v2  ;;  %5350 = vmatmul.mubr.msk.f32.gmra.mrb[30].mxu0 %vm10971_vm7, %v1870_v19  ;;  %vm3557_vm11 = vcmp.lt.s32.totalorder %v8329_v45, 0  ;;  %v8361_v51 = vsub.s32 %v8165_v16, %v2578_v24  ;;  %v4812_v19 = vld [vmem:[%s10689_s3 + $0x28] sm:$0xff] }
 0x2a3   : > { %v8364_v53 = vmul.u32.u64.low 3352169597, %v8338_v17  ;;  %v8365_v62 = vmul.u32.u64.high 3352169597, %v8338_v17, %v8364_v53  ;;  %vm10973_vm0 = vcmask 64512   ;;  %v2916_v21 = vadd.s32 328, %v8332_v37  ;;  %v8385_v12 = vpop.permute.xlu1 %853  ;;  %v8387_v55 = vpop.permute.xlu0 %1248  ;;  %vm8396_vm12 = vmand %vm2844_vm4, %vm2808_vm3 }
 0x2a4   : > { %v8370_v29 = vsel %vm10973_vm0, %v7931_v59, %v10972_v10  ;;  %v8381_v16 = vmul.u32.u64.low 3817748708, %v8347_v0  ;;  %v8382_v42 = vmul.u32.u64.high 3817748708, %v8347_v0, %v8381_v16  ;;  %vm3018_vm10 = vcmp.ge.s32.totalorder %v7919_v34, 0  ;;  %vm8412_vm2 = vmand %vm3557_vm11, %vm3521_vm14  ;;  %v4815_v10 = vld [vmem:[%s10689_s3 + $0x40] sm:$0xff] }
 0x2a5   : > { %v3629_v59 = vadd.s32 18, %v8329_v45  ;;  %v3267_v18 = vsub.s32 0, %v3266_v20  ;;  %v3255_v28 = vsub.s32 %v8179_v22, %v3254_v48  ;;  %vm3054_vm15 = vcmp.lt.s32.totalorder %v7919_v34, 286 }
 0x2a6   : > { %vm3017_vm8 = vcmp.ge.s32.totalorder %v7925_v9, 0  ;;  %vm3258_vm1 = vcmp.lt.s32.totalorder %v8026_v31, 0  ;;  %v8417_v58 = vadd.s32 19, %v2341_v54  ;;  %v3666_v5 = vsel %vm8376_vm13, %v8344_v7, %v8300_v39  ;;  %vm8450_vm7 = vmand %vm3018_vm10, %vm3054_vm15  ;;  %v8488_v54 = vld [vmem:[%s10688_s2] ss:$0 sm:$0xff] }
 0x2a7   : > { %vm3053_vm9 = vcmp.lt.s32.totalorder %v7925_v9, 286  ;;  %v3286_v32 = vshrl.u32 %v8316_v61, 4  ;;  %vm2807_vm3 = vcmp.ne.s32.totalorder %v8361_v51, 0  ;;  %v2952_v6 = vsel %vm8396_vm12, %v2916_v21, %v8332_v37  ;;  %v1393_v23 = vpop.permute.xlu1 %1392  ;;  %v8430_v11 = vpop.permute.xlu0 %1250  ;;  %v4809_v61 = vld [vmem:[%s10689_s3 + $0x10] sm:$0xff] }
 0x2a8   : > { %vm2843_vm14 = vcmp.lt.s32.totalorder %v8361_v51, 0  ;;  %v5367_v60 = vpack.c.bf16 %v4808_v46, %v4807_v41  ;;  %v3665_v39 = vsel %vm8412_vm2, %v3629_v59, %v8329_v45  ;;  %v8435_v47 = vsel %vm3258_vm1, %v3267_v18, %v3266_v20  ;;  %vm8495_vm10 = vmand %vm3017_vm8, %vm3053_vm9 }
 0x2a9   : > { %vm3247_vm4 = vcmp.lt.s32.totalorder %v8095_v50, 0  ;;  %v3256_v30 = vsub.s32 0, %v3255_v28  ;;  %v5784_v52 = vmov 0.0|0.0   ;;  %v2915_v45 = vadd.s32 328, %v8361_v51  ;;  %v5321_v15 = vpop.f32.mrb[10].mxu0  ;;  %vm8472_vm13 = vmand %vm2843_vm14, %vm2807_vm3 }
 0x2aa   : > { %5405 = vmatprep.subr.bf16.mxu1 %v5784_v52  ;;  %5366 = vmatprep.subr.bf16.mxu0 %v5784_v52  ;;  %v8456_v37 = vmul.u32.u64.low 3352169597, %v8417_v58  ;;  %v8457_v27 = vmul.u32.u64.high 3352169597, %v8417_v58, %v8456_v37  ;;  %v5370_v24 = vpack.c.bf16 %v4810_v38, %v4809_v61  ;;  %vm10983_vm11 = vcmask 97280  }
 0x2ab   : > { %5419 = vmatpush1.bf16.msra.mxu1 %v5367_v60  ;;  %5368 = vmatpush1.bf16.msra.mxu0 %v5367_v60  ;;  %v1687_v7 = vsel %vm10983_vm11, %v8184_v57, %v10982_v35  ;;  %vm8462_vm0 = vcmp.lt.s32.totalorder %v3666_v5, 16  ;;  %v8466_v8 = vadd.s32 4294967277, %v2952_v6  ;;  %v2610_v48 = vshrl.u32 %v8365_v62, 8  ;;  %v4811_v57 = vld [vmem:[%s10689_s3 + $0x20] sm:$0xff]  ;;  %v2116_v62 = vpop.f32.mrb[11].mxu0  ;;  %v8505_v18 = vpop.permute.xlu1 %997 }
 0x2ac   : > { %5406 = vmatprep.subr.bf16.mxu1 %v5784_v52  ;;  %5369 = vmatprep.subr.bf16.mxu0 %v5784_v52  ;;  %v2122_v53 = vadd.f32 %v8488_v54, %v5321_v15  ;;  %vm8499_vm12 = vcmp.lt.s32.totalorder %v3665_v39, 16  ;;  %v3287_v16 = vmul.u32 18, %v3286_v32  ;;  %v3275_v21 = vshrl.u32 %v8382_v42, 4  ;;  %v8507_v33 = vpop.permute.xlu0 %855  ;;  %vm3738_vm1 = vmand %vm8450_vm7, %vm8462_vm0 }
 0x2ad   : > { %v2117_v59 = vadd.f32 %v8488_v54, %v2116_v62  ;;  %vm3524_vm15 = vcmp.ne.s32.totalorder %v8435_v47, 0  ;;  %vm3560_vm8 = vcmp.lt.s32.totalorder %v8435_v47, 0  ;;  %v8513_v9 = vsel %vm3247_vm4, %v3256_v30, %v3255_v28  ;;  %vm3737_vm9 = vmand %vm8495_vm10, %vm8499_vm12 }
 0x2ae   : > { %vm10992_vm2 = vcmask 130048   ;;  %v2259_v46 = vmax.f32 %v2122_v53, 0.0  ;;  %v2951_v42 = vsel %vm8472_vm13, %v2915_v45, %v8361_v51  ;;  %v5373_v22 = vpack.c.bf16 %v4812_v19, %v4811_v57 }
 0x2af   : > { %v1724_v41 = vsel %vm10992_vm2, %v1687_v7, %v8236_v44  ;;  %5420 = vmatpush1.bf16.msra.mxu1 %v5370_v24  ;;  %5371 = vmatpush1.bf16.msra.mxu0 %v5370_v24  ;;  %v2258_v5 = vmax.f32 %v2117_v59, 0.0  ;;  %v3303_v44 = vsub.s32 0, %v8466_v8  ;;  %v2611_v32 = vmul.u32 328, %v2610_v48  ;;  %v1537_v38 = vpop.permute.xlu1 %1536 }
 0x2b0   : > { %v1761_v28 = vsel %vm1728_vm5, %v1724_v41, %v8310_v56  ;;  %5407 = vmatprep.subr.bf16.mxu1 %v5784_v52  ;;  %5372 = vmatprep.subr.bf16.mxu0 %v5784_v52  ;;  %vm10993_vm3 = vcmp.lt.s32.totalorder %v7330_v36, 16  ;;  %v8538_v56 = vsub.s32 %v8286_v13, %v3287_v16  ;;  %v3276_v60 = vmul.u32 18, %v3275_v21  ;;  %v4813_v13 = vld [vmem:[%s10689_s3 + $0x30] sm:$0xff] }
 0x2b1   : > { %v1797_v51 = vsel %vm10700_vm6, %v1761_v28, %v8387_v55  ;;  %v2297_v6 = vsel %vm10993_vm3, %v2259_v46, %v2122_v53  ;;  %vm10994_vm14 = vcmask 228352   ;;  %vm10995_vm4 = vmmov %vm10993_vm3  ;;  %v1395_v55 = vpop.permute.xlu0 %1394  ;;  %v2344_v45 = vadd.s32 168, %v6788_v2 }
 0x2b2   : > { %v1834_v39 = vsel %vm10994_vm14, %v1797_v51, %v1393_v23  ;;  %v3846_v30 = vsel %vm3738_vm1, %v2297_v6, 0.0  ;;  %v2296_v61 = vsel %vm10995_vm4, %v2258_v5, %v2117_v59  ;;  %v4814_v23 = vld [vmem:[%s10689_s3 + $0x38] sm:$0xff]  ;;  %vm10996_vm7 = vcmask 261120  }
 0x2b3   : > { %3882 = vst.msk [vmem:[#allocation2 + $0x6b] sm:$0xff] %vm10700_vm6, %v3846_v30  ;;  %v3845_v43 = vsel %vm3737_vm9, %v2296_v61, 0.0  ;;  %v1871_v37 = vsel %vm10996_vm7, %v1834_v39, %v1537_v38  ;;  %v8562_v24 = vadd.s32 4294967277, %v2951_v42  ;;  %v2599_v35 = vshrl.u32 %v8457_v27, 8  ;;  %5421 = vmatpush1.bf16.msra.mxu1 %v5373_v22  ;;  %5374 = vmatpush1.bf16.msra.mxu0 %v5373_v22  ;;  %v8588_v48 = vpop.permute.xlu1 %1141  ;;  %vm8610_vm9 = vmand %vm3560_vm8, %vm3524_vm15  ;;  %v4818_v39 = vld [vmem:[%s10689_s3 + $0x58] sm:$0xff] }
 0x2b4   : > { %3881 = vst.msk [vmem:[#allocation2 + $0x63] sm:$0xff] %vm10700_vm6, %v3845_v43  ;;  %vm10997_vm11 = vcmask 293888   ;;  %v8568_v7 = vadd.s32 18, %v8435_v47  ;;  %v8571_v15 = vmin.u32 %v8466_v8, %v3303_v44  ;;  %v8574_v34 = vsub.s32 %v8338_v17, %v2611_v32  ;;  %5408 = vmatprep.subr.bf16.mxu1 %v5784_v52  ;;  %5375 = vmatprep.subr.bf16.mxu0 %v5784_v52  ;;  %v3986_v32 = vld [vmem:[#allocation2 + $0x52] ss:$2 sm:$0xff]  ;;  %vm11004_vm4 = vmmov %vm10996_vm7 }
 0x2b5   : > { %5352 = vmatprep.mubr.msk.f32.mxu0 %vm10997_vm11, %v1871_v37  ;;  %v5376_v20 = vpack.c.bf16 %v4814_v23, %v4813_v13  ;;  %vm3020_vm0 = vcmp.ge.s32.totalorder %v8026_v31, 0  ;;  %vm3523_vm13 = vcmp.ne.s32.totalorder %v8513_v9, 0  ;;  %vm3559_vm10 = vcmp.lt.s32.totalorder %v8513_v9, 0  ;;  %v8590_v57 = vpop.permute.xlu0 %999  ;;  %v3952_v38 = vld [vmem:[#allocation2 + $0x51] ss:$2 sm:$0xff]  ;;  %vm11005_vm7 = vmmov %vm10997_vm11 }
 0x2b6   : > { %v8581_v27 = vadd.s32 18, %v8513_v9  ;;  %vm3280_vm12 = vcmp.lt.s32.totalorder %v8201_v26, 0  ;;  %vm10998_vm2 = vcmask 97280   ;;  %v3289_v19 = vsub.s32 0, %v8538_v56  ;;  %vm8621_vm3 = vmand %vm3559_vm10, %vm3523_vm13 }
 0x2b7   : > { %v1688_v17 = vsel %vm10998_vm2, %v8142_v14, %v8238_v3  ;;  %v8594_v53 = vsub.s32 %v8347_v0, %v3276_v60  ;;  %v8596_v62 = vadd.s32 19, %v2344_v45  ;;  %vm10999_vm1 = vcmask 130048   ;;  %5422 = vmatpush1.bf16.msra.mxu1 %v5376_v20  ;;  %5377 = vmatpush1.bf16.msra.mxu0 %v5376_v20  ;;  %v8640_v5 = vpop.permute.xlu1 %1143  ;;  %v4817_v60 = vld [vmem:[%s10689_s3 + $0x50] sm:$0xff] }
 0x2b8   : > { %v1725_v14 = vsel %vm10999_vm1, %v1688_v17, %v8312_v4  ;;  %v3292_v0 = vsub.s32 0, %v8562_v24  ;;  %v2600_v16 = vmul.u32 328, %v2599_v35  ;;  %v5379_v21 = vpack.c.bf16 %v4816_v49, %v4815_v10  ;;  %5409 = vmatprep.subr.bf16.mxu1 %v5784_v52  ;;  %5378 = vmatprep.subr.bf16.mxu0 %v5784_v52  ;;  %v4819_v49 = vld [vmem:[%s10689_s3 + $0x60] sm:$0xff] }
 0x2b9   : > { %v1762_v59 = vsel %vm1728_vm5, %v1725_v14, %v8350_v63  ;;  %v8626_v41 = vmul.u32.u64.low 3817748708, %v8571_v15  ;;  %v8627_v46 = vmul.u32.u64.high 3817748708, %v8571_v15, %v8626_v41  ;;  %vm2810_vm15 = vcmp.ne.s32.totalorder %v8574_v34, 0  ;;  %v1539_v44 = vpop.permute.xlu0 %1538  ;;  %v4820_v14 = vld [vmem:[%s10689_s3 + $0x68] sm:$0xff] }
 0x2ba   : > { %v1798_v63 = vsel %vm10700_vm6, %v1762_v59, %v8430_v11  ;;  %vm2846_vm8 = vcmp.lt.s32.totalorder %v8574_v34, 0  ;;  %v8636_v42 = vadd.s32 328, %v8574_v34  ;;  %v2343_v22 = vadd.s32 160, %v6788_v2  ;;  %v4826_v41 = vld [vmem:[%s10689_s3 + $0x98] sm:$0xff] }
 0x2bb   : > { %v1835_v28 = vsel %vm10994_vm14, %v1798_v63, %v1395_v55  ;;  %v3668_v51 = vsel %vm8610_vm9, %v8568_v7, %v8435_v47  ;;  %v8647_v11 = vmul.u32.u64.low 3352169597, %v8596_v62  ;;  %v8648_v6 = vmul.u32.u64.high 3352169597, %v8596_v62, %v8647_v11  ;;  %v8657_v61 = vld [vmem:[#allocation2 + $0x62] ss:$2 sm:$0xff]  ;;  %v3954_v55 = vld [vmem:[#allocation2 + $0x61] ss:$2 sm:$0xff]  ;;  %5423 = vmatpush1.bf16.msra.mxu1 %v5379_v21  ;;  %vm8676_vm11 = vmand %vm2846_vm8, %vm2810_vm15  ;;  %5380 = vmatpush1.bf16.msra.mxu0 %v5379_v21  ;;  %v1255_v7 = vpop.permute.xlu1 %1254 }
 0x2bc   : > { %v1872_v30 = vsel %vm11004_vm4, %v1835_v28, %v1539_v44  ;;  %v3667_v47 = vsel %vm8621_vm3, %v8581_v27, %v8513_v9  ;;  %v8664_v45 = vsub.s32 %v8417_v58, %v2600_v16  ;;  %v5382_v13 = vpack.c.bf16 %v4818_v39, %v4817_v60  ;;  %5410 = vmatprep.subr.bf16.mxu1 %v5784_v52  ;;  %v4827_v60 = vld [vmem:[%s10689_s3 + $0xa0] sm:$0xff] }
 0x2bd   : > { %5353 = vmatmul.mubr.msk.f32.gmra.mrb[32].mxu0 %vm11005_vm7, %v1872_v30  ;;  %v5607_v23 = vpack.i.bf16 %v8657_v61, %v3986_v32  ;;  %v5602_v43 = vpack.i.bf16 %v3954_v55, %v3952_v38  ;;  %v3278_v37 = vsub.s32 0, %v8594_v53  ;;  %v8670_v35 = vmin.u32 %v8562_v24, %v3292_v0  ;;  %v1253_v20 = vpop.permute.xlu0 %1252  ;;  %5381 = vmatprep.subr.bf16.mxu0 %v5784_v52 }
 0x2be   : > { %vm3056_vm13 = vcmp.lt.s32.totalorder %v8026_v31, 286  ;;  %vm3019_vm10 = vcmp.ge.s32.totalorder %v8095_v50, 0  ;;  %vm3269_vm2 = vcmp.lt.s32.totalorder %v8280_v40, 0  ;;  %v8684_v58 = vadd.s32 19, %v2343_v22 }
 0x2bf   : > { %5608 = vrot.lane.b32.xlu1 %v5607_v23, %s5785_s27  ;;  %5603 = vrot.lane.b32.xlu0 %v5602_v43, %s5780_s13  ;;  %vm8688_vm1 = vcmp.lt.s32.totalorder %v3668_v51, 16  ;;  %vm3055_vm9 = vcmp.lt.s32.totalorder %v8095_v50, 286  ;;  %vm8693_vm3 = vcmp.lt.s32.totalorder %v3667_v47, 16  ;;  %v8700_v10 = vsel %vm3280_vm12, %v3289_v19, %v8538_v56  ;;  %v5324_v19 = vpop.f32.mrb[12].mxu0  ;;  %vm8719_vm12 = vmand %vm3020_vm0, %vm3056_vm13  ;;  %v1399_v32 = vpop.permute.xlu1 %1398  ;;  %v4824_v23 = vld [vmem:[%s10689_s3 + $0x88] sm:$0xff] }
 0x2c0   : > { %v2954_v3 = vsel %vm8676_vm11, %v8636_v42, %v8574_v34  ;;  %vm2809_vm15 = vcmp.ne.s32.totalorder %v8664_v45, 0  ;;  %vm2845_vm8 = vcmp.lt.s32.totalorder %v8664_v45, 0  ;;  %5424 = vmatpush1.bf16.msra.mxu1 %v5382_v13  ;;  %v5385_v56 = vpack.c.bf16 %v4820_v14, %v4819_v49  ;;  %v2126_v31 = vpop.f32.mrb[13].mxu0  ;;  %vm8739_vm0 = vmand %vm3019_vm10, %vm3055_vm9  ;;  %5383 = vmatpush1.bf16.msra.mxu0 %v5382_v13 }
 0x2c1   : > { %v8726_v34 = vsel %vm3269_vm2, %v3278_v37, %v8594_v53  ;;  %v3308_v16 = vshrl.u32 %v8627_v46, 4  ;;  %v8730_v21 = vmul.u32.u64.low 3817748708, %v8670_v35  ;;  %v8731_v59 = vmul.u32.u64.high 3817748708, %v8670_v35, %v8730_v21  ;;  %5411 = vmatprep.subr.bf16.mxu1 %v5784_v52  ;;  %v4057_v53 = vld [vmem:[#allocation2 + $0x64] ss:$2 sm:$0xff]  ;;  %v1397_v51 = vpop.permute.xlu0 %1396  ;;  %vm8762_vm7 = vmand %vm2845_vm8, %vm2809_vm15  ;;  %5384 = vmatprep.subr.bf16.mxu0 %v5784_v52 }
 0x2c2   : > { %v2132_v4 = vadd.f32 %v8488_v54, %v5324_v19  ;;  %v2917_v63 = vadd.s32 328, %v8664_v45  ;;  %v8745_v42 = vmul.u32.u64.low 3352169597, %v8684_v58  ;;  %v8746_v22 = vmul.u32.u64.high 3352169597, %v8684_v58, %v8745_v42  ;;  %vm3740_vm10 = vmand %vm8719_vm12, %vm8688_vm1 }
 0x2c3   : > { %vm11016_vm14 = vcmask 97280   ;;  %v2127_v44 = vadd.f32 %v8488_v54, %v2126_v31  ;;  %4435 = vrot.lane.b32.xlu0 %v4057_v53, %s5786_s8  ;;  %v8756_v11 = vadd.s32 4294967277, %v2954_v3  ;;  %vm11020_vm11 = vcmask 130048   ;;  %vm3739_vm2 = vmand %vm8739_vm0, %vm8693_vm3  ;;  %v4825_v31 = vld [vmem:[%s10689_s3 + $0x90] sm:$0xff] }
 0x2c4   : > { %v1689_v28 = vsel %vm11016_vm14, %v8370_v29, %v8385_v12  ;;  %vm11017_vm4 = vmmov %vm11016_vm14  ;;  %v4822_v29 = vld [vmem:[%s10689_s3 + $0x78] sm:$0xff]  ;;  %v2261_v39 = vmax.f32 %v2132_v4, 0.0  ;;  %v2632_v30 = vshrl.u32 %v8648_v6, 8  ;;  %5425 = vmatpush1.bf16.msra.mxu1 %v5385_v56  ;;  %vm11022_vm9 = vcmp.lt.s32.totalorder %v7330_v36, 16  ;;  %5386 = vmatpush1.bf16.msra.mxu0 %v5385_v56 }
 0x2c5   : > { %v1690_v50 = vsel %vm11017_vm4, %v8189_v1, %v8507_v33  ;;  %v4821_v1 = vld [vmem:[%s10689_s3 + $0x70] sm:$0xff]  ;;  %v1726_v12 = vsel %vm11020_vm11, %v1689_v28, %v8505_v18  ;;  %vm11021_vm13 = vmmov %vm11020_vm11  ;;  %v2260_v47 = vmax.f32 %v2127_v44, 0.0  ;;  %5412 = vmatprep.subr.bf16.mxu1 %v5784_v52  ;;  %vm11024_vm15 = vcmask 228352   ;;  %5387 = vmatprep.subr.bf16.mxu0 %v5784_v52 }
 0x2c6   : > { %v1727_v33 = vsel %vm11021_vm13, %v1690_v50, %v8590_v57  ;;  %v1763_v38 = vsel %vm1728_vm5, %v1726_v12, %v8588_v48  ;;  %v5388_v18 = vpack.c.bf16 %v4822_v29, %v4821_v1  ;;  %v2299_v13 = vsel %vm11022_vm9, %v2261_v39, %v2132_v4  ;;  %vm11025_vm8 = vmmov %vm11024_vm15 }
 0x2c7   : > { %v1764_v55 = vsel %vm1728_vm5, %v1727_v33, %v8640_v5  ;;  %v1799_v6 = vsel %vm10700_vm6, %v1763_v38, %v1253_v20  ;;  %v2953_v48 = vsel %vm8762_vm7, %v2917_v63, %v8664_v45  ;;  %v4823_v5 = vld [vmem:[%s10689_s3 + $0x80] sm:$0xff]  ;;  %v3848_v43 = vsel %vm3740_vm10, %v2299_v13, 0.0  ;;  %vm11023_vm5 = vmmov %vm11022_vm9  ;;  %v1541_v20 = vpop.permute.xlu0 %1540 }
 0x2c8   : > { %v1800_v57 = vsel %vm10700_vm6, %v1764_v55, %v1255_v7  ;;  %v2298_v37 = vsel %vm11023_vm5, %v2260_v47, %v2127_v44  ;;  %v1836_v9 = vsel %vm11025_vm8, %v1799_v6, %v1397_v51  ;;  %v1543_v7 = vpop.permute.xlu1 %1542  ;;  %3884 = vst.msk [vmem:[#allocation2 + $0x7b] sm:$0xff] %vm10700_vm6, %v3848_v43  ;;  %vm11026_vm1 = vcmask 261120   ;;  %5426 = vmatpush1.bf16.msra.mxu1 %v5388_v18 }
 0x2c9   : > { %v1837_v45 = vsel %vm11024_vm15, %v1800_v57, %v1399_v32  ;;  %v3847_v27 = vsel %vm3739_vm2, %v2298_v37, 0.0  ;;  %vm11027_vm12 = vmmov %vm11026_vm1  ;;  %v5391_v3 = vpack.c.bf16 %v4824_v23, %v4823_v5  ;;  %vm11028_vm14 = vcmask 293888   ;;  %5413 = vmatprep.subr.bf16.mxu1 %v5784_v52  ;;  %5389 = vmatpush1.bf16.msra.mxu0 %v5388_v18  ;;  %v4023_v5 = vld [vmem:[#allocation2 + $0x63] ss:$2 sm:$0xff] }
 0x2ca   : > { %v1874_v49 = vsel %vm11026_vm1, %v1837_v45, %v1543_v7  ;;  %v1873_v14 = vsel %vm11027_vm12, %v1836_v9, %v1541_v20  ;;  %3883 = vst.msk [vmem:[#allocation2 + $0x73] sm:$0xff] %vm10700_vm6, %v3847_v27  ;;  %vm3526_vm4 = vcmp.ne.s32.totalorder %v8700_v10, 0  ;;  %vm3562_vm7 = vcmp.lt.s32.totalorder %v8700_v10, 0  ;;  %vm11029_vm11 = vmmov %vm11028_vm14  ;;  %5390 = vmatprep.subr.bf16.mxu0 %v5784_v52 }
 0x2cb   : > { %5355 = vmatprep.mubr.msk.f32.mxu0 %vm11028_vm14, %v1873_v14  ;;  %v2633_v56 = vmul.u32 328, %v2632_v30  ;;  %v3634_v17 = vadd.s32 18, %v8700_v10  ;;  %v3325_v19 = vsub.s32 0, %v8756_v11  ;;  %vm3525_vm3 = vcmp.ne.s32.totalorder %v8726_v34, 0  ;;  %vm8842_vm0 = vmand %vm3562_vm7, %vm3526_vm4 }
 0x2cc   : > { %5356 = vmatmul.mubr.msk.f32.gmra.mrb[34].mxu0 %vm11029_vm11, %v1874_v49  ;;  %v3309_v0 = vmul.u32 18, %v3308_v16  ;;  %v3297_v21 = vshrl.u32 %v8731_v59, 4  ;;  %v8834_v4 = vadd.s32 4294967277, %v2953_v48  ;;  %vm3561_vm13 = vcmp.lt.s32.totalorder %v8726_v34, 0  ;;  %5427 = vmatpush1.bf16.msra.mxu1 %v5391_v3  ;;  %v4829_v48 = vld [vmem:[%s10689_s3 + $0xb0] sm:$0xff] }
 0x2cd   : > { %v2621_v46 = vshrl.u32 %v8746_v22, 8  ;;  %v2346_v16 = vadd.s32 184, %v6788_v2  ;;  %v5394_v59 = vpack.c.bf16 %v4826_v41, %v4825_v31  ;;  %vm3022_vm10 = vcmp.ge.s32.totalorder %v8201_v26, 0  ;;  %5414 = vmatprep.subr.bf16.mxu1 %v5784_v52  ;;  %vm8870_vm15 = vmand %vm3561_vm13, %vm3525_vm3  ;;  %5392 = vmatpush1.bf16.msra.mxu0 %v5391_v3  ;;  %v4832_v31 = vld [vmem:[%s10689_s3 + $0xc8] sm:$0xff] }
 0x2ce   : > { %vm3058_vm2 = vcmp.lt.s32.totalorder %v8201_v26, 286  ;;  %v8853_v63 = vsub.s32 %v8596_v62, %v2633_v56  ;;  %v2345_v42 = vadd.s32 176, %v6788_v2  ;;  %vm3021_vm9 = vcmp.ge.s32.totalorder %v8280_v40, 0  ;;  %5393 = vmatprep.subr.bf16.mxu0 %v5784_v52 }
 0x2cf   : > { %vm3057_vm5 = vcmp.lt.s32.totalorder %v8280_v40, 286  ;;  %v3633_v22 = vadd.s32 18, %v8726_v34  ;;  %v8861_v28 = vmin.u32 %v8756_v11, %v3325_v19  ;;  %v3670_v50 = vsel %vm8842_vm0, %v3634_v17, %v8700_v10  ;;  %v4828_v10 = vld [vmem:[%s10689_s3 + $0xa8] sm:$0xff]  ;;  %vm8943_vm4 = vmand %vm3022_vm10, %vm3058_vm2 }
 0x2d0   : > { %v8875_v44 = vsub.s32 %v8571_v15, %v3309_v0  ;;  %v3298_v32 = vmul.u32 18, %v3297_v21  ;;  %v3314_v51 = vsub.s32 0, %v8834_v4  ;;  %v2622_v12 = vmul.u32 328, %v2621_v46  ;;  %5428 = vmatpush1.bf16.msra.mxu1 %v5394_v59  ;;  %vm8958_vm7 = vmand %vm3021_vm9, %vm3057_vm5  ;;  %v4831_v21 = vld [vmem:[%s10689_s3 + $0xc0] sm:$0xff] }
 0x2d1   : > { %v8884_v1 = vld [vmem:[#allocation2 + $0x74] ss:$2 sm:$0xff]  ;;  %v8888_v33 = vadd.s32 19, %v2346_v16  ;;  %v5397_v15 = vpack.c.bf16 %v4828_v10, %v4827_v60  ;;  %vm2812_vm8 = vcmp.ne.s32.totalorder %v8853_v63, 0  ;;  %vm2848_vm1 = vcmp.lt.s32.totalorder %v8853_v63, 0  ;;  %5415 = vmatprep.subr.bf16.mxu1 %v5784_v52  ;;  %5395 = vmatpush1.bf16.msra.mxu0 %v5394_v59  ;;  %v5327_v7 = vpop.f32.mrb[14].mxu0 }
 0x2d2   : > { %v8886_v29 = vld [vmem:[#allocation2 + $0x72] ss:$2 sm:$0xff]  ;;  %4488 = vrot.lane.b32.xlu1 %v8884_v1, %s5778_s7  ;;  %v8897_v30 = vadd.s32 19, %v2345_v42  ;;  %vm8900_vm12 = vcmp.lt.s32.totalorder %v3670_v50, 16  ;;  %v3669_v55 = vsel %vm8870_vm15, %v3633_v22, %v8726_v34  ;;  %v4025_v47 = vld [vmem:[#allocation2 + $0x73] ss:$2 sm:$0xff]  ;;  %v8914_v6 = vmin.u32 %v8834_v4, %v3314_v51  ;;  %vm8927_vm14 = vmand %vm2848_vm1, %vm2812_vm8  ;;  %5396 = vmatprep.subr.bf16.mxu0 %v5784_v52 }
 0x2d3   : > { %v5612_v39 = vpack.i.bf16 %v8886_v29, %v8657_v61  ;;  %v8908_v18 = vmul.u32.u64.low 3817748708, %v8861_v28  ;;  %v8909_v61 = vmul.u32.u64.high 3817748708, %v8861_v28, %v8908_v18  ;;  %v3311_v57 = vsub.s32 0, %v8875_v44  ;;  %v4830_v34 = vld [vmem:[%s10689_s3 + $0xb8] sm:$0xff]  ;;  %v2136_v56 = vpop.f32.mrb[15].mxu0  ;;  %vm3742_vm0 = vmand %vm8943_vm4, %vm8900_vm12 }
 0x2d4   : > { %v2920_v13 = vadd.s32 328, %v8853_v63  ;;  %v8932_v43 = vsub.s32 %v8684_v58, %v2622_v12  ;;  %v8935_v37 = vmul.u32.u64.low 3352169597, %v8888_v33  ;;  %v8936_v45 = vmul.u32.u64.high 3352169597, %v8888_v33, %v8935_v37  ;;  %5429 = vmatpush1.bf16.msra.mxu1 %v5397_v15  ;;  %v4833_v12 = vld [vmem:[%s10689_s3 + $0xd0] sm:$0xff] }
 0x2d5   : > { %5613 = vrot.lane.b32.xlu0 %v5612_v39, %s5787_s29  ;;  %v5400_v9 = vpack.c.bf16 %v4830_v34, %v4829_v48  ;;  %v5617_v27 = vpack.i.bf16 %v4025_v47, %v4023_v5  ;;  %v3299_v58 = vsub.s32 %v8670_v35, %v3298_v32  ;;  %5416 = vmatprep.subr.bf16.mxu1 %v5784_v52  ;;  %vm8962_vm11 = vcmp.lt.s32.totalorder %v3669_v55, 16 }
 0x2d6   : > { %v8949_v49 = vmul.u32.u64.low 3352169597, %v8897_v30  ;;  %v8950_v14 = vmul.u32.u64.high 3352169597, %v8897_v30, %v8949_v49  ;;  %v2142_v3 = vadd.f32 %v8488_v54, %v5327_v7  ;;  %vm3302_vm3 = vcmp.lt.s32.totalorder %v8466_v8, 0  ;;  %5398 = vmatpush1.bf16.msra.mxu0 %v5397_v15  ;;  %vm3741_vm2 = vmand %vm8958_vm7, %vm8962_vm11 }
 0x2d7   : > { %v2137_v35 = vadd.f32 %v8488_v54, %v2136_v56  ;;  %v8970_v19 = vmul.u32.u64.low 3817748708, %v8914_v6  ;;  %v8971_v0 = vmul.u32.u64.high 3817748708, %v8914_v6, %v8970_v19  ;;  %v2956_v40 = vsel %vm8927_vm14, %v2920_v13, %v8853_v63  ;;  %5399 = vmatprep.subr.bf16.mxu0 %v5784_v52 }
 0x2d8   : > { %v2263_v41 = vmax.f32 %v2142_v3, 0.0  ;;  %vm2811_vm13 = vcmp.ne.s32.totalorder %v8932_v43, 0  ;;  %vm2847_vm10 = vcmp.lt.s32.totalorder %v8932_v43, 0  ;;  %5430 = vmatpush1.bf16.msra.mxu1 %v5400_v9  ;;  %v5403_v53 = vpack.c.bf16 %v4832_v31, %v4831_v21 }
 0x2d9   : > { %5618 = vrot.lane.b32.xlu0 %v5617_v27, %s5788_s11  ;;  %v2262_v46 = vmax.f32 %v2137_v35, 0.0  ;;  %v3312_v16 = vsel %vm3302_vm3, %v3311_v57, %v8875_v44  ;;  %v3300_v59 = vsub.s32 0, %v3299_v58  ;;  %5417 = vmatprep.subr.bf16.mxu1 %v5784_v52  ;;  %vm11044_vm9 = vcmp.lt.s32.totalorder %v7330_v36, 16  ;;  %vm9017_vm8 = vmand %vm2847_vm10, %vm2811_vm13 }
 0x2da   : > { %v2301_v63 = vsel %vm11044_vm9, %v2263_v41, %v2142_v3  ;;  %vm3291_vm5 = vcmp.lt.s32.totalorder %v8562_v24, 0  ;;  %v2919_v42 = vadd.s32 328, %v8932_v43  ;;  %vm11045_vm15 = vmmov %vm11044_vm9  ;;  %v3330_v62 = vshrl.u32 %v8909_v61, 4  ;;  %5401 = vmatpush1.bf16.msra.mxu0 %v5400_v9 }
 0x2db   : > { %v3850_v22 = vsel %vm3742_vm0, %v2301_v63, 0.0  ;;  %v2300_v50 = vsel %vm11045_vm15, %v2262_v46, %v2137_v35  ;;  %v9011_v44 = vadd.s32 4294967277, %v2956_v40  ;;  %vm3528_vm1 = vcmp.ne.s32.totalorder %v3312_v16, 0  ;;  %5402 = vmatprep.subr.bf16.mxu0 %v5784_v52 }
 0x2dc   : > { %3886 = vst.msk [vmem:[#allocation2 + $0x8b] sm:$0xff] %vm10700_vm6, %v3850_v22  ;;  %v3849_v51 = vsel %vm3741_vm2, %v2300_v50, 0.0  ;;  %vm3564_vm12 = vcmp.lt.s32.totalorder %v3312_v16, 0  ;;  %v2654_v60 = vshrl.u32 %v8936_v45, 8  ;;  %5431 = vmatpush1.bf16.msra.mxu1 %v5403_v53  ;;  %v3301_v10 = vsel %vm3291_vm5, %v3300_v59, %v3299_v58 }
 0x2dd   : > { %4437 = vrot.lane.b32.xlu0 %v8884_v1, %s5786_s8  ;;  %3885 = vst.msk [vmem:[#allocation2 + $0x83] sm:$0xff] %vm10700_vm6, %v3849_v51  ;;  %v2643_v1 = vshrl.u32 %v8950_v14, 8  ;;  %5418 = vmatprep.subr.mxu1 %v5783_v25  ;;  %v3636_v15 = vadd.s32 18, %v3312_v16  ;;  %v2955_v39 = vsel %vm9017_vm8, %v2919_v42, %v8932_v43  ;;  %v2348_v52 = vadd.s32 200, %v6788_v2  ;;  %vm9041_vm14 = vmand %vm3564_vm12, %vm3528_vm1 }
 0x2de   : > { %v3331_v55 = vmul.u32 18, %v3330_v62  ;;  %v3319_v47 = vshrl.u32 %v8971_v0, 4  ;;  %v3347_v18 = vsub.s32 0, %v9011_v44  ;;  %5404 = vmatpush1.bf16.msra.mxu0 %v5403_v53  ;;  %vm3527_vm4 = vcmp.ne.s32.totalorder %v3301_v10, 0 }
 0x2df   : > { %vm3563_vm7 = vcmp.lt.s32.totalorder %v3301_v10, 0  ;;  %v2655_v61 = vmul.u32 328, %v2654_v60  ;;  %v2347_v57 = vadd.s32 192, %v6788_v2  ;;  %4945 = vmatprep.subr.mxu0 %v5783_v25  ;;  %v9049_v13 = vadd.s32 4294967277, %v2955_v39 }
 0x2e0   : > { %5432 = vmatpush1.msra.mxu1 %v4833_v12  ;;  %v2644_v48 = vmul.u32 328, %v2643_v1  ;;  %v3672_v34 = vsel %vm9041_vm14, %v3636_v15, %v3312_v16  ;;  %v3635_v5 = vadd.s32 18, %v3301_v10  ;;  %v9053_v23 = vadd.s32 19, %v2348_v52  ;;  %vm9056_vm3 = vmand %vm3563_vm7, %vm3527_vm4 }
 0x2e1   : > { %vm3024_vm11 = vcmp.ge.s32.totalorder %v8466_v8, 0  ;;  %v3332_v37 = vsub.s32 %v8861_v28, %v3331_v55  ;;  %v3320_v45 = vmul.u32 18, %v3319_v47  ;;  %v9062_v25 = vmin.u32 %v9011_v44, %v3347_v18 }
 0x2e2   : > { %4946 = vmatpush1.msra.mxu0 %v4833_v12  ;;  %vm3060_vm0 = vcmp.lt.s32.totalorder %v8466_v8, 286  ;;  %vm3023_vm13 = vcmp.ge.s32.totalorder %v8562_v24, 0  ;;  %v9067_v7 = vsub.s32 %v8888_v33, %v2655_v61  ;;  %v9069_v20 = vadd.s32 19, %v2347_v57 }
 0x2e3   : > { %vm9072_vm10 = vcmp.lt.s32.totalorder %v3672_v34, 16  ;;  %vm3059_vm2 = vcmp.lt.s32.totalorder %v8562_v24, 286  ;;  %v3336_v27 = vsub.s32 0, %v9049_v13  ;;  %v2645_v58 = vsub.s32 %v8897_v30, %v2644_v48  ;;  %vm9088_vm5 = vmand %vm3024_vm11, %vm3060_vm0 }
 0x2e4   : > { %v4094_v9 = vld [vmem:[#allocation2 + $0x75] ss:$2 sm:$0xff]  ;;  %v3671_v49 = vsel %vm9056_vm3, %v3635_v5, %v3301_v10  ;;  %vm3324_vm9 = vcmp.lt.s32.totalorder %v8756_v11, 0  ;;  %v9083_v33 = vmul.u32.u64.low 3352169597, %v9053_v23  ;;  %v9084_v14 = vmul.u32.u64.high 3352169597, %v9053_v23, %v9083_v33  ;;  %vm9108_vm1 = vmand %vm3023_vm13, %vm3059_vm2 }
 0x2e5   : > { %4556 = vrot.lane.b32.xlu1 %v4094_v9, %s5789_s21  ;;  %v3333_v56 = vsub.s32 0, %v3332_v37  ;;  %v3321_v26 = vsub.s32 %v8914_v6, %v3320_v45  ;;  %v9094_v30 = vmul.u32.u64.low 3817748708, %v9062_v25  ;;  %v9095_v17 = vmul.u32.u64.high 3817748708, %v9062_v25, %v9094_v30  ;;  %v4128_v35 = vld [vmem:[#allocation2 + $0x76] ss:$2 sm:$0xff]  ;;  %v5330_v8 = vpop.f32.mrb[16].mxu0  ;;  %vm3744_vm4 = vmand %vm9088_vm5, %vm9072_vm10 }
 0x2e6   : > { %vm2814_vm15 = vcmp.ne.s32.totalorder %v9067_v7, 0  ;;  %vm2850_vm8 = vcmp.lt.s32.totalorder %v9067_v7, 0  ;;  %v9100_v19 = vmul.u32.u64.low 3352169597, %v9069_v20  ;;  %v9101_v0 = vmul.u32.u64.high 3352169597, %v9069_v20, %v9100_v19  ;;  %v2146_v31 = vpop.f32.mrb[17].mxu0 }
 0x2e7   : > { %v9113_v40 = vmin.u32 %v9049_v13, %v3336_v27  ;;  %vm2813_vm12 = vcmp.ne.s32.totalorder %v2645_v58, 0  ;;  %vm2849_vm14 = vcmp.lt.s32.totalorder %v2645_v58, 0  ;;  %v2152_v21 = vadd.f32 %v8488_v54, %v5330_v8  ;;  %vm9131_vm11 = vmand %vm2850_vm8, %vm2814_vm15  ;;  %v9136_v42 = vld [vmem:[#allocation2 + $0x84] ss:$2 sm:$0xff]  ;;  %v3958_v30 = vld [vmem:[#allocation2 + $0x81] ss:$2 sm:$0xff] }
 0x2e8   : > { %vm9120_vm7 = vcmp.lt.s32.totalorder %v3671_v49, 16  ;;  %v2147_v24 = vadd.f32 %v8488_v54, %v2146_v31  ;;  %v3334_v53 = vsel %vm3324_vm9, %v3333_v56, %v3332_v37  ;;  %v2922_v16 = vadd.s32 328, %v9067_v7  ;;  %vm9140_vm3 = vmand %vm2849_vm14, %vm2813_vm12  ;;  %v3956_v6 = vld [vmem:[#allocation2 + $0x71] ss:$2 sm:$0xff] }
 0x2e9   : > { %4624 = vrot.lane.b32.xlu1 %v4128_v35, %s5790_s22  ;;  %v2921_v59 = vadd.s32 328, %v2645_v58  ;;  %v2265_v63 = vmax.f32 %v2152_v21, 0.0  ;;  %v3322_v22 = vsub.s32 0, %v3321_v26  ;;  %vm3743_vm0 = vmand %vm9108_vm1, %vm9120_vm7  ;;  %vm3313_vm13 = vcmp.lt.s32.totalorder %v8834_v4, 0 }
 0x2ea   : > { %v2264_v62 = vmax.f32 %v2147_v24, 0.0  ;;  %v9152_v32 = vmul.u32.u64.low 3817748708, %v9113_v40  ;;  %v9153_v51 = vmul.u32.u64.high 3817748708, %v9113_v40, %v9152_v32  ;;  %vm11064_vm2 = vcmp.lt.s32.totalorder %v7330_v36, 16 }
 0x2eb   : > { %v2303_v60 = vsel %vm11064_vm2, %v2265_v63, %v2152_v21  ;;  %vm3530_vm9 = vcmp.ne.s32.totalorder %v3334_v53, 0  ;;  %vm3566_vm15 = vcmp.lt.s32.totalorder %v3334_v53, 0  ;;  %v2676_v10 = vshrl.u32 %v9084_v14, 8  ;;  %vm11065_vm8 = vmmov %vm11064_vm2  ;;  %v9200_v14 = vld [vmem:[#allocation2 + $0x82] ss:$2 sm:$0xff] }
 0x2ec   : > { %v3852_v1 = vsel %vm3744_vm4, %v2303_v60, 0.0  ;;  %v2302_v12 = vsel %vm11065_vm8, %v2264_v62, %v2147_v24  ;;  %v2958_v15 = vsel %vm9131_vm11, %v2922_v16, %v9067_v7  ;;  %v2957_v39 = vsel %vm9140_vm3, %v2921_v59, %v2645_v58  ;;  %vm9180_vm10 = vmand %vm3566_vm15, %vm3530_vm9 }
 0x2ed   : > { %4490 = vrot.lane.b32.xlu1 %v9136_v42, %s5778_s7  ;;  %3888 = vst.msk [vmem:[#allocation2 + $0x9b] sm:$0xff] %vm10700_vm6, %v3852_v1  ;;  %v3851_v52 = vsel %vm3743_vm0, %v2302_v12, 0.0  ;;  %v3323_v38 = vsel %vm3313_vm13, %v3322_v22, %v3321_v26  ;;  %v3352_v55 = vshrl.u32 %v9095_v17, 4  ;;  %v2665_v47 = vshrl.u32 %v9101_v0, 8 }
 0x2ee   : > { %3887 = vst.msk [vmem:[#allocation2 + $0x93] sm:$0xff] %vm10700_vm6, %v3851_v52  ;;  %v3638_v18 = vadd.s32 18, %v3334_v53  ;;  %v9174_v61 = vadd.s32 4294967277, %v2958_v15  ;;  %v9176_v57 = vadd.s32 4294967277, %v2957_v39  ;;  %v2677_v48 = vmul.u32 328, %v2676_v10 }
 0x2ef   : > { %vm3529_vm5 = vcmp.ne.s32.totalorder %v3323_v38, 0  ;;  %vm3565_vm1 = vcmp.lt.s32.totalorder %v3323_v38, 0  ;;  %v2350_v5 = vadd.s32 216, %v6788_v2  ;;  %v3353_v43 = vmul.u32 18, %v3352_v55 }
 0x2f0   : > { %v2666_v37 = vmul.u32 328, %v2665_v47  ;;  %vm3026_vm12 = vcmp.ge.s32.totalorder %v8756_v11, 0  ;;  %v3637_v45 = vadd.s32 18, %v3323_v38  ;;  %v3341_v9 = vshrl.u32 %v9153_v51, 4  ;;  %vm9190_vm14 = vmand %vm3565_vm1, %vm3529_vm5 }
 0x2f1   : > { %v2349_v7 = vadd.s32 208, %v6788_v2  ;;  %v3674_v28 = vsel %vm9180_vm10, %v3638_v18, %v3334_v53  ;;  %v3369_v58 = vsub.s32 0, %v9174_v61  ;;  %v3358_v49 = vsub.s32 0, %v9176_v57 }
 0x2f2   : > { %v9197_v33 = vsub.s32 %v9053_v23, %v2677_v48  ;;  %vm3062_vm4 = vcmp.lt.s32.totalorder %v8756_v11, 286  ;;  %vm3025_vm7 = vcmp.ge.s32.totalorder %v8834_v4, 0  ;;  %vm3061_vm11 = vcmp.lt.s32.totalorder %v8834_v4, 286 }
 0x2f3   : > { %v9204_v3 = vadd.s32 19, %v2350_v5  ;;  %v3354_v17 = vsub.s32 %v9062_v25, %v3353_v43  ;;  %v9208_v35 = vsub.s32 %v9069_v20, %v2666_v37  ;;  %vm9212_vm3 = vcmp.lt.s32.totalorder %v3674_v28, 16  ;;  %vm9238_vm2 = vmand %vm3026_vm12, %vm3062_vm4 }
 0x2f4   : > { %v3673_v19 = vsel %vm9190_vm14, %v3637_v45, %v3323_v38  ;;  %v3342_v0 = vmul.u32 18, %v3341_v9  ;;  %v9218_v8 = vadd.s32 19, %v2349_v7  ;;  %v9221_v25 = vmin.u32 %v9174_v61, %v3369_v58  ;;  %vm9254_vm10 = vmand %vm3025_vm7, %vm3061_vm11 }
 0x2f5   : > { %v4130_v56 = vld [vmem:[#allocation2 + $0x86] ss:$2 sm:$0xff]  ;;  %v4096_v26 = vld [vmem:[#allocation2 + $0x85] ss:$2 sm:$0xff]  ;;  %v9224_v20 = vmin.u32 %v9176_v57, %v3358_v49  ;;  %vm2816_vm0 = vcmp.ne.s32.totalorder %v9197_v33, 0  ;;  %vm2852_vm13 = vcmp.lt.s32.totalorder %v9197_v33, 0  ;;  %v5627_v21 = vpack.i.bf16 %v9200_v14, %v8886_v29  ;;  %vm3746_vm14 = vmand %vm9238_vm2, %vm9212_vm3 }
 0x2f6   : > { %4626 = vrot.lane.b32.xlu1 %v4130_v56, %s5790_s22  ;;  %4558 = vrot.lane.b32.xlu0 %v4096_v26, %s5789_s21  ;;  %v5622_v31 = vpack.i.bf16 %v3958_v30, %v3956_v6  ;;  %v9231_v41 = vmul.u32.u64.low 3352169597, %v9204_v3  ;;  %v9232_v24 = vmul.u32.u64.high 3352169597, %v9204_v3, %v9231_v41  ;;  %vm9242_vm9 = vcmp.lt.s32.totalorder %v3673_v19, 16  ;;  %vm9273_vm5 = vmand %vm2852_vm13, %vm2816_vm0  ;;  %v9296_v52 = vld [vmem:[#allocation2 + $0x92] ss:$2 sm:$0xff] }
 0x2f7   : > { %v3355_v16 = vsub.s32 0, %v3354_v17  ;;  %vm2815_vm15 = vcmp.ne.s32.totalorder %v9208_v35, 0  ;;  %vm2851_vm8 = vcmp.lt.s32.totalorder %v9208_v35, 0  ;;  %v3343_v59 = vsub.s32 %v9113_v40, %v3342_v0  ;;  %vm3745_vm4 = vmand %vm9254_vm10, %vm9242_vm9  ;;  %v4029_v9 = vld [vmem:[#allocation2 + $0x93] ss:$2 sm:$0xff] }
 0x2f8   : > { %v2924_v63 = vadd.s32 328, %v9197_v33  ;;  %v9261_v22 = vmul.u32.u64.low 3352169597, %v9218_v8  ;;  %v9262_v50 = vmul.u32.u64.high 3352169597, %v9218_v8, %v9261_v22  ;;  %v2923_v40 = vadd.s32 328, %v9208_v35  ;;  %vm9288_vm12 = vmand %vm2851_vm8, %vm2815_vm15  ;;  %v4027_v49 = vld [vmem:[#allocation2 + $0x83] ss:$2 sm:$0xff] }
 0x2f9   : > { %v5333_v29 = vpop.f32.mrb[18].mxu0  ;;  %v9266_v51 = vmul.u32.u64.low 3817748708, %v9221_v25  ;;  %v9267_v60 = vmul.u32.u64.high 3817748708, %v9221_v25, %v9266_v51  ;;  %vm3346_vm1 = vcmp.lt.s32.totalorder %v9011_v44, 0  ;;  %v3344_v55 = vsub.s32 0, %v3343_v59 }
 0x2fa   : > { %5628 = vrot.lane.b32.xlu1 %v5627_v21, %s5785_s27  ;;  %5623 = vrot.lane.b32.xlu0 %v5622_v31, %s5780_s13  ;;  %v2162_v62 = vadd.f32 %v8488_v54, %v5333_v29  ;;  %v2156_v32 = vpop.f32.mrb[19].mxu0  ;;  %v9281_v1 = vmul.u32.u64.low 3817748708, %v9224_v20  ;;  %v9282_v12 = vmul.u32.u64.high 3817748708, %v9224_v20, %v9281_v1  ;;  %v2960_v47 = vsel %vm9273_vm5, %v2924_v63, %v9197_v33 }
 0x2fb   : > { %v2157_v10 = vadd.f32 %v8488_v54, %v2156_v32  ;;  %v4063_v54 = vld [vmem:[#allocation2 + $0x94] ss:$2 sm:$0xff]  ;;  %vm11082_vm7 = vcmp.lt.s32.totalorder %v7330_v36, 16  ;;  %v3356_v48 = vsel %vm3346_vm1, %v3355_v16, %v3354_v17  ;;  %vm3335_vm11 = vcmp.lt.s32.totalorder %v9049_v13, 0 }
 0x2fc   : > { %v2267_v39 = vmax.f32 %v2162_v62, 0.0  ;;  %v2959_v34 = vsel %vm9288_vm12, %v2923_v40, %v9208_v35  ;;  %vm11083_vm3 = vmmov %vm11082_vm7  ;;  %v5632_v43 = vpack.i.bf16 %v9296_v52, %v9200_v14  ;;  %v2698_v37 = vshrl.u32 %v9232_v24, 8 }
 0x2fd   : > { %v2266_v38 = vmax.f32 %v2157_v10, 0.0  ;;  %v9327_v7 = vadd.s32 4294967277, %v2960_v47  ;;  %v3345_v28 = vsel %vm3335_vm11, %v3344_v55, %v3343_v59  ;;  %v2687_v27 = vshrl.u32 %v9262_v50, 8 }
 0x2fe   : > { %4492 = vrot.lane.b32.xlu1 %v4063_v54, %s5778_s7  ;;  %4439 = vrot.lane.b32.xlu0 %v9136_v42, %s5786_s8  ;;  %v2305_v18 = vsel %vm11082_vm7, %v2267_v39, %v2162_v62  ;;  %v2352_v58 = vadd.s32 232, %v6788_v2  ;;  %vm3532_vm0 = vcmp.ne.s32.totalorder %v3356_v48, 0  ;;  %vm3568_vm13 = vcmp.lt.s32.totalorder %v3356_v48, 0 }
 0x2ff   : > { %v3854_v5 = vsel %vm3746_vm14, %v2305_v18, 0.0  ;;  %v2304_v42 = vsel %vm11083_vm3, %v2266_v38, %v2157_v10  ;;  %v3374_v33 = vshrl.u32 %v9267_v60, 4  ;;  %v9334_v14 = vadd.s32 4294967277, %v2959_v34  ;;  %vm9339_vm15 = vmand %vm3568_vm13, %vm3532_vm0 }
 0x300   : > { %3890 = vst.msk [vmem:[#allocation2 + $0xab] sm:$0xff] %vm10700_vm6, %v3854_v5  ;;  %v3853_v45 = vsel %vm3745_vm4, %v2304_v42, 0.0  ;;  %v5637_v56 = vpack.i.bf16 %v4029_v9, %v4027_v49  ;;  %v3640_v26 = vadd.s32 18, %v3356_v48  ;;  %v2699_v30 = vmul.u32 328, %v2698_v37 }
 0x301   : > { %3889 = vst.msk [vmem:[#allocation2 + $0xa3] sm:$0xff] %vm10700_vm6, %v3853_v45  ;;  %vm3531_vm2 = vcmp.ne.s32.totalorder %v3345_v28, 0  ;;  %vm3567_vm9 = vcmp.lt.s32.totalorder %v3345_v28, 0  ;;  %v3363_v17 = vshrl.u32 %v9282_v12, 4  ;;  %v3391_v35 = vsub.s32 0, %v9327_v7 }
 0x302   : > { %5633 = vrot.lane.b32.xlu0 %v5632_v43, %s5787_s29  ;;  %v2688_v19 = vmul.u32 328, %v2687_v27  ;;  %v9343_v0 = vadd.s32 19, %v2352_v58  ;;  %v3639_v6 = vadd.s32 18, %v3345_v28  ;;  %v3375_v21 = vmul.u32 18, %v3374_v33  ;;  %vm9347_vm10 = vmand %vm3567_vm9, %vm3531_vm2  ;;  %v9415_v12 = vld [vmem:[%s10688_s2] ss:$0 sm:$0xff] }
 0x303   : > { %v3380_v31 = vsub.s32 0, %v9334_v14  ;;  %vm3028_vm8 = vcmp.ge.s32.totalorder %v9011_v44, 0  ;;  %v9352_v24 = vsub.s32 %v9204_v3, %v2699_v30  ;;  %v2351_v53 = vadd.s32 224, %v6788_v2 }
 0x304   : > { %vm3064_vm5 = vcmp.lt.s32.totalorder %v9011_v44, 286  ;;  %v3676_v16 = vsel %vm9339_vm15, %v3640_v26, %v3356_v48  ;;  %v3364_v29 = vmul.u32 18, %v3363_v17  ;;  %v9359_v11 = vmin.u32 %v9327_v7, %v3391_v35 }
 0x305   : > { %vm3027_vm1 = vcmp.ge.s32.totalorder %v9049_v13, 0  ;;  %v2689_v3 = vsub.s32 %v9218_v8, %v2688_v19  ;;  %v9366_v59 = vmul.u32.u64.low 3352169597, %v9343_v0  ;;  %v9367_v63 = vmul.u32.u64.high 3352169597, %v9343_v0, %v9366_v59  ;;  %vm9388_vm11 = vmand %vm3028_vm8, %vm3064_vm5 }
 0x306   : > { %5638 = vrot.lane.b32.xlu0 %v5637_v56, %s5788_s11  ;;  %vm3063_vm12 = vcmp.lt.s32.totalorder %v9049_v13, 286  ;;  %v3675_v22 = vsel %vm9347_vm10, %v3639_v6, %v3345_v28  ;;  %v3376_v50 = vsub.s32 %v9221_v25, %v3375_v21  ;;  %v9374_v62 = vmin.u32 %v9334_v14, %v3380_v31 }
 0x307   : > { %vm9376_vm14 = vcmp.lt.s32.totalorder %v3676_v16, 16  ;;  %vm2818_vm4 = vcmp.ne.s32.totalorder %v9352_v24, 0  ;;  %vm2854_vm7 = vcmp.lt.s32.totalorder %v9352_v24, 0  ;;  %v9382_v8 = vadd.s32 19, %v2351_v53  ;;  %vm9403_vm0 = vmand %vm3027_vm1, %vm3063_vm12 }
 0x308   : > { %v4098_v46 = vld [vmem:[#allocation2 + $0x95] ss:$2 sm:$0xff]  ;;  %v4132_v25 = vld [vmem:[#allocation2 + $0x96] ss:$2 sm:$0xff]  ;;  %vm3368_vm3 = vcmp.lt.s32.totalorder %v9174_v61, 0  ;;  %v3365_v60 = vsub.s32 %v9224_v20, %v3364_v29  ;;  %vm9407_vm13 = vcmp.lt.s32.totalorder %v3675_v22, 16  ;;  %vm9426_vm15 = vmand %vm2854_vm7, %vm2818_vm4 }
 0x309   : > { %4560 = vrot.lane.b32.xlu1 %v4098_v46, %s5789_s21  ;;  %v9395_v4 = vmul.u32.u64.low 3817748708, %v9359_v11  ;;  %v9396_v40 = vmul.u32.u64.high 3817748708, %v9359_v11, %v9395_v4  ;;  %v2926_v20 = vadd.s32 328, %v9352_v24  ;;  %vm2817_vm2 = vcmp.ne.s32.totalorder %v2689_v3, 0  ;;  %vm3748_vm8 = vmand %vm9388_vm11, %vm9376_vm14  ;;  %v9439_v42 = vld [vmem:[#allocation2 + $0xa4] ss:$2 sm:$0xff] }
 0x30a   : > { %4441 = vrot.lane.b32.xlu0 %v4063_v54, %s5786_s8  ;;  %vm2853_vm9 = vcmp.lt.s32.totalorder %v2689_v3, 0  ;;  %v3377_v39 = vsub.s32 0, %v3376_v50  ;;  %v9419_v54 = vmul.u32.u64.low 3817748708, %v9374_v62  ;;  %v9420_v38 = vmul.u32.u64.high 3817748708, %v9374_v62, %v9419_v54  ;;  %vm3747_vm5 = vmand %vm9403_vm0, %vm9407_vm13  ;;  %v9504_v32 = vld [vmem:[#allocation2 + $0xa2] ss:$2 sm:$0xff] }
 0x30b   : > { %v2925_v18 = vadd.s32 328, %v2689_v3  ;;  %v9436_v48 = vmul.u32.u64.low 3352169597, %v9382_v8  ;;  %v9437_v34 = vmul.u32.u64.high 3352169597, %v9382_v8, %v9436_v48  ;;  %v3366_v43 = vsub.s32 0, %v3365_v60  ;;  %vm9443_vm10 = vmand %vm2853_vm9, %vm2817_vm2 }
 0x30c   : > { %vm3357_vm1 = vcmp.lt.s32.totalorder %v9176_v57, 0  ;;  %v2962_v9 = vsel %vm9426_vm15, %v2926_v20, %v9352_v24  ;;  %v2720_v28 = vshrl.u32 %v9367_v63, 8  ;;  %vm11100_vm12 = vcmp.lt.s32.totalorder %v7330_v36, 16  ;;  %v3960_v20 = vld [vmem:[#allocation2 + $0x91] ss:$2 sm:$0xff] }
 0x30d   : > { %v5336_v10 = vpop.f32.mrb[20].mxu0  ;;  %4628 = vrot.lane.b32.xlu1 %v4132_v25, %s5790_s22  ;;  %v9462_v58 = vsel %vm3368_vm3, %v3377_v39, %v3376_v50  ;;  %vm11101_vm4 = vmmov %vm11100_vm12  ;;  %v2961_v56 = vsel %vm9443_vm10, %v2925_v18, %v2689_v3  ;;  %v3367_v30 = vsel %vm3357_vm1, %v3366_v43, %v3365_v60  ;;  %v9474_v17 = vadd.s32 4294967277, %v2962_v9 }
 0x30e   : > { %v2172_v15 = vadd.f32 %v9415_v12, %v5336_v10  ;;  %v2166_v13 = vpop.f32.mrb[21].mxu0  ;;  %vm3534_vm7 = vcmp.ne.s32.totalorder %v9462_v58, 0  ;;  %v3396_v35 = vshrl.u32 %v9396_v40, 4  ;;  %v2721_v23 = vmul.u32 328, %v2720_v28  ;;  %v3962_v40 = vld [vmem:[#allocation2 + $0xa1] ss:$2 sm:$0xff] }
 0x30f   : > { %v2167_v47 = vadd.f32 %v9415_v12, %v2166_v13  ;;  %vm3570_vm14 = vcmp.lt.s32.totalorder %v9462_v58, 0  ;;  %v3385_v19 = vshrl.u32 %v9420_v38, 4  ;;  %v9481_v6 = vadd.s32 4294967277, %v2961_v56 }
 0x310   : > { %v2269_v5 = vmax.f32 %v2172_v15, 0.0  ;;  %v2354_v21 = vadd.s32 248, %v6788_v2  ;;  %vm3533_vm11 = vcmp.ne.s32.totalorder %v3367_v30, 0  ;;  %vm3569_vm3 = vcmp.lt.s32.totalorder %v3367_v30, 0  ;;  %vm9489_vm13 = vmand %vm3570_vm14, %vm3534_vm7 }
 0x311   : > { %v2268_v45 = vmax.f32 %v2167_v47, 0.0  ;;  %4494 = vrot.lane.b32.xlu1 %v9439_v42, %s5778_s7  ;;  %v2709_v31 = vshrl.u32 %v9437_v34, 8  ;;  %v2353_v41 = vadd.s32 240, %v6788_v2  ;;  %v3642_v24 = vadd.s32 18, %v9462_v58  ;;  %vm9497_vm9 = vmand %vm3569_vm3, %vm3533_vm11 }
 0x312   : > { %v2307_v27 = vsel %vm11100_vm12, %v2269_v5, %v2172_v15  ;;  %v3413_v53 = vsub.s32 0, %v9474_v17  ;;  %vm3030_vm0 = vcmp.ge.s32.totalorder %v9174_v61, 0  ;;  %v3641_v16 = vadd.s32 18, %v3367_v30 }
 0x313   : > { %v3856_v49 = vsel %vm3748_vm8, %v2307_v27, 0.0  ;;  %v2306_v33 = vsel %vm11101_vm4, %v2268_v45, %v2167_v47  ;;  %v3397_v29 = vmul.u32 18, %v3396_v35  ;;  %v9494_v3 = vsub.s32 %v9343_v0, %v2721_v23 }
 0x314   : > { %3892 = vst.msk [vmem:[#allocation2 + $0xbb] sm:$0xff] %vm10700_vm6, %v3856_v49  ;;  %v3855_v26 = vsel %vm3747_vm5, %v2306_v33, 0.0  ;;  %vm3066_vm2 = vcmp.lt.s32.totalorder %v9174_v61, 286  ;;  %v3386_v63 = vmul.u32 18, %v3385_v19  ;;  %v3402_v22 = vsub.s32 0, %v9481_v6 }
 0x315   : > { %3891 = vst.msk [vmem:[#allocation2 + $0xb3] sm:$0xff] %vm10700_vm6, %v3855_v26  ;;  %v9502_v50 = vadd.s32 19, %v2354_v21  ;;  %vm3029_vm15 = vcmp.ge.s32.totalorder %v9176_v57, 0  ;;  %vm3065_vm8 = vcmp.lt.s32.totalorder %v9176_v57, 286  ;;  %v2710_v51 = vmul.u32 328, %v2709_v31  ;;  %vm9553_vm12 = vmand %vm3030_vm0, %vm3066_vm2 }
 0x316   : > { %v9508_v0 = vadd.s32 19, %v2353_v41  ;;  %v3678_v4 = vsel %vm9489_vm13, %v3642_v24, %v9462_v58  ;;  %v9514_v10 = vmin.u32 %v9474_v17, %v3413_v53  ;;  %v3677_v44 = vsel %vm9497_vm9, %v3641_v16, %v3367_v30  ;;  %vm9573_vm11 = vmand %vm3029_vm15, %vm3065_vm8 }
 0x317   : > { %v3398_v1 = vsub.s32 %v9359_v11, %v3397_v29  ;;  %vm2820_vm10 = vcmp.ne.s32.totalorder %v9494_v3, 0  ;;  %vm2856_vm5 = vcmp.lt.s32.totalorder %v9494_v3, 0  ;;  %v3387_v15 = vsub.s32 %v9374_v62, %v3386_v63 }
 0x318   : > { %v9525_v13 = vmin.u32 %v9481_v6, %v3402_v22  ;;  %v9528_v39 = vmul.u32.u64.low 3352169597, %v9502_v50  ;;  %v9529_v54 = vmul.u32.u64.high 3352169597, %v9502_v50, %v9528_v39  ;;  %v5647_v38 = vpack.i.bf16 %v9504_v32, %v9296_v52  ;;  %vm9541_vm1 = vmand %vm2856_vm5, %vm2820_vm10 }
 0x319   : > { %v5642_v55 = vpack.i.bf16 %v3962_v40, %v3960_v20  ;;  %v2928_v11 = vadd.s32 328, %v9494_v3  ;;  %v9535_v47 = vsub.s32 %v9382_v8, %v2710_v51  ;;  %vm9557_vm4 = vcmp.lt.s32.totalorder %v3678_v4, 16 }
 0x31a   : > { %v9538_v18 = vmul.u32.u64.low 3817748708, %v9514_v10  ;;  %v9539_v48 = vmul.u32.u64.high 3817748708, %v9514_v10, %v9538_v18  ;;  %v9546_v34 = vmul.u32.u64.low 3352169597, %v9508_v0  ;;  %v9547_v5 = vmul.u32.u64.high 3352169597, %v9508_v0, %v9546_v34  ;;  %vm3750_vm13 = vmand %vm9553_vm12, %vm9557_vm4 }
 0x31b   : > { %vm9563_vm7 = vcmp.lt.s32.totalorder %v3677_v44, 16  ;;  %vm3390_vm14 = vcmp.lt.s32.totalorder %v9327_v7, 0  ;;  %v3399_v28 = vsub.s32 0, %v3398_v1  ;;  %v2964_v33 = vsel %vm9541_vm1, %v2928_v11, %v9494_v3 }
 0x31c   : > { %v4134_v25 = vld [vmem:[#allocation2 + $0xa6] ss:$2 sm:$0xff]  ;;  %v4100_v60 = vld [vmem:[#allocation2 + $0xa5] ss:$2 sm:$0xff]  ;;  %v9578_v27 = vmul.u32.u64.low 3817748708, %v9525_v13  ;;  %v9579_v58 = vmul.u32.u64.high 3817748708, %v9525_v13, %v9578_v27  ;;  %vm3749_vm2 = vmand %vm9573_vm11, %vm9563_vm7 }
 0x31d   : > { %4630 = vrot.lane.b32.xlu1 %v4134_v25, %s5790_s22  ;;  %4562 = vrot.lane.b32.xlu0 %v4100_v60, %s5789_s21  ;;  %vm2819_vm3 = vcmp.ne.s32.totalorder %v9535_v47, 0  ;;  %vm2855_vm0 = vcmp.lt.s32.totalorder %v9535_v47, 0  ;;  %v4067_v56 = vld [vmem:[#allocation2 + $0xb4] ss:$2 sm:$0xff]  ;;  %v3388_v30 = vsub.s32 0, %v3387_v15  ;;  %vm3379_vm9 = vcmp.lt.s32.totalorder %v9334_v14, 0 }
 0x31e   : > { %v9591_v26 = vld [vmem:[#allocation2 + $0xb2] ss:$2 sm:$0xff]  ;;  %v2927_v23 = vadd.s32 328, %v9535_v47  ;;  %vm11116_vm15 = vcmp.lt.s32.totalorder %v7330_v36, 16  ;;  %v3400_v21 = vsel %vm3390_vm14, %v3399_v28, %v3398_v1  ;;  %v9606_v31 = vadd.s32 4294967277, %v2964_v33  ;;  %vm9612_vm8 = vmand %vm2855_vm0, %vm2819_vm3 }
 0x31f   : > { %vm11119_vm10 = vmmov %vm11116_vm15  ;;  %v5652_v53 = vpack.i.bf16 %v9591_v26, %v9504_v32  ;;  %v2742_v46 = vshrl.u32 %v9529_v54, 8  ;;  %v4033_v29 = vld [vmem:[#allocation2 + $0xb3] ss:$2 sm:$0xff]  ;;  %v3389_v3 = vsel %vm3379_vm9, %v3388_v30, %v3387_v15  ;;  %v3418_v59 = vshrl.u32 %v9539_v48, 4  ;;  %v4031_v32 = vld [vmem:[#allocation2 + $0xa3] ss:$2 sm:$0xff] }
 0x320   : > { %v2731_v63 = vshrl.u32 %v9547_v5, 8  ;;  %vm3536_vm5 = vcmp.ne.s32.totalorder %v3400_v21, 0  ;;  %vm3572_vm1 = vcmp.lt.s32.totalorder %v3400_v21, 0  ;;  %v2963_v22 = vsel %vm9612_vm8, %v2927_v23, %v9535_v47 }
 0x321   : > { %v5339_v43 = vpop.f32.mrb[22].mxu0  ;;  %5648 = vrot.lane.b32.xlu1 %v5647_v38, %s5785_s27  ;;  %5643 = vrot.lane.b32.xlu0 %v5642_v55, %s5780_s13  ;;  %v3644_v51 = vadd.s32 18, %v3400_v21  ;;  %v3407_v25 = vshrl.u32 %v9579_v58, 4  ;;  %v5657_v60 = vpack.i.bf16 %v4033_v29, %v4031_v32  ;;  %vm3535_vm12 = vcmp.ne.s32.totalorder %v3389_v3, 0  ;;  %vm9636_vm4 = vmand %vm3572_vm1, %vm3536_vm5 }
 0x322   : > { %v2182_v61 = vadd.f32 %v9415_v12, %v5339_v43  ;;  %v2176_v45 = vpop.f32.mrb[23].mxu0  ;;  %v3435_v4 = vsub.s32 0, %v9606_v31  ;;  %v2743_v40 = vmul.u32 328, %v2742_v46  ;;  %vm3571_vm7 = vcmp.lt.s32.totalorder %v3389_v3, 0 }
 0x323   : > { %v2177_v49 = vadd.f32 %v9415_v12, %v2176_v45  ;;  %v3419_v1 = vmul.u32 18, %v3418_v59  ;;  %v9640_v20 = vadd.s32 4294967277, %v2963_v22  ;;  %v2732_v15 = vmul.u32 328, %v2731_v63  ;;  %vm9647_vm3 = vmand %vm3571_vm7, %vm3535_vm12 }
 0x324   : > { %v2271_v57 = vmax.f32 %v2182_v61, 0.0  ;;  %vm3032_vm14 = vcmp.ge.s32.totalorder %v9327_v7, 0  ;;  %v3643_v39 = vadd.s32 18, %v3389_v3  ;;  %v3408_v54 = vmul.u32 18, %v3407_v25 }
 0x325   : > { %v2270_v35 = vmax.f32 %v2177_v49, 0.0  ;;  %4496 = vrot.lane.b32.xlu1 %v4067_v56, %s5778_s7  ;;  %4443 = vrot.lane.b32.xlu0 %v9439_v42, %s5786_s8  ;;  %vm3068_vm11 = vcmp.lt.s32.totalorder %v9327_v7, 286  ;;  %v3680_v38 = vsel %vm9636_vm4, %v3644_v51, %v3400_v21  ;;  %v9652_v11 = vmin.u32 %v9606_v31, %v3435_v4 }
 0x326   : > { %v2309_v19 = vsel %vm11116_vm15, %v2271_v57, %v2182_v61  ;;  %v2744_v47 = vsub.s32 %v9502_v50, %v2743_v40  ;;  %v3420_v48 = vsub.s32 %v9514_v10, %v3419_v1  ;;  %v3424_v62 = vsub.s32 0, %v9640_v20 }
 0x327   : > { %v3858_v42 = vsel %vm3750_vm13, %v2309_v19, 0.0  ;;  %v2308_v24 = vsel %vm11119_vm10, %v2270_v35, %v2177_v49  ;;  %v2733_v34 = vsub.s32 %v9508_v0, %v2732_v15  ;;  %vm3031_vm0 = vcmp.ge.s32.totalorder %v9334_v14, 0 }
 0x328   : > { %3894 = vst.msk [vmem:[#allocation2 + $0xcb] sm:$0xff] %vm10700_vm6, %v3858_v42  ;;  %v3857_v16 = vsel %vm3749_vm2, %v2308_v24, 0.0  ;;  %vm3067_vm13 = vcmp.lt.s32.totalorder %v9334_v14, 286  ;;  %v2356_v5 = vadd.s32 264, %v6788_v2  ;;  %vm9665_vm2 = vmand %vm3032_vm14, %vm3068_vm11  ;;  %vm9669_vm9 = vcmp.lt.s32.totalorder %v3680_v38, 16 }
 0x329   : > { %3893 = vst.msk [vmem:[#allocation2 + $0xc3] sm:$0xff] %vm10700_vm6, %v3857_v16  ;;  %5653 = vrot.lane.b32.xlu0 %v5652_v53, %s5787_s29  ;;  %v3679_v0 = vsel %vm9647_vm3, %v3643_v39, %v3389_v3  ;;  %vm3412_vm15 = vcmp.lt.s32.totalorder %v9474_v17, 0  ;;  %v3409_v43 = vsub.s32 %v9525_v13, %v3408_v54  ;;  %vm2822_vm8 = vcmp.ne.s32.totalorder %v2744_v47, 0  ;;  %vm9681_vm5 = vmand %vm3031_vm0, %vm3067_vm13 }
 0x32a   : > { %v9678_v14 = vmul.u32.u64.low 3817748708, %v9652_v11  ;;  %v9679_v52 = vmul.u32.u64.high 3817748708, %v9652_v11, %v9678_v14  ;;  %vm2858_vm10 = vcmp.lt.s32.totalorder %v2744_v47, 0  ;;  %v3421_v61 = vsub.s32 0, %v3420_v48  ;;  %vm3752_vm4 = vmand %vm9665_vm2, %vm9669_vm9 }
 0x32b   : > { %v9686_v45 = vmin.u32 %v9640_v20, %v3424_v62  ;;  %vm2821_vm1 = vcmp.ne.s32.totalorder %v2733_v34, 0  ;;  %vm2857_vm12 = vcmp.lt.s32.totalorder %v2733_v34, 0  ;;  %vm9694_vm7 = vcmp.lt.s32.totalorder %v3679_v0, 16  ;;  %vm9703_vm14 = vmand %vm2858_vm10, %vm2822_vm8  ;;  %v3964_v14 = vld [vmem:[#allocation2 + $0xb1] ss:$2 sm:$0xff] }
 0x32c   : > { %v2930_v27 = vadd.s32 328, %v2744_v47  ;;  %v9698_v58 = vadd.s32 19, %v2356_v5  ;;  %v2929_v57 = vadd.s32 328, %v2733_v34  ;;  %vm3401_vm11 = vcmp.lt.s32.totalorder %v9481_v6, 0  ;;  %vm9711_vm3 = vmand %vm2857_vm12, %vm2821_vm1  ;;  %v3942_v5 = vld [vmem:[#allocation2 + $0x1] ss:$2 sm:$0xff] }
 0x32d   : > { %5658 = vrot.lane.b32.xlu0 %v5657_v60, %s5788_s11  ;;  %v3410_v35 = vsub.s32 0, %v3409_v43  ;;  %vm3751_vm0 = vmand %vm9681_vm5, %vm9694_vm7  ;;  %v3422_v41 = vsel %vm3412_vm15, %v3421_v61, %v3420_v48  ;;  %v9724_v42 = vmul.u32.u64.low 3817748708, %v9686_v45  ;;  %v9725_v24 = vmul.u32.u64.high 3817748708, %v9686_v45, %v9724_v42 }
 0x32e   : > { %vm11136_vm13 = vcmp.lt.s32.totalorder %v7330_v36, 16  ;;  %v2966_v46 = vsel %vm9703_vm14, %v2930_v27, %v2744_v47  ;;  %v9734_v16 = vmul.u32.u64.low 3352169597, %v9698_v58  ;;  %v9735_v29 = vmul.u32.u64.high 3352169597, %v9698_v58, %v9734_v16 }
 0x32f   : > { %vm11137_vm15 = vmmov %vm11136_vm13  ;;  %v2965_v63 = vsel %vm9711_vm3, %v2929_v57, %v2733_v34  ;;  %v3411_v51 = vsel %vm3401_vm11, %v3410_v35, %v3409_v43  ;;  %v3440_v25 = vshrl.u32 %v9679_v52, 4  ;;  %v9753_v60 = vadd.s32 4294967277, %v2966_v46 }
 0x330   : > { %v4102_v18 = vld [vmem:[#allocation2 + $0xb5] ss:$2 sm:$0xff]  ;;  %v4136_v8 = vld [vmem:[#allocation2 + $0xb6] ss:$2 sm:$0xff]  ;;  %vm3538_vm2 = vcmp.ne.s32.totalorder %v3422_v41, 0  ;;  %vm3574_vm9 = vcmp.lt.s32.totalorder %v3422_v41, 0  ;;  %v5662_v27 = vpack.i.bf16 %v3942_v5, %v3964_v14 }
 0x331   : > { %4564 = vrot.lane.b32.xlu1 %v4102_v18, %s5789_s21  ;;  %4445 = vrot.lane.b32.xlu0 %v4067_v56, %s5786_s8  ;;  %v2355_v56 = vadd.s32 256, %v6788_v2  ;;  %v9719_v21 = vld [vmem:[#allocation2 + $0xc4] ss:$2 sm:$0xff]  ;;  %v9755_v4 = vadd.s32 4294967277, %v2965_v63  ;;  %vm3537_vm8 = vcmp.ne.s32.totalorder %v3411_v51, 0  ;;  %vm3573_vm10 = vcmp.lt.s32.totalorder %v3411_v51, 0  ;;  %v9761_v1 = vpop.permute.xlu0 %5603  ;;  %vm9763_vm5 = vmand %vm3574_vm9, %vm3538_vm2 }
 0x332   : > { %v3646_v15 = vadd.s32 18, %v3422_v41  ;;  %v3441_v39 = vmul.u32 18, %v3440_v25  ;;  %v3645_v38 = vadd.s32 18, %v3411_v51  ;;  %v3429_v55 = vshrl.u32 %v9725_v24, 4  ;;  %v3976_v18 = vld [vmem:[#allocation2 + $0x2] ss:$2 sm:$0xff]  ;;  %vm9769_vm1 = vmand %vm3573_vm10, %vm3537_vm8 }
 0x333   : > { %v9746_v22 = vadd.s32 19, %v2355_v56  ;;  %v3457_v47 = vsub.s32 0, %v9753_v60  ;;  %v3446_v62 = vsub.s32 0, %v9755_v4  ;;  %v2764_v34 = vshrl.u32 %v9735_v29, 8 }
 0x334   : > { %v5342_v7 = vpop.f32.mrb[24].mxu0  ;;  %vm3034_vm12 = vcmp.ge.s32.totalorder %v9474_v17, 0  ;;  %v2358_v50 = vadd.s32 280, %v6788_v2  ;;  %v3682_v43 = vsel %vm9763_vm5, %v3646_v15, %v3422_v41  ;;  %v3442_v52 = vsub.s32 %v9652_v11, %v3441_v39 }
 0x335   : > { %v2192_v13 = vadd.f32 %v9415_v12, %v5342_v7  ;;  %4632 = vrot.lane.b32.xlu1 %v4136_v8, %s5790_s22  ;;  %v2186_v9 = vpop.f32.mrb[25].mxu0  ;;  %v9758_v40 = vmul.u32.u64.low 3352169597, %v9746_v22  ;;  %v9759_v44 = vmul.u32.u64.high 3352169597, %v9746_v22, %v9758_v40  ;;  %v3681_v7 = vsel %vm9769_vm1, %v3645_v38, %v3411_v51 }
 0x336   : > { %v2187_v49 = vadd.f32 %v9415_v12, %v2186_v9  ;;  %v3430_v8 = vmul.u32 18, %v3429_v55  ;;  %v9786_v37 = vmin.u32 %v9753_v60, %v3457_v47  ;;  %v2357_v61 = vadd.s32 272, %v6788_v2  ;;  %v3978_v55 = vld [vmem:[#allocation2 + $0x12] ss:$2 sm:$0xff] }
 0x337   : > { %v2273_v30 = vmax.f32 %v2192_v13, 0.0  ;;  %vm3033_vm7 = vcmp.ge.s32.totalorder %v9481_v6, 0  ;;  %vm3069_vm14 = vcmp.lt.s32.totalorder %v9481_v6, 286  ;;  %v9794_v11 = vmin.u32 %v9755_v4, %v3446_v62  ;;  %v9849_v6 = vpop.permute.xlu1 %5608 }
 0x338   : > { %v2272_v19 = vmax.f32 %v2187_v49, 0.0  ;;  %v2765_v9 = vmul.u32 328, %v2764_v34  ;;  %v5667_v28 = vpack.i.bf16 %v3976_v18, %v9591_v26  ;;  %v9798_v33 = vadd.s32 19, %v2358_v50  ;;  %v4035_v50 = vld [vmem:[#allocation2 + $0xc3] ss:$2 sm:$0xff] }
 0x339   : > { %v2311_v53 = vsel %vm11136_vm13, %v2273_v30, %v2192_v13  ;;  %4498 = vrot.lane.b32.xlu1 %v9719_v21, %s5778_s7  ;;  %v9789_v13 = vpop.permute.xlu0 %4435  ;;  %vm9800_vm11 = vcmp.lt.s32.totalorder %v3682_v43, 16  ;;  %vm9804_vm3 = vcmp.lt.s32.totalorder %v3681_v7, 16  ;;  %v3443_v56 = vsub.s32 0, %v3442_v52  ;;  %v4013_v7 = vld [vmem:[#allocation2 + $0x13] ss:$2 sm:$0xff] }
 0x33a   : > { %v3860_v3 = vsel %vm3752_vm4, %v2311_v53, 0.0  ;;  %v2310_v59 = vsel %vm11137_vm15, %v2272_v19, %v2187_v49  ;;  %vm3070_vm4 = vcmp.lt.s32.totalorder %v9474_v17, 286  ;;  %v2753_v49 = vshrl.u32 %v9759_v44, 8  ;;  %vm9833_vm15 = vmand %vm3033_vm7, %vm3069_vm14  ;;  %v3944_v26 = vld [vmem:[#allocation2 + $0x11] ss:$2 sm:$0xff] }
 0x33b   : > { %3896 = vst.msk [vmem:[#allocation2 + $0xdb] sm:$0xff] %vm10700_vm6, %v3860_v3  ;;  %v3859_v32 = vsel %vm3751_vm0, %v2310_v59, 0.0  ;;  %vm3434_vm0 = vcmp.lt.s32.totalorder %v9606_v31, 0  ;;  %vm9813_vm13 = vmand %vm3034_vm12, %vm3070_vm4  ;;  %v3431_v35 = vsub.s32 %v9686_v45, %v3430_v8  ;;  %v9824_v41 = vadd.s32 19, %v2357_v61 }
 0x33c   : > { %3895 = vst.msk [vmem:[#allocation2 + $0xd3] sm:$0xff] %vm10700_vm6, %v3859_v32  ;;  %v9821_v23 = vmul.u32.u64.low 3817748708, %v9786_v37  ;;  %v9822_v19 = vmul.u32.u64.high 3817748708, %v9786_v37, %v9821_v23  ;;  %vm4682_vm2 = vcmask 392192   ;;  %v9842_v16 = vsub.s32 %v9698_v58, %v2765_v9  ;;  %vm3754_vm8 = vmand %vm9813_vm13, %vm9800_vm11  ;;  %v4000_v58 = vld [vmem:[#allocation2 + $0xc2] ss:$2 sm:$0xff] }
 0x33d   : > { %v9838_v45 = vmul.u32.u64.low 3817748708, %v9794_v11  ;;  %v9839_v46 = vmul.u32.u64.high 3817748708, %v9794_v11, %v9838_v45  ;;  %vm4700_vm9 = vcmask 588800   ;;  %v2754_v3 = vmul.u32 328, %v2753_v49  ;;  %vm3753_vm5 = vmand %vm9833_vm15, %vm9804_vm3 }
 0x33e   : > { %v9846_v59 = vmul.u32.u64.low 3352169597, %v9798_v33  ;;  %v9847_v63 = vmul.u32.u64.high 3352169597, %v9798_v33, %v9846_v59  ;;  %v9859_v25 = vsel %vm3434_vm0, %v3443_v56, %v3442_v52  ;;  %vm3423_vm10 = vcmp.lt.s32.totalorder %v9640_v20, 0 }
 0x33f   : > { %v3432_v44 = vsub.s32 0, %v3431_v35  ;;  %v9871_v15 = vmul.u32.u64.low 3352169597, %v9824_v41  ;;  %v9872_v39 = vmul.u32.u64.high 3352169597, %v9824_v41, %v9871_v15  ;;  %v5605_v54 = vunpack.i.l.bf16 %v9761_v1 }
 0x340   : > { %vm11150_vm1 = vcmp.lt.s32.totalorder %v7330_v36, 16  ;;  %vm2824_vm12 = vcmp.ne.s32.totalorder %v9842_v16, 0  ;;  %vm2860_vm4 = vcmp.lt.s32.totalorder %v9842_v16, 0  ;;  %v9886_v18 = vpack.i.bf16 %v3978_v55, %v4000_v58 }
 0x341   : > { %vm11151_vm7 = vmmov %vm11150_vm1  ;;  %v9889_v48 = vsub.s32 %v9746_v22, %v2754_v3  ;;  %vm10704_vm14 = vcmask 326656   ;;  %vm10705_vm11 = vcmask 785408   ;;  %vm10701_vm0 = vcmask 982016  }
 0x342   : > { %vm10703_vm13 = vcmask 523264   ;;  %v9905_v22 = vsel %vm3423_vm10, %v3432_v44, %v3431_v35  ;;  %v2932_v43 = vadd.s32 328, %v9842_v16  ;;  %vm10702_vm3 = vcmask 719872  }
 0x343   : > { %v4138_v10 = vld [vmem:[#allocation2 + $0xc6] ss:$2 sm:$0xff]  ;;  %v4104_v0 = vld [vmem:[#allocation2 + $0xc5] ss:$2 sm:$0xff]  ;;  %vm3540_vm15 = vcmp.ne.s32.totalorder %v9859_v25, 0  ;;  %v5677_v9 = vpack.i.bf16 %v4013_v7, %v4035_v50  ;;  %vm2823_vm10 = vcmp.ne.s32.totalorder %v9889_v48, 0 }
 0x344   : > { %4634 = vrot.lane.b32.xlu1 %v4138_v10, %s5790_s22  ;;  %4566 = vrot.lane.b32.xlu0 %v4104_v0, %s5789_s21  ;;  %v9855_v51 = vld [vmem:[#allocation2 + $0xd4] ss:$2 sm:$0xff]  ;;  %v4489_v62 = vpop.permute.xlu1 %4488  ;;  %v5610_v10 = vunpack.i.l.bf16 %v9849_v6  ;;  %v2786_v49 = vshrl.u32 %v9847_v63, 8  ;;  %v2931_v56 = vadd.s32 328, %v9889_v48  ;;  %v3648_v23 = vadd.s32 18, %v9859_v25 }
 0x345   : > { %v3918_v0 = vld [vmem:[#allocation2 + $0x50] ss:$2 sm:$0xff] }
 0x346   : > { %v4670_v14 = vsel %vm10700_vm6, %v3918_v0, %v5605_v54  ;;  %v10023_v7 = vld [vmem:[#allocation2 + $0x24] ss:$2 sm:$0xff] }
 0x347   : > { %v9826_v42 = vpop.permute.xlu0 %5613  ;;  %v4688_v57 = vsel %vm4682_vm2, %v4670_v14, %v5610_v10 }
 0x348   : > { %v5345_v30 = vpop.f32.mrb[26].mxu0  ;;  %5668 = vrot.lane.b32.xlu1 %v5667_v28, %s5785_s27  ;;  %5663 = vrot.lane.b32.xlu0 %v5662_v27, %s5780_s13  ;;  %v5615_v52 = vunpack.i.l.bf16 %v9826_v42  ;;  %v3966_v27 = vld [vmem:[#allocation2 + $0xc1] ss:$2 sm:$0xff] }
 0x349   : > { %v2202_v17 = vadd.f32 %v9415_v12, %v5345_v30  ;;  %v2196_v24 = vpop.f32.mrb[27].mxu0  ;;  %v2775_v30 = vshrl.u32 %v9872_v39, 8 }
 0x34a   : > { %v2197_v29 = vadd.f32 %v9415_v12, %v2196_v24  ;;  %v4706_v35 = vsel %vm4700_vm9, %v4688_v57, %v5615_v52  ;;  %v3451_v24 = vshrl.u32 %v9839_v46, 4  ;;  %v3647_v46 = vadd.s32 18, %v9905_v22 }
 0x34b   : > { %v2275_v32 = vmax.f32 %v2202_v17, 0.0  ;;  %v9891_v34 = vpop.permute.xlu0 %5618  ;;  %v2776_v39 = vmul.u32 328, %v2775_v30 }
 0x34c   : > { %v2274_v40 = vmax.f32 %v2197_v29, 0.0  ;;  %4500 = vrot.lane.b32.xlu1 %v9855_v51, %s5778_s7  ;;  %4447 = vrot.lane.b32.xlu0 %v9719_v21, %s5786_s8  ;;  %v5620_v61 = vunpack.i.l.bf16 %v9891_v34 }
 0x34d   : > { %v2313_v38 = vsel %vm11150_vm1, %v2275_v32, %v2202_v17  ;;  %vm3576_vm1 = vcmp.lt.s32.totalorder %v9859_v25, 0  ;;  %v3462_v17 = vshrl.u32 %v9822_v19, 4 }
 0x34e   : > { %v3862_v21 = vsel %vm3754_vm8, %v2313_v38, 0.0  ;;  %v2312_v47 = vsel %vm11151_vm7, %v2274_v40, %v2197_v29  ;;  %vm9915_vm8 = vmand %vm2860_vm4, %vm2824_vm12  ;;  %vm3539_vm7 = vcmp.ne.s32.totalorder %v9905_v22, 0  ;;  %vm11156_vm4 = vcmask 130048  }
 0x34f   : > { %3898 = vst.msk [vmem:[#allocation2 + $0xeb] sm:$0xff] %vm10700_vm6, %v3862_v21  ;;  %v3861_v5 = vsel %vm3753_vm5, %v2312_v47, 0.0  ;;  %vm2859_vm5 = vcmp.lt.s32.totalorder %v9889_v48, 0  ;;  %v2968_v2 = vsel %vm9915_vm8, %v2932_v43, %v9842_v16  ;;  %v4759_v45 = vsel %vm11156_vm4, %v9789_v13, %v4489_v62  ;;  %vm9952_vm8 = vmand %vm3576_vm1, %vm3540_vm15  ;;  %v4047_v62 = vld [vmem:[#allocation2 + $0x14] ss:$2 sm:$0xff] }
 0x350   : > { %3897 = vst.msk [vmem:[#allocation2 + $0xe3] sm:$0xff] %vm10700_vm6, %v3861_v5  ;;  %5673 = vrot.lane.b32.xlu0 %v9886_v18, %s5787_s29  ;;  %vm3575_vm6 = vcmp.lt.s32.totalorder %v9905_v22, 0  ;;  %vm9941_vm12 = vmand %vm2859_vm5, %vm2823_vm10  ;;  %v5682_v16 = vpack.i.bf16 %v3944_v26, %v3966_v27  ;;  %v4724_v29 = vsel %vm10705_vm11, %v4706_v35, %v5620_v61  ;;  %v9966_v58 = vadd.s32 4294967277, %v2968_v2  ;;  %v3920_v27 = vld [vmem:[#allocation2 + $0x60] ss:$2 sm:$0xff] }
 0x351   : > { %vm9962_vm10 = vmand %vm3575_vm6, %vm3539_vm7  ;;  %v2787_v40 = vmul.u32 328, %v2786_v49  ;;  %vm3036_vm15 = vcmp.ge.s32.totalorder %v9606_v31, 0  ;;  %v2967_v15 = vsel %vm9941_vm12, %v2931_v56, %v9889_v48  ;;  %v4742_v54 = vsel %vm10701_vm0, %v4724_v29, %v9789_v13  ;;  %v3980_v56 = vld [vmem:[#allocation2 + $0x22] ss:$2 sm:$0xff] }
 0x352   : > { %vm3072_vm6 = vcmp.lt.s32.totalorder %v9606_v31, 286  ;;  %v3684_v38 = vsel %vm9952_vm8, %v3648_v23, %v9859_v25  ;;  %vm3035_vm5 = vcmp.ge.s32.totalorder %v9640_v20, 0  ;;  %vm3071_vm1 = vcmp.lt.s32.totalorder %v9640_v20, 286  ;;  %v4002_v20 = vld [vmem:[#allocation2 + $0xd2] ss:$2 sm:$0xff]  ;;  %v4438_v23 = vpop.permute.xlu0 %4437 }
 0x353   : > { %v3683_v55 = vsel %vm9962_vm10, %v3647_v46, %v9905_v22  ;;  %v3463_v21 = vmul.u32 18, %v3462_v17  ;;  %v3452_v47 = vmul.u32 18, %v3451_v24  ;;  %v3479_v13 = vsub.s32 0, %v9966_v58  ;;  %vm9995_vm7 = vmand %vm3036_vm15, %vm3072_vm6 }
 0x354   : > { %5678 = vrot.lane.b32.xlu0 %v5677_v9, %s5788_s11  ;;  %v9988_v5 = vadd.s32 4294967277, %v2967_v15  ;;  %v9991_v50 = vsub.s32 %v9798_v33, %v2787_v40  ;;  %vm9999_vm12 = vcmp.lt.s32.totalorder %v3684_v38, 16  ;;  %v10006_v22 = vsub.s32 %v9824_v41, %v2776_v39  ;;  %vm10014_vm4 = vmand %vm3035_vm5, %vm3071_vm1 }
 0x355   : > { %v5606_v33 = vunpack.i.h.bf16 %v9761_v1  ;;  %vm10018_vm8 = vcmp.lt.s32.totalorder %v3683_v55, 16  ;;  %v3464_v1 = vsub.s32 %v9786_v37, %v3463_v21  ;;  %v3453_v8 = vsub.s32 %v9794_v11, %v3452_v47  ;;  %vm3756_vm10 = vmand %vm9995_vm7, %vm9999_vm12 }
 0x356   : > { %v10032_v9 = vmin.u32 %v9966_v58, %v3479_v13  ;;  %vm2826_vm15 = vcmp.ne.s32.totalorder %v9991_v50, 0  ;;  %vm3755_vm6 = vmand %vm10014_vm4, %vm10018_vm8  ;;  %vm2862_vm5 = vcmp.lt.s32.totalorder %v9991_v50, 0  ;;  %v2934_v37 = vadd.s32 328, %v9991_v50 }
 0x357   : > { %v4557_v28 = vpop.permute.xlu1 %4556  ;;  %v4106_v63 = vld [vmem:[#allocation2 + $0xd5] ss:$2 sm:$0xff]  ;;  %v4140_v48 = vld [vmem:[#allocation2 + $0xd6] ss:$2 sm:$0xff]  ;;  %vm2825_vm1 = vcmp.ne.s32.totalorder %v10006_v22, 0  ;;  %v5611_v11 = vunpack.i.h.bf16 %v9849_v6  ;;  %vm11169_vm0 = vcmask 195584   ;;  %v10060_v6 = vpack.i.bf16 %v3980_v56, %v4002_v20 }
 0x358   : > { %v4777_v3 = vsel %vm10704_vm14, %v4759_v45, %v4557_v28  ;;  %4568 = vrot.lane.b32.xlu1 %v4106_v63, %s5789_s21  ;;  %5683 = vrot.lane.b32.xlu0 %v5682_v16, %s5780_s13  ;;  %v3468_v28 = vsub.s32 0, %v9988_v5  ;;  %v4671_v57 = vsel %vm11169_vm0, %v3920_v27, %v5606_v33  ;;  %v5621_v35 = vunpack.i.h.bf16 %v9891_v34  ;;  %v4015_v33 = vld [vmem:[#allocation2 + $0x23] ss:$2 sm:$0xff]  ;;  %v4118_v20 = vld [vmem:[#allocation2 + $0x26] ss:$2 sm:$0xff] }
 0x359   : > { %v3465_v24 = vsub.s32 0, %v3464_v1  ;;  %v2933_v34 = vadd.s32 328, %v10006_v22  ;;  %vm3456_vm7 = vcmp.lt.s32.totalorder %v9753_v60, 0  ;;  %v3454_v45 = vsub.s32 0, %v3453_v8 }
 0x35a   : > { %v10085_v16 = vmin.u32 %v9988_v5, %v3468_v28  ;;  %v4689_v19 = vsel %vm4682_vm2, %v4671_v57, %v5611_v11  ;;  %vm3445_vm4 = vcmp.lt.s32.totalorder %v9755_v4, 0  ;;  %vm11177_vm8 = vcmask 130048   ;;  %v3968_v28 = vld [vmem:[#allocation2 + $0xd1] ss:$2 sm:$0xff]  ;;  %v3946_v57 = vld [vmem:[#allocation2 + $0x21] ss:$2 sm:$0xff] }
 0x35b   : > { %v4625_v59 = vpop.permute.xlu1 %4624  ;;  %v3466_v39 = vsel %vm3456_vm7, %v3465_v24, %v3464_v1  ;;  %v3455_v55 = vsel %vm3445_vm4, %v3454_v45, %v3453_v8  ;;  %vm3074_vm4 = vcmp.lt.s32.totalorder %v9753_v60, 286  ;;  %v4017_v24 = vld [vmem:[#allocation2 + $0x33] ss:$2 sm:$0xff] }
 0x35c   : > { %v4795_v44 = vsel %vm10703_vm13, %v4777_v3, %v4625_v59  ;;  %v5348_v25 = vpop.f32.mrb[28].mxu0  ;;  %4636 = vrot.lane.b32.xlu1 %v4140_v48, %s5790_s22  ;;  %4425 = vrot.lane.b32.xlu0 %v4047_v62, %s5786_s8  ;;  %vm2861_vm13 = vcmp.lt.s32.totalorder %v10006_v22, 0  ;;  %v10099_v46 = vmul.u32.u64.low 3817748708, %v10032_v9  ;;  %v10100_v3 = vmul.u32.u64.high 3817748708, %v10032_v9, %v10099_v46 }
 0x35d   : > { %5239 = vmatprep.mubr.msk.f32.mxu1 %vm10702_vm3, %v4795_v44  ;;  %v2212_v43 = vadd.f32 %v9415_v12, %v5348_v25  ;;  %v2206_v31 = vpop.f32.mrb[29].mxu0  ;;  %vm11170_vm3 = vcmp.lt.s32.totalorder %v7330_v36, 16  ;;  %vm10091_vm12 = vmand %vm2861_vm13, %vm2825_vm1  ;;  %v10106_v44 = vld [vmem:[#allocation2 + $0xe4] ss:$2 sm:$0xff]  ;;  %vm11178_vm13 = vcmask 326656   ;;  %vm3578_vm1 = vcmp.lt.s32.totalorder %v3466_v39, 0 }
 0x35e   : > { %4983 = vmatmul.mubr.f32.vlgmr.msra.gmra.mrb[0].mxu1 %v4742_v54  ;;  %v2207_v41 = vadd.f32 %v9415_v12, %v2206_v31  ;;  %vm11171_vm14 = vmmov %vm11170_vm3  ;;  %v2969_v54 = vsel %vm10091_vm12, %v2933_v34, %v10006_v22  ;;  %v10116_v21 = vmul.u32.u64.low 3817748708, %v10085_v16  ;;  %v10117_v47 = vmul.u32.u64.high 3817748708, %v10085_v16, %v10116_v21  ;;  %v4037_v22 = vld [vmem:[#allocation2 + $0xd3] ss:$2 sm:$0xff] }
 0x35f   : > { %v2277_v61 = vmax.f32 %v2212_v43, 0.0  ;;  %v4491_v17 = vpop.permute.xlu1 %4490  ;;  %v10124_v25 = vadd.s32 4294967277, %v2969_v54  ;;  %v3650_v31 = vadd.s32 18, %v3466_v39  ;;  %v3649_v14 = vadd.s32 18, %v3455_v55  ;;  %v3922_v54 = vld [vmem:[#allocation2 + $0x70] ss:$2 sm:$0xff] }
 0x360   : > { %v2276_v49 = vmax.f32 %v2207_v41, 0.0  ;;  %5688 = vrot.lane.b32.xlu1 %v9886_v18, %s5785_s27  ;;  %4478 = vrot.lane.b32.xlu0 %v10023_v7, %s5778_s7  ;;  %v5616_v18 = vunpack.i.h.bf16 %v9826_v42  ;;  %v4760_v63 = vsel %vm11177_vm8, %v4438_v23, %v4491_v17  ;;  %v3484_v27 = vshrl.u32 %v10100_v3, 4 }
 0x361   : > { %v2315_v2 = vsel %vm11170_vm3, %v2277_v61, %v2212_v43  ;;  %vm11174_vm3 = vmmov %vm11169_vm0  ;;  %v3490_v8 = vsub.s32 0, %v10124_v25  ;;  %vm3038_vm12 = vcmp.ge.s32.totalorder %v9753_v60, 0  ;;  %vm3037_vm8 = vcmp.ge.s32.totalorder %v9755_v4, 0  ;;  %v3982_v43 = vld [vmem:[#allocation2 + $0x32] ss:$2 sm:$0xff] }
 0x362   : > { %v3864_v30 = vsel %vm3756_vm10, %v2315_v2, 0.0  ;;  %v2314_v26 = vsel %vm11171_vm14, %v2276_v49, %v2207_v41  ;;  %vm10073_vm14 = vmand %vm2862_vm5, %vm2826_vm15  ;;  %vm11179_vm10 = vcmask 523264   ;;  %vm11180_vm15 = vcmask 719872  }
 0x363   : > { %3900 = vst.msk [vmem:[#allocation2 + $0xfb] sm:$0xff] %vm11169_vm0, %v3864_v30  ;;  %v3863_v42 = vsel %vm3755_vm6, %v2314_v26, 0.0  ;;  %v2970_v59 = vsel %vm10073_vm14, %v2934_v37, %v9991_v50  ;;  %vm11181_vm6 = vcmask 982016   ;;  %v4084_v50 = vld [vmem:[#allocation2 + $0x25] ss:$2 sm:$0xff]  ;;  %vm3542_vm5 = vcmp.ne.s32.totalorder %v3466_v39, 0 }
 0x364   : > { %3899 = vst.msk [vmem:[#allocation2 + $0xf3] sm:$0xff] %vm11174_vm3, %v3863_v42  ;;  %4449 = vrot.lane.b32.xlu1 %v9855_v51, %s5786_s8  ;;  %5693 = vrot.lane.b32.xlu0 %v10060_v6, %s5787_s29  ;;  %v4707_v51 = vsel %vm4700_vm9, %v4689_v19, %v5616_v18  ;;  %v10120_v62 = vadd.s32 4294967277, %v2970_v59  ;;  %vm3541_vm0 = vcmp.ne.s32.totalorder %v3455_v55, 0  ;;  %vm3577_vm14 = vcmp.lt.s32.totalorder %v3455_v55, 0  ;;  %vm10130_vm3 = vmand %vm3578_vm1, %vm3542_vm5 }
 0x365   : > { %v4725_v15 = vsel %vm10705_vm11, %v4707_v51, %v5621_v35  ;;  %v5697_v41 = vpack.i.bf16 %v4015_v33, %v4037_v22  ;;  %vm10135_vm7 = vmand %vm3577_vm14, %vm3541_vm0  ;;  %v3473_v49 = vshrl.u32 %v10117_v47, 4  ;;  %v3686_v11 = vsel %vm10130_vm3, %v3650_v31, %v3466_v39 }
 0x366   : > { %v4743_v13 = vsel %vm11181_vm6, %v4725_v15, %v4438_v23  ;;  %v3501_v52 = vsub.s32 0, %v10120_v62  ;;  %v3685_v2 = vsel %vm10135_vm7, %v3649_v14, %v3455_v55  ;;  %v5702_v18 = vpack.i.bf16 %v3946_v57, %v3968_v28 }
 0x367   : > { %v10160_v30 = vmin.u32 %v10124_v25, %v3490_v8  ;;  %v3485_v23 = vmul.u32 18, %v3484_v27  ;;  %vm10176_vm6 = vcmp.lt.s32.totalorder %v3685_v2, 16  ;;  %v3474_v34 = vmul.u32 18, %v3473_v49 }
 0x368   : > { %v4627_v32 = vpop.permute.xlu1 %4626  ;;  %v4559_v40 = vpop.permute.xlu0 %4558  ;;  %4502 = vrot.lane.b32.xlu1 %v10106_v44, %s5778_s7  ;;  %v10155_v56 = vmin.u32 %v10120_v62, %v3501_v52  ;;  %vm11194_vm14 = vcmask 195584   ;;  %vm11195_vm3 = vcmp.lt.s32.totalorder %v7330_v36, 16 }
 0x369   : > { %v4778_v38 = vsel %vm11178_vm13, %v4760_v63, %v4559_v40  ;;  %vm3073_vm13 = vcmp.lt.s32.totalorder %v9755_v4, 286  ;;  %v10196_v59 = vmul.u32.u64.low 3817748708, %v10160_v30  ;;  %v10197_v63 = vmul.u32.u64.high 3817748708, %v10160_v30, %v10196_v59  ;;  %vm11196_vm7 = vmmov %vm11195_vm3 }
 0x36a   : > { %v4796_v48 = vsel %vm11179_vm10, %v4778_v38, %v4627_v32  ;;  %vm10166_vm10 = vmand %vm3038_vm12, %vm3074_vm4  ;;  %v10191_v51 = vmul.u32.u64.low 3817748708, %v10155_v56  ;;  %v10192_v46 = vmul.u32.u64.high 3817748708, %v10155_v56, %v10191_v51  ;;  %v3486_v15 = vsub.s32 %v10032_v9, %v3485_v23 }
 0x36b   : > { %5240 = vmatprep.mubr.msk.f32.mxu1 %vm11180_vm15, %v4796_v48  ;;  %v4108_v0 = vld [vmem:[#allocation2 + $0xe5] ss:$2 sm:$0xff]  ;;  %v4142_v35 = vld [vmem:[#allocation2 + $0xe6] ss:$2 sm:$0xff]  ;;  %vm10170_vm15 = vcmp.lt.s32.totalorder %v3686_v11, 16  ;;  %vm10186_vm5 = vmand %vm3037_vm8, %vm3073_vm13  ;;  %vm3478_vm8 = vcmp.lt.s32.totalorder %v9966_v58, 0 }
 0x36c   : > { %v10126_v10 = vpop.permute.xlu0 %5623  ;;  %4988 = vmatmul.mubr.f32.gmra.mrb[2].mxu1 %v4743_v13  ;;  %4546 = vrot.lane.b32.xlu1 %v4084_v50, %s5789_s21  ;;  %v10147_v37 = vpop.permute.xlu1 %5628  ;;  %vm3758_vm1 = vmand %vm10166_vm10, %vm10170_vm15  ;;  %vm3467_vm13 = vcmp.lt.s32.totalorder %v9988_v5, 0  ;;  %v3506_v14 = vshrl.u32 %v10192_v46, 4  ;;  %vm11199_vm10 = vcmask 130048   ;;  %v3495_v1 = vshrl.u32 %v10197_v63, 4  ;;  %v10243_v28 = vld [vmem:[#allocation2 + $0xf4] ss:$2 sm:$0xff] }
 0x36d   : > { %4570 = vrot.lane.b32.xlu0 %v4108_v0, %s5789_s21  ;;  %v5625_v45 = vunpack.i.l.bf16 %v10126_v10  ;;  %v5630_v39 = vunpack.i.l.bf16 %v10147_v37  ;;  %vm3757_vm0 = vmand %vm10186_vm5, %vm10176_vm6  ;;  %v3487_v0 = vsub.s32 0, %v3486_v15  ;;  %vm11200_vm15 = vcmask 326656   ;;  %v4120_v51 = vld [vmem:[#allocation2 + $0x36] ss:$2 sm:$0xff]  ;;  %v3970_v46 = vld [vmem:[#allocation2 + $0xe1] ss:$2 sm:$0xff] }
 0x36e   : > { %vm11197_vm12 = vmmov %vm11194_vm14  ;;  %vm11201_vm6 = vcmask 523264   ;;  %vm11202_vm5 = vcmask 719872   ;;  %v3507_v2 = vmul.u32 18, %v3506_v14 }
 0x36f   : > { %v4672_v55 = vsel %vm11194_vm14, %v3922_v54, %v5625_v45  ;;  %vm11198_vm4 = vmmov %vm11197_vm12  ;;  %v3488_v27 = vsel %vm3478_vm8, %v3487_v0, %v3486_v15  ;;  %v5626_v45 = vunpack.i.h.bf16 %v10126_v10  ;;  %vm3040_vm8 = vcmp.ge.s32.totalorder %v9966_v58, 0 }
 0x370   : > { %v10140_v61 = vpop.permute.xlu0 %4439  ;;  %5698 = vrot.lane.b32.xlu1 %v5697_v41, %s5788_s11  ;;  %v4493_v32 = vpop.permute.xlu1 %4492  ;;  %v4690_v22 = vsel %vm4682_vm2, %v4672_v55, %v5630_v39  ;;  %vm3580_vm14 = vcmp.lt.s32.totalorder %v3488_v27, 0  ;;  %v3652_v42 = vadd.s32 18, %v3488_v27 }
 0x371   : > { %4614 = vrot.lane.b32.xlu0 %v4118_v20, %s5790_s22  ;;  %v4761_v52 = vsel %vm11199_vm10, %v10140_v61, %v4493_v32  ;;  %vm3039_vm10 = vcmp.ge.s32.totalorder %v9988_v5, 0 }
 0x374   : > { %v10162_v26 = vpop.permute.xlu0 %5633  ;;  %4638 = vrot.lane.b32.xlu1 %v4142_v35, %s5790_s22  ;;  %v3496_v35 = vmul.u32 18, %v3495_v1 }
 0x375   : > { %v5351_v17 = vpop.f32.mrb[30].mxu0  ;;  %5703 = vrot.lane.b32.xlu0 %v5702_v18, %s5780_s13  ;;  %v5635_v9 = vunpack.i.l.bf16 %v10162_v26  ;;  %v4086_v18 = vld [vmem:[#allocation2 + $0x35] ss:$2 sm:$0xff] }
 0x376   : > { %v2222_v60 = vadd.f32 %v9415_v12, %v5351_v17  ;;  %v2216_v29 = vpop.f32.mrb[31].mxu0  ;;  %v4039_v17 = vld [vmem:[#allocation2 + $0xe3] ss:$2 sm:$0xff]  ;;  %v3497_v19 = vsub.s32 %v10160_v30, %v3496_v35  ;;  %v3924_v30 = vld [vmem:[#allocation2 + $0x80] ss:$2 sm:$0xff] }
 0x377   : > { %v2217_v3 = vadd.f32 %v9415_v12, %v2216_v29  ;;  %v3475_v12 = vsub.s32 %v10085_v16, %v3474_v34  ;;  %v4004_v16 = vld [vmem:[#allocation2 + $0xe2] ss:$2 sm:$0xff]  ;;  %v4708_v31 = vsel %vm4700_vm9, %v4690_v22, %v5635_v9  ;;  %v3508_v34 = vsub.s32 %v10155_v56, %v3507_v2  ;;  %v4090_v35 = vld [vmem:[#allocation2 + $0x55] ss:$2 sm:$0xff] }
 0x378   : > { %v2279_v40 = vmax.f32 %v2222_v60, 0.0  ;;  %v10203_v4 = vpop.permute.xlu0 %5638  ;;  %5708 = vrot.lane.b32.xlu1 %v10060_v6, %s5785_s27  ;;  %v10238_v41 = vpack.i.bf16 %v3982_v43, %v4004_v16  ;;  %v5631_v56 = vunpack.i.h.bf16 %v10147_v37  ;;  %v3498_v39 = vsub.s32 0, %v3497_v19 }
 0x379   : > { %v2278_v38 = vmax.f32 %v2217_v3, 0.0  ;;  %4427 = vrot.lane.b32.xlu0 %v10023_v7, %s5786_s8  ;;  %v5640_v13 = vunpack.i.l.bf16 %v10203_v4  ;;  %v10224_v7 = vld [vmem:[#allocation2 + $0x34] ss:$2 sm:$0xff]  ;;  %v3476_v33 = vsub.s32 0, %v3475_v12  ;;  %v3509_v63 = vsub.s32 0, %v3508_v34 }
 0x37a   : > { %v2317_v21 = vsel %vm11195_vm3, %v2279_v40, %v2222_v60  ;;  %v5717_v60 = vpack.i.bf16 %v4017_v24, %v4039_v17  ;;  %v5636_v40 = vunpack.i.h.bf16 %v10162_v26  ;;  %v5641_v54 = vunpack.i.h.bf16 %v10203_v4  ;;  %v10299_v4 = vld [vmem:[%s10688_s2] ss:$0 sm:$0xff]  ;;  %v3926_v26 = vld [vmem:[#allocation2 + $0x90] ss:$2 sm:$0xff] }
 0x37b   : > { %v3866_v47 = vsel %vm3758_vm1, %v2317_v21, 0.0  ;;  %v2316_v48 = vsel %vm11196_vm7, %v2278_v38, %v2217_v3  ;;  %v4561_v50 = vpop.permute.xlu1 %4560  ;;  %v3477_v11 = vsel %vm3467_vm13, %v3476_v33, %v3475_v12  ;;  %vm11203_vm1 = vcmask 982016   ;;  %v3948_v3 = vld [vmem:[#allocation2 + $0x31] ss:$2 sm:$0xff] }
 0x37c   : > { %3902 = vst.msk [vmem:[#allocation2 + $0x10b] sm:$0xff] %vm11197_vm12, %v3866_v47  ;;  %v3865_v6 = vsel %vm3757_vm0, %v2316_v48, 0.0  ;;  %4451 = vrot.lane.b32.xlu1 %v10106_v44, %s5786_s8  ;;  %v4726_v44 = vsel %vm10705_vm11, %v4708_v31, %v5640_v13  ;;  %v4779_v8 = vsel %vm11200_vm15, %v4761_v52, %v4561_v50  ;;  %vm3544_vm0 = vcmp.ne.s32.totalorder %v3488_v27, 0  ;;  %v4442_v38 = vpop.permute.xlu0 %4441 }
 0x37d   : > { %3901 = vst.msk [vmem:[#allocation2 + $0x103] sm:$0xff] %vm11198_vm4, %v3865_v6  ;;  %4480 = vrot.lane.b32.xlu0 %v10224_v7, %s5778_s7  ;;  %v4744_v57 = vsel %vm11203_vm1, %v4726_v44, %v10140_v61  ;;  %vm3543_vm3 = vcmp.ne.s32.totalorder %v3477_v11, 0  ;;  %vm3579_vm7 = vcmp.lt.s32.totalorder %v3477_v11, 0  ;;  %vm10255_vm12 = vmand %vm3580_vm14, %vm3544_vm0  ;;  %v3651_v61 = vadd.s32 18, %v3477_v11 }
 0x37e   : > { %vm10261_vm4 = vmand %vm3579_vm7, %vm3543_vm3  ;;  %vm3076_vm13 = vcmp.lt.s32.totalorder %v9966_v58, 286  ;;  %v3688_v10 = vsel %vm10255_vm12, %v3652_v42, %v3488_v27  ;;  %vm3075_vm15 = vcmp.lt.s32.totalorder %v9988_v5, 286  ;;  %v5722_v15 = vpack.i.bf16 %v3948_v3, %v3970_v46 }
 0x37f   : > { %v4629_v20 = vpop.permute.xlu1 %4628  ;;  %v3687_v59 = vsel %vm10261_vm4, %v3651_v61, %v3477_v11  ;;  %vm3489_vm1 = vcmp.lt.s32.totalorder %v10124_v25, 0  ;;  %vm10286_vm0 = vmand %vm3040_vm8, %vm3076_vm13  ;;  %vm10290_vm14 = vcmp.lt.s32.totalorder %v3688_v10, 16  ;;  %vm11217_vm12 = vcmask 130048   ;;  %v10349_v11 = vld [vmem:[#allocation2 + $0x44] ss:$2 sm:$0xff] }
 0x380   : > { %v4797_v49 = vsel %vm11201_vm6, %v4779_v8, %v4629_v20  ;;  %4504 = vrot.lane.b32.xlu1 %v10243_v28, %s5778_s7  ;;  %vm3500_vm6 = vcmp.lt.s32.totalorder %v10120_v62, 0  ;;  %vm10306_vm3 = vmand %vm3039_vm10, %vm3075_vm15  ;;  %vm10310_vm7 = vcmp.lt.s32.totalorder %v3687_v59, 16  ;;  %v3499_v0 = vsel %vm3489_vm1, %v3498_v39, %v3497_v19  ;;  %v4088_v10 = vld [vmem:[#allocation2 + $0x45] ss:$2 sm:$0xff] }
 0x381   : > { %5713 = vrot.lane.b32.xlu0 %v10238_v41, %s5787_s29  ;;  %5241 = vmatprep.mubr.msk.f32.mxu1 %vm11202_vm5, %v4797_v49  ;;  %vm11208_vm5 = vcmask 195584   ;;  %v3510_v6 = vsel %vm3500_vm6, %v3509_v63, %v3508_v34  ;;  %vm3760_vm4 = vmand %vm10286_vm0, %vm10290_vm14  ;;  %vm11218_vm13 = vcmask 326656   ;;  %vm11219_vm6 = vcmp.lt.s32.totalorder %v7330_v36, 16 }
 0x382   : > { %4993 = vmatmul.mubr.f32.gmra.mrb[4].mxu1 %v4744_v57  ;;  %v4673_v32 = vsel %vm11208_vm5, %v3924_v30, %v5626_v45  ;;  %vm3759_vm8 = vmand %vm10306_vm3, %vm10310_vm7  ;;  %vm3546_vm10 = vcmp.ne.s32.totalorder %v3510_v6, 0  ;;  %vm3582_vm15 = vcmp.lt.s32.totalorder %v3510_v6, 0  ;;  %vm11220_vm5 = vcmask 523264   ;;  %v4006_v57 = vld [vmem:[#allocation2 + $0xf2] ss:$2 sm:$0xff] }
 0x383   : > { %v4495_v12 = vpop.permute.xlu1 %4494  ;;  %v4691_v13 = vsel %vm4682_vm2, %v4673_v32, %v5631_v56  ;;  %vm3545_vm1 = vcmp.ne.s32.totalorder %v3499_v0, 0  ;;  %vm3581_vm0 = vcmp.lt.s32.totalorder %v3499_v0, 0  ;;  %vm11221_vm14 = vmmov %vm11219_vm6  ;;  %v3654_v27 = vadd.s32 18, %v3510_v6  ;;  %v4041_v30 = vld [vmem:[#allocation2 + $0xf3] ss:$2 sm:$0xff] }
 0x384   : > { %v4110_v23 = vld [vmem:[#allocation2 + $0xf5] ss:$2 sm:$0xff]  ;;  %4548 = vrot.lane.b32.xlu1 %v4086_v18, %s5789_s21  ;;  %v4144_v55 = vld [vmem:[#allocation2 + $0xf6] ss:$2 sm:$0xff]  ;;  %v4709_v16 = vsel %vm4700_vm9, %v4691_v13, %v5636_v40  ;;  %v4762_v5 = vsel %vm11217_vm12, %v4442_v38, %v4495_v12  ;;  %vm11222_vm12 = vcmask 719872   ;;  %v3653_v18 = vadd.s32 18, %v3499_v0  ;;  %vm10364_vm3 = vmand %vm3581_vm0, %vm3545_vm1 }
 0x385   : > { %4572 = vrot.lane.b32.xlu0 %v4110_v23, %s5789_s21  ;;  %v4727_v31 = vsel %vm10705_vm11, %v4709_v16, %v5641_v54  ;;  %vm11224_vm11 = vcmask 195584   ;;  %v3984_v23 = vld [vmem:[#allocation2 + $0x42] ss:$2 sm:$0xff]  ;;  %vm3042_vm7 = vcmp.ge.s32.totalorder %v10120_v62, 0  ;;  %v4019_v32 = vld [vmem:[#allocation2 + $0x43] ss:$2 sm:$0xff] }
 0x386   : > { %v10368_v17 = vpack.i.bf16 %v3984_v23, %v4006_v57  ;;  %v10376_v24 = vld [vmem:[#allocation2 + $0x104] ss:$2 sm:$0xff]  ;;  %v3689_v53 = vsel %vm10364_vm3, %v3653_v18, %v3499_v0  ;;  %vm11239_vm3 = vcmask 195584  }
 0x387   : > { %vm10401_vm0 = vcmp.lt.s32.totalorder %v3689_v53, 16 }
 0x388   : > { %5718 = vrot.lane.b32.xlu1 %v5717_v60, %s5788_s11 }
 0x389   : > { %4616 = vrot.lane.b32.xlu0 %v4120_v51, %s5790_s22 }
 0x38c   : > { %4640 = vrot.lane.b32.xlu1 %v4144_v55, %s5790_s22  ;;  %v4122_v55 = vld [vmem:[#allocation2 + $0x46] ss:$2 sm:$0xff] }
 0x38d   : > { %5723 = vrot.lane.b32.xlu0 %v5722_v15, %s5780_s13  ;;  %v5737_v15 = vpack.i.bf16 %v4019_v32, %v4041_v30  ;;  %v5766_v32 = vld [vmem:[#allocation2 + $0x64] ss:$2 sm:$0xff] }
 0x38f   : > { %v4631_v33 = vpop.permute.xlu1 %4630  ;;  %v4563_v43 = vpop.permute.xlu0 %4562 }
 0x390   : > { %v5354_v37 = vpop.f32.mrb[32].mxu0  ;;  %v4780_v52 = vsel %vm11218_vm13, %v4762_v5, %v4563_v43  ;;  %5728 = vrot.lane.b32.xlu1 %v10238_v41, %s5785_s27  ;;  %vm11223_vm13 = vcmask 982016  }
 0x391   : > { %v2232_v21 = vadd.f32 %v10299_v4, %v5354_v37  ;;  %v2226_v58 = vpop.f32.mrb[33].mxu0  ;;  %4429 = vrot.lane.b32.xlu0 %v10224_v7, %s5786_s8  ;;  %v4798_v1 = vsel %vm11220_vm5, %v4780_v52, %v4631_v33  ;;  %v4745_v41 = vsel %vm11223_vm13, %v4727_v31, %v4442_v38  ;;  %v3972_v37 = vld [vmem:[#allocation2 + $0xf1] ss:$2 sm:$0xff]  ;;  %v4009_v52 = vld [vmem:[#allocation2 + $0x102] ss:$2 sm:$0xff] }
 0x392   : > { %v2227_v50 = vadd.f32 %v10299_v4, %v2226_v58  ;;  %5242 = vmatprep.mubr.msk.f32.mxu1 %vm11222_vm12, %v4798_v1  ;;  %vm3906_vm12 = vcmask 193536   ;;  %v5765_v1 = vld [vmem:[#allocation2 + $0x52] ss:$2 sm:$0xff] }
 0x393   : > { %v2281_v22 = vmax.f32 %v2232_v21, 0.0  ;;  %v10347_v49 = vpop.permute.xlu0 %5643  ;;  %4998 = vmatmul.mubr.f32.gmra.mrb[6].mxu1 %v4745_v41 }
 0x394   : > { %v2280_v14 = vmax.f32 %v2227_v50, 0.0  ;;  %4453 = vrot.lane.b32.xlu1 %v10243_v28, %s5786_s8  ;;  %v5645_v59 = vunpack.i.l.bf16 %v10347_v49 }
 0x395   : > { %v2319_v44 = vsel %vm11219_vm6, %v2281_v22, %v2232_v21  ;;  %4482 = vrot.lane.b32.xlu0 %v10349_v11, %s5778_s7 }
 0x396   : > { %v3868_v8 = vsel %vm3760_vm4, %v2319_v44, 0.0  ;;  %v2318_v20 = vsel %vm11221_vm14, %v2280_v14, %v2227_v50  ;;  %vm10353_vm4 = vmand %vm3582_vm15, %vm3546_vm10  ;;  %vm3041_vm10 = vcmp.ge.s32.totalorder %v10124_v25, 0  ;;  %vm3077_vm15 = vcmp.lt.s32.totalorder %v10124_v25, 286  ;;  %v4055_v14 = vld [vmem:[#allocation2 + $0x54] ss:$2 sm:$0xff] }
 0x397   : > { %3904 = vst.msk [vmem:[#allocation2 + $0x11b] sm:$0xff] %vm11224_vm11, %v3868_v8  ;;  %v3867_v7 = vsel %vm3759_vm8, %v2318_v20, 0.0  ;;  %vm3078_vm8 = vcmp.lt.s32.totalorder %v10120_v62, 286  ;;  %v3690_v42 = vsel %vm10353_vm4, %v3654_v27, %v3510_v6  ;;  %v10374_v28 = vpop.permute.xlu0 %4443  ;;  %v10386_v62 = vpop.permute.xlu1 %5648  ;;  %vm10397_vm1 = vmand %vm3041_vm10, %vm3077_vm15  ;;  %vm11237_vm4 = vcmp.lt.s32.totalorder %v7330_v36, 16  ;;  %v3950_v36 = vld [vmem:[#allocation2 + $0x41] ss:$2 sm:$0xff] }
 0x398   : > { %3903 = vst.msk [vmem:[#allocation2 + $0x113] sm:$0xff] %vm11224_vm11, %v3867_v7  ;;  %4506 = vrot.lane.b32.xlu1 %v10376_v24, %s5778_s7  ;;  %vm10388_vm6 = vmand %vm3042_vm7, %vm3078_vm8  ;;  %vm10392_vm5 = vcmp.lt.s32.totalorder %v3690_v42, 16  ;;  %v5650_v9 = vunpack.i.l.bf16 %v10386_v62  ;;  %v4674_v21 = vsel %vm11239_vm3, %v3926_v26, %v5645_v59  ;;  %v5742_v48 = vpack.i.bf16 %v3950_v36, %v3972_v37  ;;  %v3928_v27 = vld [vmem:[#allocation2 + $0xa0] ss:$2 sm:$0xff]  ;;  %v4021_v42 = vld [vmem:[#allocation2 + $0x53] ss:$2 sm:$0xff] }
 0x399   : > { %5733 = vrot.lane.b32.xlu0 %v10368_v17, %s5787_s29  ;;  %vm3762_vm14 = vmand %vm10388_vm6, %vm10392_vm5  ;;  %vm11241_vm8 = vcmask 130048   ;;  %vm11242_vm10 = vcmask 785408   ;;  %vm11243_vm15 = vcmask 326656   ;;  %vm11244_vm6 = vcmask 523264  }
 0x39a   : > { %vm3761_vm13 = vmand %vm10397_vm1, %vm10401_vm0  ;;  %v4692_v50 = vsel %vm4682_vm2, %v4674_v21, %v5650_v9  ;;  %vm11245_vm5 = vcmask 719872   ;;  %vm11246_vm1 = vcmask 982016   ;;  %v5646_v44 = vunpack.i.h.bf16 %v10347_v49  ;;  %v4043_v49 = vld [vmem:[#allocation2 + $0x103] ss:$2 sm:$0xff] }
 0x39b   : > { %v10406_v46 = vpop.permute.xlu0 %5653  ;;  %v4497_v39 = vpop.permute.xlu1 %4496  ;;  %vm11238_vm11 = vmmov %vm11237_vm4  ;;  %v5752_v8 = vpack.i.bf16 %v5765_v1, %v4009_v52  ;;  %v5651_v41 = vunpack.i.h.bf16 %v10386_v62  ;;  %v4092_v21 = vld [vmem:[#allocation2 + $0x65] ss:$2 sm:$0xff] }
 0x39c   : > { %4550 = vrot.lane.b32.xlu1 %v4088_v10, %s5789_s21  ;;  %vm11240_vm7 = vmmov %vm11239_vm3  ;;  %v5655_v58 = vunpack.i.l.bf16 %v10406_v46  ;;  %v4763_v0 = vsel %vm11241_vm8, %v10374_v28, %v4497_v39 }
 0x39d   : > { %vm11247_vm0 = vmmov %vm11239_vm3 }
 0x39e   : > { %v4710_v16 = vsel %vm4700_vm9, %v4692_v50, %v5655_v58  ;;  %v4675_v7 = vsel %vm11247_vm0, %v3928_v27, %v5646_v44  ;;  %vm11253_vm3 = vmmov %vm11246_vm1 }
 0x39f   : > { %v5357_v61 = vpop.f32.mrb[34].mxu0  ;;  %v4112_v56 = vld [vmem:[#allocation2 + $0x105] ss:$2 sm:$0xff]  ;;  %v5659_v12 = vpop.permute.xlu0 %5658  ;;  %v4146_v6 = vld [vmem:[#allocation2 + $0x106] ss:$2 sm:$0xff] }
 0x3a0   : > { %v2242_v25 = vadd.f32 %v10299_v4, %v5357_v61  ;;  %v2236_v60 = vpop.f32.mrb[35].mxu0  ;;  %4574 = vrot.lane.b32.xlu0 %v4112_v56, %s5789_s21  ;;  %5738 = vrot.lane.b32.xlu1 %v5737_v15, %s5788_s11  ;;  %v5660_v47 = vunpack.i.l.bf16 %v5659_v12  ;;  %v4080_v20 = vld [vmem:[#allocation2 + $0x114] ss:$2 sm:$0xff]  ;;  %v5661_v57 = vunpack.i.h.bf16 %v5659_v12  ;;  %v5757_v61 = vpack.i.bf16 %v4021_v42, %v4043_v49 }
 0x3a1   : > { %v2237_v51 = vadd.f32 %v10299_v4, %v2236_v60  ;;  %v4008_v56 = vld [vmem:[#allocation2 + $0x102] ss:$2 sm:$0x3f]  ;;  %v4079_v59 = vld [vmem:[#allocation2 + $0x114] ss:$2 sm:$0x3f] }
 0x3a2   : > { %v2283_v3 = vmax.f32 %v2242_v25, 0.0  ;;  %v4728_v5 = vsel %vm11242_vm10, %v4710_v16, %v5660_v47  ;;  %v4011_v12 = vld [vmem:[#allocation2 + $0x112] ss:$2 sm:$0x3f]  ;;  %v3932_v49 = vld [vmem:[#allocation2 + $0xc0] ss:$2 sm:$0xff] }
 0x3a3   : > { %v2282_v63 = vmax.f32 %v2237_v51, 0.0  ;;  %v4565_v13 = vpop.permute.xlu1 %4564  ;;  %v4746_v31 = vsel %vm11246_vm1, %v4728_v5, %v10374_v28  ;;  %v4446_v2 = vpop.permute.xlu0 %4445  ;;  %v4045_v5 = vld [vmem:[#allocation2 + $0x113] ss:$2 sm:$0x3f] }
 0x3a4   : > { %v2321_v40 = vsel %vm11237_vm4, %v2283_v3, %v2242_v25  ;;  %4618 = vrot.lane.b32.xlu0 %v4122_v55, %s5790_s22  ;;  %4642 = vrot.lane.b32.xlu1 %v4146_v6, %s5790_s22  ;;  %v4781_v22 = vsel %vm11243_vm15, %v4763_v0, %v4565_v13  ;;  %v4124_v25 = vld [vmem:[#allocation2 + $0x56] ss:$2 sm:$0xff]  ;;  %vm11251_vm4 = vmmov %vm11244_vm6 }
 0x3a5   : > { %v3870_v54 = vsel %vm3762_vm14, %v2321_v40, 0.0  ;;  %v2320_v38 = vsel %vm11238_vm11, %v2282_v63, %v2237_v51  ;;  %vm11248_vm14 = vmmov %vm11241_vm8  ;;  %v3930_v40 = vld [vmem:[#allocation2 + $0xb0] ss:$2 sm:$0xff] }
 0x3a6   : > { %3907 = vst.msk [vmem:[#allocation2 + $0x12b] sm:$0x3f] %vm3906_vm12, %v3870_v54  ;;  %v3869_v4 = vsel %vm3761_vm13, %v2320_v38, 0.0  ;;  %vm11249_vm12 = vmmov %vm11242_vm10 }
 0x3a7   : > { %3905 = vst.msk [vmem:[#allocation2 + $0x123] sm:$0xff] %vm11240_vm7, %v3869_v4  ;;  %v4633_v33 = vpop.permute.xlu1 %4632  ;;  %vm11250_vm13 = vmmov %vm11243_vm15 }
 0x3a8   : > { %5743 = vrot.lane.b32.xlu0 %v5742_v48, %s5780_s13  ;;  %v4799_v43 = vsel %vm11244_vm6, %v4781_v22, %v4633_v33  ;;  %5748 = vrot.lane.b32.xlu1 %v10368_v17, %s5785_s27  ;;  %v4693_v17 = vsel %vm4682_vm2, %v4675_v7, %v5651_v41  ;;  %vm11252_vm11 = vmmov %vm11245_vm5  ;;  %v4126_v22 = vld [vmem:[#allocation2 + $0x66] ss:$2 sm:$0xff] }
 0x3a9   : > { %5243 = vmatprep.mubr.msk.f32.mxu1 %vm11245_vm5, %v4799_v43  ;;  %vm11254_vm7 = vmmov %vm11247_vm0 }
 0x3aa   : > { %5003 = vmatmul.mubr.f32.gmra.mrb[8].mxu1 %v4746_v31  ;;  %vm11255_vm15 = vmmov %vm11250_vm13 }
 0x3ab   : > { %v4499_v18 = vpop.permute.xlu1 %4498  ;;  %vm11256_vm6 = vmmov %vm11251_vm4 }
 0x3ac   : > { %4431 = vrot.lane.b32.xlu0 %v10349_v11, %s5786_s8  ;;  %4455 = vrot.lane.b32.xlu1 %v10376_v24, %s5786_s8  ;;  %v5656_v11 = vunpack.i.h.bf16 %v10406_v46  ;;  %v4764_v24 = vsel %vm11248_vm14, %v4446_v2, %v4499_v18  ;;  %v3974_v46 = vld [vmem:[#allocation2 + $0x101] ss:$2 sm:$0x3f]  ;;  %vm11257_vm14 = vmmov %vm11241_vm8 }
 0x3ae   : > { %v4114_v23 = vld [vmem:[#allocation2 + $0x115] ss:$2 sm:$0xff]  ;;  %v4711_v28 = vsel %vm4700_vm9, %v4693_v17, %v5656_v11  ;;  %v4148_v51 = vld [vmem:[#allocation2 + $0x116] ss:$2 sm:$0xff] }
 0x3af   : > { %v4729_v34 = vsel %vm11249_vm12, %v4711_v28, %v5661_v57  ;;  %v4082_v38 = vld [vmem:[#allocation2 + $0x124] ss:$2 sm:$0x3f]  ;;  %v4116_v58 = vld [vmem:[#allocation2 + $0x125] ss:$2 sm:$0x3f]  ;;  %vm11258_vm12 = vmmov %vm11247_vm0 }
 0x3b0   : > { %4484 = vrot.lane.b32.xlu0 %v4055_v14, %s5778_s7  ;;  %4508 = vrot.lane.b32.xlu1 %v4080_v20, %s5778_s7  ;;  %v4747_v29 = vsel %vm11253_vm3, %v4729_v34, %v4446_v2  ;;  %v4150_v31 = vld [vmem:[#allocation2 + $0x126] ss:$2 sm:$0x3f]  ;;  %vm11261_vm3 = vmmov %vm11246_vm1 }
 0x3b1   : > { %v3908_v20 = vld [vmem:[#allocation2] ss:$2 sm:$0xff] }
 0x3b4   : > { %5753 = vrot.lane.b32.xlu0 %v5752_v8, %s5787_s29  ;;  %4552 = vrot.lane.b32.xlu1 %v4090_v35, %s5789_s21 }
 0x3b6   : > { %v4635_v53 = vpop.permute.xlu1 %4634  ;;  %v4567_v62 = vpop.permute.xlu0 %4566 }
 0x3b7   : > { %v4782_v45 = vsel %vm11250_vm13, %v4764_v24, %v4567_v62 }
 0x3b8   : > { %4576 = vrot.lane.b32.xlu0 %v4114_v23, %s5789_s21  ;;  %5758 = vrot.lane.b32.xlu1 %v5757_v61, %s5788_s11  ;;  %v4800_v60 = vsel %vm11251_vm4, %v4782_v45, %v4635_v53  ;;  %vm11259_vm4 = vmmov %vm11242_vm10 }
 0x3b9   : > { %5244 = vmatprep.mubr.msk.f32.mxu1 %vm11252_vm11, %v4800_v60  ;;  %vm11260_vm11 = vmmov %vm11256_vm6 }
 0x3ba   : > { %v5664_v19 = vpop.permute.xlu0 %5663  ;;  %5008 = vmatmul.mubr.f32.gmra.mrb[10].mxu1 %v4747_v29  ;;  %v5669_v30 = vpop.permute.xlu1 %5668 }
 0x3bb   : > { %v5665_v63 = vunpack.i.l.bf16 %v5664_v19  ;;  %v5670_v54 = vunpack.i.l.bf16 %v5669_v30  ;;  %v5666_v44 = vunpack.i.h.bf16 %v5664_v19  ;;  %v5671_v41 = vunpack.i.h.bf16 %v5669_v30 }
 0x3bc   : > { %4620 = vrot.lane.b32.xlu0 %v4124_v25, %s5790_s22  ;;  %4644 = vrot.lane.b32.xlu1 %v4148_v51, %s5790_s22 }
 0x3bd   : > { %v4676_v55 = vsel %vm11254_vm7, %v3930_v40, %v5665_v63  ;;  %v4665_v27 = vsel %vm11247_vm0, %v3908_v20, %v5666_v44  ;;  %vm11262_vm7 = vmmov %vm11245_vm5 }
 0x3be   : > { %v4448_v10 = vpop.permute.xlu0 %4447  ;;  %v4501_v15 = vpop.permute.xlu1 %4500  ;;  %v4694_v36 = vsel %vm4682_vm2, %v4676_v55, %v5670_v54  ;;  %v4683_v17 = vsel %vm4682_vm2, %v4665_v27, %v5671_v41 }
 0x3bf   : > { %v4765_v48 = vsel %vm11241_vm8, %v4448_v10, %v4501_v15 }
 0x3c0   : > { %4200 = vrot.lane.b32.xlu0 %v3974_v46, %s5780_s13  ;;  %4268 = vrot.lane.b32.xlu1 %v4008_v56, %s5785_s27 }
 0x3c2   : > { %v5674_v3 = vpop.permute.xlu0 %5673 }
 0x3c3   : > { %v5675_v37 = vunpack.i.l.bf16 %v5674_v3  ;;  %v5676_v7 = vunpack.i.h.bf16 %v5674_v3 }
 0x3c4   : > { %4433 = vrot.lane.b32.xlu0 %v4055_v14, %s5786_s8  ;;  %4457 = vrot.lane.b32.xlu1 %v4079_v59, %s5786_s8 }
 0x3c5   : > { %v4712_v47 = vsel %vm4700_vm9, %v4694_v36, %v5675_v37  ;;  %v4701_v24 = vsel %vm4700_vm9, %v4683_v17, %v5676_v7 }
 0x3c6   : > { %v5679_v39 = vpop.permute.xlu0 %5678 }
 0x3c7   : > { %v5680_v9 = vunpack.i.l.bf16 %v5679_v39  ;;  %v5681_v18 = vunpack.i.h.bf16 %v5679_v39 }
 0x3c8   : > { %4486 = vrot.lane.b32.xlu0 %v5766_v32, %s5778_s7  ;;  %4510 = vrot.lane.b32.xlu1 %v4082_v38, %s5778_s7  ;;  %s5433_s7 = smul.u32 136, %s11322_s19 }
 0x3c9   : > { %v4730_v13 = vsel %vm11242_vm10, %v4712_v47, %v5680_v9  ;;  %v4719_v34 = vsel %vm11259_vm4, %v4701_v24, %v5681_v18  ;;  %vm11263_vm10 = vmmov %vm11259_vm4 }
 0x3ca   : > { %v4569_v26 = vpop.permute.xlu1 %4568  ;;  %v10475_v4 = vpop.permute.xlu0 %5683  ;;  %v4748_v33 = vsel %vm11246_vm1, %v4730_v13, %v4448_v10  ;;  %vm11267_vm4 = vmmov %vm11256_vm6  ;;  %s10605_s28 = scalar_lea.vmem %s10691_s5, %s5433_s7 }
 0x3cb   : > { %v4783_v6 = vsel %vm11255_vm15, %v4765_v48, %v4569_v26  ;;  %v5685_v11 = vunpack.i.l.bf16 %v10475_v4  ;;  %vm11264_vm15 = vmmov %vm11250_vm13  ;;  %v5686_v38 = vunpack.i.h.bf16 %v10475_v4 }
 0x3cc   : > { %4321 = vrot.lane.b32.xlu0 %v4011_v12, %s5787_s29  ;;  %4554 = vrot.lane.b32.xlu1 %v4092_v21, %s5789_s21  ;;  %v3910_v21 = vld [vmem:[#allocation2 + $0x10] ss:$2 sm:$0xff] }
 0x3cd   : > { %v4677_v28 = vsel %vm11258_vm12, %v3932_v49, %v5685_v11  ;;  %v4666_v47 = vsel %vm11247_vm0, %v3910_v21, %v5686_v38  ;;  %vm11266_vm12 = vmmov %vm11247_vm0 }
 0x3ce   : > { %v4637_v50 = vpop.permute.xlu1 %4636  ;;  %v4426_v16 = vpop.permute.xlu0 %4425 }
 0x3cf   : > { %v4801_v0 = vsel %vm11256_vm6, %v4783_v6, %v4637_v50  ;;  %v4737_v29 = vsel %vm11261_vm3, %v4719_v34, %v4426_v16  ;;  %v3934_v6 = vld [vmem:[#allocation2 + $0xd0] ss:$2 sm:$0xff]  ;;  %vm11269_vm3 = vmmov %vm11245_vm5 }
 0x3d0   : > { %4578 = vrot.lane.b32.xlu0 %v4116_v58, %s5789_s21  ;;  %5245 = vmatprep.mubr.msk.f32.mxu1 %vm11245_vm5, %v4801_v0 }
 0x3d1   : > { %4389 = vrot.lane.b32.xlu1 %v4045_v5, %s5788_s11  ;;  %5013 = vmatmul.mubr.f32.gmra.mrb[12].mxu1 %v4748_v33 }
 0x3d2   : > { %v5689_v43 = vpop.permute.xlu1 %5688  ;;  %v4479_v14 = vpop.permute.xlu0 %4478 }
 0x3d3   : > { %v5690_v35 = vunpack.i.l.bf16 %v5689_v43  ;;  %v4754_v42 = vsel %vm11257_vm14, %v4426_v16, %v4479_v14  ;;  %v5691_v12 = vunpack.i.h.bf16 %v5689_v43  ;;  %vm11265_vm14 = vmmov %vm11241_vm8 }
 0x3d4   : > { %4622 = vrot.lane.b32.xlu0 %v4126_v22, %s5790_s22 }
 0x3d5   : > { %4646 = vrot.lane.b32.xlu1 %v4150_v31, %s5790_s22  ;;  %v4695_v45 = vsel %vm4682_vm2, %v4677_v28, %v5690_v35  ;;  %v4684_v13 = vsel %vm4682_vm2, %v4666_v47, %v5691_v12 }
 0x3d6   : > { %v4450_v52 = vpop.permute.xlu1 %4449  ;;  %v10490_v1 = vpop.permute.xlu0 %5693 }
 0x3d7   : > { %v5695_v23 = vunpack.i.l.bf16 %v10490_v1  ;;  %v5696_v55 = vunpack.i.h.bf16 %v10490_v1 }
 0x3d9   : > { %v4713_v19 = vsel %vm4700_vm9, %v4695_v45, %v5695_v23  ;;  %v4702_v22 = vsel %vm4700_vm9, %v4684_v13, %v5696_v55 }
 0x3da   : > { %v4503_v8 = vpop.permute.xlu1 %4502 }
 0x3db   : > { %v4766_v51 = vsel %vm11241_vm8, %v4450_v52, %v4503_v8 }
 0x3de   : > { %v4547_v57 = vpop.permute.xlu1 %4546 }
 0x3df   : > { %v4571_v2 = vpop.permute.xlu0 %4570  ;;  %v4772_v53 = vsel %vm11250_vm13, %v4754_v42, %v4547_v57 }
 0x3e0   : > { %v4784_v10 = vsel %vm11264_vm15, %v4766_v51, %v4571_v2  ;;  %vm11271_vm15 = vmmov %vm11250_vm13 }
 0x3e2   : > { %v5699_v62 = vpop.permute.xlu1 %5698 }
 0x3e3   : > { %v4615_v61 = vpop.permute.xlu0 %4614  ;;  %v5700_v25 = vunpack.i.l.bf16 %v5699_v62  ;;  %v5701_v58 = vunpack.i.h.bf16 %v5699_v62 }
 0x3e4   : > { %v4790_v60 = vsel %vm11260_vm11, %v4772_v53, %v4615_v61  ;;  %vm11268_vm11 = vmmov %vm11263_vm10  ;;  %v3912_v61 = vld [vmem:[#allocation2 + $0x20] ss:$2 sm:$0xff] }
 0x3e5   : > { %5234 = vmatprep.mubr.msk.f32.mxu0 %vm11262_vm7, %v4790_v60  ;;  %v4731_v46 = vsel %vm11263_vm10, %v4713_v19, %v5700_v25  ;;  %v4720_v14 = vsel %vm11268_vm11, %v4702_v22, %v5701_v58  ;;  %vm11270_vm7 = vmmov %vm11246_vm1  ;;  %v3936_v19 = vld [vmem:[#allocation2 + $0xe0] ss:$2 sm:$0xff]  ;;  %v3914_v22 = vld [vmem:[#allocation2 + $0x30] ss:$2 sm:$0xff] }
 0x3e6   : > { %4958 = vmatmul.mubr.f32.vlgmr.msra.gmra.mrb[36].mxu0 %v4737_v29  ;;  %v4639_v56 = vpop.permute.xlu1 %4638  ;;  %v4749_v59 = vsel %vm11246_vm1, %v4731_v46, %v4450_v52  ;;  %vm11276_vm11 = vmmov %vm11263_vm10 }
 0x3e7   : > { %v10509_v30 = vpop.permute.xlu0 %5703  ;;  %v4802_v3 = vsel %vm11256_vm6, %v4784_v10, %v4639_v56  ;;  %vm11272_vm6 = vmmov %vm11267_vm4 }
 0x3e8   : > { %5246 = vmatprep.mubr.msk.f32.mxu1 %vm11245_vm5, %v4802_v3  ;;  %v5705_v37 = vunpack.i.l.bf16 %v10509_v30  ;;  %vm11273_vm5 = vmmov %vm11269_vm3  ;;  %v5706_v17 = vunpack.i.h.bf16 %v10509_v30 }
 0x3e9   : > { %5018 = vmatmul.mubr.f32.gmra.mrb[14].mxu1 %v4749_v59 }
 0x3ea   : > { %v5709_v63 = vpop.permute.xlu1 %5708  ;;  %v4678_v4 = vsel %vm11266_vm12, %v3934_v6, %v5705_v37  ;;  %v4667_v25 = vsel %vm11247_vm0, %v3912_v61, %v5706_v17  ;;  %vm11275_vm12 = vmmov %vm11247_vm0 }
 0x3eb   : > { %v4428_v32 = vpop.permute.xlu0 %4427  ;;  %v5710_v36 = vunpack.i.l.bf16 %v5709_v63  ;;  %v5711_v42 = vunpack.i.h.bf16 %v5709_v63 }
 0x3ec   : > { %v4738_v52 = vsel %vm11270_vm7, %v4720_v14, %v4428_v32  ;;  %vm11277_vm7 = vmmov %vm11246_vm1 }
 0x3ed   : > { %v4696_v33 = vsel %vm4682_vm2, %v4678_v4, %v5710_v36  ;;  %v4685_v29 = vsel %vm4682_vm2, %v4667_v25, %v5711_v42 }
 0x3ee   : > { %v4452_v40 = vpop.permute.xlu1 %4451 }
 0x3ef   : > { %v4481_v15 = vpop.permute.xlu0 %4480 }
 0x3f0   : > { %v4755_v50 = vsel %vm11265_vm14, %v4428_v32, %v4481_v15  ;;  %vm11274_vm14 = vmmov %vm11241_vm8 }
 0x3f2   : > { %v4505_v39 = vpop.permute.xlu1 %4504 }
 0x3f3   : > { %v10514_v54 = vpop.permute.xlu0 %5713  ;;  %v4767_v1 = vsel %vm11241_vm8, %v4452_v40, %v4505_v39 }
 0x3f4   : > { %v5715_v48 = vunpack.i.l.bf16 %v10514_v54  ;;  %v5716_v28 = vunpack.i.h.bf16 %v10514_v54 }
 0x3f6   : > { %v4549_v9 = vpop.permute.xlu1 %4548  ;;  %v4714_v44 = vsel %vm4700_vm9, %v4696_v33, %v5715_v48  ;;  %v4703_v3 = vsel %vm4700_vm9, %v4685_v29, %v5716_v28 }
 0x3f7   : > { %v4573_v26 = vpop.permute.xlu0 %4572  ;;  %v4773_v16 = vsel %vm11250_vm13, %v4755_v50, %v4549_v9 }
 0x3f8   : > { %v4785_v20 = vsel %vm11271_vm15, %v4767_v1, %v4573_v26  ;;  %vm11278_vm15 = vmmov %vm11250_vm13 }
 0x3fa   : > { %v5719_v0 = vpop.permute.xlu1 %5718 }
 0x3fb   : > { %v4617_v5 = vpop.permute.xlu0 %4616  ;;  %v5720_v43 = vunpack.i.l.bf16 %v5719_v0  ;;  %v5721_v34 = vunpack.i.h.bf16 %v5719_v0 }
 0x3fc   : > { %v4791_v31 = vsel %vm11267_vm4, %v4773_v16, %v4617_v5 }
 0x3fd   : > { %5235 = vmatprep.mubr.msk.f32.mxu0 %vm11269_vm3, %v4791_v31  ;;  %v4732_v8 = vsel %vm11263_vm10, %v4714_v44, %v5720_v43  ;;  %v3938_v44 = vld [vmem:[#allocation2 + $0xf0] ss:$2 sm:$0xff] }
 0x3fe   : > { %4963 = vmatmul.mubr.f32.gmra.mrb[38].mxu0 %v4738_v52  ;;  %v4641_v41 = vpop.permute.xlu1 %4640  ;;  %v4750_v11 = vsel %vm11246_vm1, %v4732_v8, %v4452_v40  ;;  %v4721_v40 = vsel %vm11276_vm11, %v4703_v3, %v5721_v34  ;;  %vm11283_vm11 = vmmov %vm11263_vm10 }
 0x3ff   : > { %v10535_v27 = vpop.permute.xlu0 %5723  ;;  %v4803_v7 = vsel %vm11272_vm6, %v4785_v20, %v4641_v41  ;;  %vm11279_vm6 = vmmov %vm11267_vm4 }
 0x400   : > { %5247 = vmatprep.mubr.msk.f32.mxu1 %vm11273_vm5, %v4803_v7  ;;  %v5725_v24 = vunpack.i.l.bf16 %v10535_v27  ;;  %vm11280_vm5 = vmmov %vm11269_vm3  ;;  %v5726_v6 = vunpack.i.h.bf16 %v10535_v27 }
 0x401   : > { %5023 = vmatmul.mubr.f32.gmra.mrb[16].mxu1 %v4750_v11 }
 0x402   : > { %v10540_v57 = vpop.permute.xlu1 %5728  ;;  %v4679_v46 = vsel %vm11275_vm12, %v3936_v19, %v5725_v24  ;;  %v4668_v31 = vsel %vm11247_vm0, %v3914_v22, %v5726_v6  ;;  %vm11282_vm12 = vmmov %vm11247_vm0 }
 0x403   : > { %v4430_v2 = vpop.permute.xlu0 %4429  ;;  %v5730_v45 = vunpack.i.l.bf16 %v10540_v57  ;;  %v5731_v50 = vunpack.i.h.bf16 %v10540_v57 }
 0x404   : > { %v4739_v15 = vsel %vm11277_vm7, %v4721_v40, %v4430_v2  ;;  %vm11284_vm7 = vmmov %vm11246_vm1 }
 0x405   : > { %v4697_v59 = vsel %vm4682_vm2, %v4679_v46, %v5730_v45  ;;  %v4686_v52 = vsel %vm4682_vm2, %v4668_v31, %v5731_v50  ;;  %vm11289_vm0 = vmmov %vm11284_vm7 }
 0x406   : > { %v4454_v18 = vpop.permute.xlu1 %4453 }
 0x407   : > { %v4483_v35 = vpop.permute.xlu0 %4482 }
 0x408   : > { %v4756_v51 = vsel %vm11274_vm14, %v4430_v2, %v4483_v35  ;;  %vm11281_vm14 = vmmov %vm11241_vm8 }
 0x40a   : > { %v4507_v23 = vpop.permute.xlu1 %4506 }
 0x40b   : > { %v10542_v49 = vpop.permute.xlu0 %5733  ;;  %v4768_v54 = vsel %vm11241_vm8, %v4454_v18, %v4507_v23 }
 0x40c   : > { %v5735_v60 = vunpack.i.l.bf16 %v10542_v49  ;;  %v5736_v4 = vunpack.i.h.bf16 %v10542_v49 }
 0x40e   : > { %v4551_v53 = vpop.permute.xlu1 %4550  ;;  %v4715_v39 = vsel %vm4700_vm9, %v4697_v59, %v5735_v60  ;;  %v4704_v7 = vsel %vm4700_vm9, %v4686_v52, %v5736_v4 }
 0x40f   : > { %v4774_v10 = vsel %vm11250_vm13, %v4756_v51, %v4551_v53 }
 0x412   : > { %v4575_v62 = vpop.permute.xlu0 %4574  ;;  %v5739_v56 = vpop.permute.xlu1 %5738 }
 0x413   : > { %v5740_v63 = vunpack.i.l.bf16 %v5739_v56  ;;  %v4786_v12 = vsel %vm11278_vm15, %v4768_v54, %v4575_v62  ;;  %v5741_v33 = vunpack.i.h.bf16 %v5739_v56  ;;  %vm11285_vm15 = vmmov %vm11250_vm13 }
 0x415   : > { %v4733_v38 = vsel %vm11263_vm10, %v4715_v39, %v5740_v63  ;;  %v4722_v35 = vsel %vm11283_vm11, %v4704_v7, %v5741_v33  ;;  %v3916_v39 = vld [vmem:[#allocation2 + $0x40] ss:$2 sm:$0xff]  ;;  %vm11294_vm11 = vmmov %vm11285_vm15 }
 0x416   : > { %v4619_v30 = vpop.permute.xlu0 %4618  ;;  %v4643_v55 = vpop.permute.xlu1 %4642  ;;  %v4751_v26 = vsel %vm11246_vm1, %v4733_v38, %v4454_v18  ;;  %v10595_v18 = vld [vmem:[%s10690_s4] ss:$0 sm:$0xff]  ;;  %vm11288_vm1 = vmmov %vm11269_vm3 }
 0x417   : > { %v4792_v32 = vsel %vm11267_vm4, %v4774_v10, %v4619_v30  ;;  %v4804_v9 = vsel %vm11279_vm6, %v4786_v12, %v4643_v55  ;;  %vm11286_vm6 = vmmov %vm11267_vm4  ;;  %v3940_v12 = vld [vmem:[#allocation2 + $0x100] ss:$2 sm:$0x3f] }
 0x418   : > { %5236 = vmatprep.mubr.msk.f32.mxu0 %vm11269_vm3, %v4792_v32  ;;  %5248 = vmatprep.mubr.msk.f32.mxu1 %vm11280_vm5, %v4804_v9  ;;  %vm11287_vm5 = vcmask 64512  }
 0x419   : > { %4968 = vmatmul.mubr.f32.gmra.mrb[40].mxu0 %v4739_v15  ;;  %5028 = vmatmul.mubr.f32.gmra.mrb[18].mxu1 %v4751_v26 }
 0x41a   : > { %v10564_v37 = vpop.permute.xlu0 %5743  ;;  %v10569_v21 = vpop.permute.xlu1 %5748 }
 0x41b   : > { %v5745_v16 = vunpack.i.l.bf16 %v10564_v37  ;;  %v5750_v43 = vunpack.i.l.bf16 %v10569_v21  ;;  %v5746_v56 = vunpack.i.h.bf16 %v10564_v37  ;;  %v5751_v30 = vunpack.i.h.bf16 %v10569_v21 }
 0x41d   : > { %v4680_v8 = vsel %vm11282_vm12, %v3938_v44, %v5745_v16 }
 0x41e   : > { %v4432_v58 = vpop.permute.xlu0 %4431  ;;  %v4456_v36 = vpop.permute.xlu1 %4455  ;;  %v4698_v11 = vsel %vm4682_vm2, %v4680_v8, %v5750_v43 }
 0x41f   : > { %v4740_v23 = vsel %vm11284_vm7, %v4722_v35, %v4432_v58  ;;  %vm11296_vm7 = vmmov %vm11263_vm10 }
 0x422   : > { %v4485_v47 = vpop.permute.xlu0 %4484  ;;  %v4509_v48 = vpop.permute.xlu1 %4508 }
 0x423   : > { %v4757_v1 = vsel %vm11281_vm14, %v4432_v58, %v4485_v47  ;;  %v4769_v17 = vsel %vm11241_vm8, %v4456_v36, %v4509_v48  ;;  %vm11290_vm14 = vmmov %vm11282_vm12 }
 0x424   : > { %v4669_v38 = vsel %vm11290_vm14, %v3916_v39, %v5746_v56  ;;  %vm11291_vm12 = vmmov %vm11287_vm5 }
 0x425   : > { %v4687_v55 = vsel %vm4682_vm2, %v4669_v38, %v5751_v30 }
 0x426   : > { %v10572_v13 = vpop.permute.xlu0 %5753  ;;  %v4553_v0 = vpop.permute.xlu1 %4552 }
 0x427   : > { %v5755_v14 = vunpack.i.l.bf16 %v10572_v13  ;;  %v4775_v20 = vsel %vm11250_vm13, %v4757_v1, %v4553_v0  ;;  %v5756_v63 = vunpack.i.h.bf16 %v10572_v13  ;;  %vm11292_vm13 = vmmov %vm11290_vm14 }
 0x429   : > { %v4716_v49 = vsel %vm4700_vm9, %v4698_v11, %v5755_v14  ;;  %v4705_v47 = vsel %vm4700_vm9, %v4687_v55, %v5756_v63 }
 0x42a   : > { %v4577_v5 = vpop.permute.xlu0 %4576  ;;  %v5759_v41 = vpop.permute.xlu1 %5758 }
 0x42b   : > { %v5760_v57 = vunpack.i.l.bf16 %v5759_v41  ;;  %v4787_v24 = vsel %vm11285_vm15, %v4769_v17, %v4577_v5  ;;  %v5761_v54 = vunpack.i.h.bf16 %v5759_v41  ;;  %vm11299_vm15 = vmmov %vm11288_vm1 }
 0x42d   : > { %v4734_v28 = vsel %vm11263_vm10, %v4716_v49, %v5760_v57  ;;  %v4723_v6 = vsel %vm11296_vm7, %v4705_v47, %v5761_v54  ;;  %vm11298_vm10 = vmmov %vm11296_vm7 }
 0x42e   : > { %v4621_v27 = vpop.permute.xlu0 %4620  ;;  %v4645_v61 = vpop.permute.xlu1 %4644  ;;  %v4752_v25 = vsel %vm11289_vm0, %v4734_v28, %v4456_v36 }
 0x42f   : > { %v4793_v2 = vsel %vm11267_vm4, %v4775_v20, %v4621_v27  ;;  %v4805_v34 = vsel %vm11286_vm6, %v4787_v24, %v4645_v61  ;;  %vm11293_vm4 = vmmov %vm11241_vm8 }
 0x430   : > { %5237 = vmatprep.mubr.msk.f32.mxu0 %vm11269_vm3, %v4793_v2  ;;  %5249 = vmatprep.mubr.msk.f32.mxu1 %vm11288_vm1, %v4805_v34  ;;  %vm11295_vm3 = vmmov %vm11286_vm6 }
 0x431   : > { %v4984_v42 = vpop.f32.mrb[0].mxu1  ;;  %4973 = vmatmul.mubr.f32.gmra.mrb[42].mxu0 %v4740_v23  ;;  %5033 = vmatmul.mubr.f32.gmra.mrb[20].mxu1 %v4752_v25  ;;  %vm11297_vm8 = vmmov %vm11293_vm4 }
 0x432   : > { %v4985_v53 = vadd.f32 %v10595_v18, %v4984_v42  ;;  %v4986_v62 = vpop.f32.mrb[1].mxu1  ;;  %v4201_v45 = vpop.permute.xlu0 %4200  ;;  %vm11300_vm6 = vmmov %vm11289_vm0 }
 0x433   : > { %v4269_v60 = vpop.permute.xlu1 %4268  ;;  %v4681_v37 = vsel %vm11292_vm13, %v3940_v12, %v4201_v45 }
 0x434   : > { %5048 = vst.msk [vmem:[%s10605_s28 + $0x28] sm:$0xff] %vm11287_vm5, %v4985_v53  ;;  %v4699_v21 = vsel %vm4682_vm2, %v4681_v37, %v4269_v60  ;;  %vm11301_vm2 = vmmov %vm11294_vm11 }
 0x435   : > { %vm11302_vm5 = vmmov %vm11295_vm3 }
 0x436   : > { %v4434_v29 = vpop.permute.xlu0 %4433 }
 0x437   : > { %v4458_v19 = vpop.permute.xlu1 %4457  ;;  %v4741_v16 = vsel %vm11300_vm6, %v4723_v6, %v4434_v29 }
 0x43a   : > { %v4487_v51 = vpop.permute.xlu0 %4486 }
 0x43b   : > { %v4511_v46 = vpop.permute.xlu1 %4510  ;;  %v4758_v9 = vsel %vm11293_vm4, %v4434_v29, %v4487_v51 }
 0x43c   : > { %v4770_v50 = vsel %vm11297_vm8, %v4458_v19, %v4511_v46 }
 0x43e   : > { %v4322_v10 = vpop.permute.xlu0 %4321 }
 0x43f   : > { %v4989_v3 = vpop.f32.mrb[2].mxu1  ;;  %v4555_v59 = vpop.permute.xlu1 %4554  ;;  %v4717_v48 = vsel %vm4700_vm9, %v4699_v21, %v4322_v10  ;;  %vm11303_vm9 = vmmov %vm11288_vm1 }
 0x440   : > { %v4990_v32 = vadd.f32 %v10595_v18, %v4989_v3  ;;  %v4991_v40 = vpop.f32.mrb[3].mxu1  ;;  %v4776_v58 = vsel %vm11294_vm11, %v4758_v9, %v4555_v59  ;;  %vm11304_vm1 = vmmov %vm11289_vm0 }
 0x441   : > { %vm11305_vm0 = vmmov %vm11291_vm12 }
 0x442   : > { %v4579_v15 = vpop.permute.xlu0 %4578  ;;  %5049 = vst.msk [vmem:[%s10605_s28 + $0x30] sm:$0xff] %vm11291_vm12, %v4990_v32  ;;  %vm11306_vm14 = vmmov %vm11305_vm0 }
 0x443   : > { %v4390_v26 = vpop.permute.xlu1 %4389  ;;  %v4788_v0 = vsel %vm11301_vm2, %v4770_v50, %v4579_v15  ;;  %vm11307_vm12 = vmmov %vm11305_vm0 }
 0x444   : > { %v4735_v4 = vsel %vm11298_vm10, %v4717_v48, %v4390_v26  ;;  %vm11308_vm13 = vmmov %vm11305_vm0 }
 0x445   : > { %v4753_v33 = vsel %vm11304_vm1, %v4735_v4, %v4458_v19  ;;  %vm11309_vm4 = vmmov %vm11305_vm0 }
 0x446   : > { %v4623_v36 = vpop.permute.xlu0 %4622  ;;  %vm11310_vm11 = vmmov %vm11305_vm0 }
 0x447   : > { %v4794_v13 = vsel %vm11295_vm3, %v4776_v58, %v4623_v36  ;;  %v4647_v5 = vpop.permute.xlu1 %4646  ;;  %vm11311_vm3 = vmmov %vm11305_vm0 }
 0x448   : > { %5238 = vmatprep.mubr.msk.f32.mxu0 %vm11299_vm15, %v4794_v13  ;;  %v4806_v22 = vsel %vm11302_vm5, %v4788_v0, %v4647_v5  ;;  %vm11312_vm7 = vmmov %vm11305_vm0 }
 0x449   : > { %4978 = vmatmul.mubr.f32.gmra.mrb[44].mxu0 %v4741_v16  ;;  %5250 = vmatprep.mubr.msk.f32.mxu1 %vm11303_vm9, %v4806_v22  ;;  %vm11313_vm8 = vmmov %vm11305_vm0  ;;  %vm5059_vm9 = vcmask 62464  }
 0x44a   : > { %5038 = vmatmul.mubr.f32.gmra.mrb[22].mxu1 %v4753_v33  ;;  %vm11314_vm10 = vmmov %vm11305_vm0 }
 0x44b   : > { %vm11315_vm15 = vmmov %vm11305_vm0 }
 0x44c   : > { %vm11316_vm6 = vmmov %vm11305_vm0 }
 0x44d   : > { %vm11317_vm2 = vmmov %vm11305_vm0 }
 0x44e   : > { %vm11318_vm5 = vmmov %vm11305_vm0 }
 0x455   : > { %v4994_v43 = vpop.f32.mrb[4].mxu1 }
 0x456   : > { %v4995_v31 = vadd.f32 %v10595_v18, %v4994_v43  ;;  %v4996_v14 = vpop.f32.mrb[5].mxu1 }
 0x458   : > { %5050 = vst.msk [vmem:[%s10605_s28 + $0x38] sm:$0xff] %vm11305_vm0, %v4995_v31 }
 0x466   : > { %v4999_v52 = vpop.f32.mrb[6].mxu1 }
 0x467   : > { %v5000_v44 = vadd.f32 %v10595_v18, %v4999_v52  ;;  %v5001_v1 = vpop.f32.mrb[7].mxu1 }
 0x469   : > { %5051 = vst.msk [vmem:[%s10605_s28 + $0x40] sm:$0xff] %vm11306_vm14, %v5000_v44 }
 0x47d   : > { %v5004_v8 = vpop.f32.mrb[8].mxu1 }
 0x47e   : > { %v5005_v20 = vadd.f32 %v10595_v18, %v5004_v8  ;;  %v5006_v41 = vpop.f32.mrb[9].mxu1 }
 0x480   : > { %5052 = vst.msk [vmem:[%s10605_s28 + $0x48] sm:$0xff] %vm11307_vm12, %v5005_v20 }
 0x48d   : > { %v5009_v27 = vpop.f32.mrb[10].mxu1 }
 0x48e   : > { %v5010_v7 = vadd.f32 %v10595_v18, %v5009_v27  ;;  %v5011_v11 = vpop.f32.mrb[11].mxu1 }
 0x490   : > { %5053 = vst.msk [vmem:[%s10605_s28 + $0x50] sm:$0xff] %vm11308_vm13, %v5010_v7 }
 0x4a4   : > { %v5014_v57 = vpop.f32.mrb[12].mxu1 }
 0x4a5   : > { %v5015_v2 = vadd.f32 %v10595_v18, %v5014_v57  ;;  %v5016_v35 = vpop.f32.mrb[13].mxu1 }
 0x4a7   : > { %5054 = vst.msk [vmem:[%s10605_s28 + $0x58] sm:$0xff] %vm11309_vm4, %v5015_v2 }
 0x4b9   : > { %v4959_v23 = vpop.f32.mrb[36].mxu0 }
 0x4ba   : > { %v4960_v49 = vadd.f32 %v10595_v18, %v4959_v23  ;;  %v4961_v17 = vpop.f32.mrb[37].mxu0 }
 0x4bc   : > { %5043 = vst.msk [vmem:[%s10605_s28] sm:$0xff] %vm11310_vm11, %v4960_v49  ;;  %v5019_v42 = vpop.f32.mrb[14].mxu1 }
 0x4bd   : > { %v5020_v28 = vadd.f32 %v10595_v18, %v5019_v42  ;;  %v5021_v24 = vpop.f32.mrb[15].mxu1 }
 0x4bf   : > { %5055 = vst.msk [vmem:[%s10605_s28 + $0x60] sm:$0xff] %vm11311_vm3, %v5020_v28 }
 0x4d1   : > { %v4964_v53 = vpop.f32.mrb[38].mxu0 }
 0x4d2   : > { %v4965_v62 = vadd.f32 %v10595_v18, %v4964_v53  ;;  %v4966_v61 = vpop.f32.mrb[39].mxu0 }
 0x4d4   : > { %5044 = vst.msk [vmem:[%s10605_s28 + $0x8] sm:$0xff] %vm11312_vm7, %v4965_v62  ;;  %v5024_v34 = vpop.f32.mrb[16].mxu1 }
 0x4d5   : > { %v5025_v45 = vadd.f32 %v10595_v18, %v5024_v34  ;;  %v5026_v25 = vpop.f32.mrb[17].mxu1 }
 0x4d7   : > { %5056 = vst.msk [vmem:[%s10605_s28 + $0x68] sm:$0xff] %vm11313_vm8, %v5025_v45 }
 0x4ec   : > { %v4969_v60 = vpop.f32.mrb[40].mxu0  ;;  %v5029_v51 = vpop.f32.mrb[18].mxu1 }
 0x4ed   : > { %v4970_v29 = vadd.f32 %v10595_v18, %v4969_v60  ;;  %v4971_v19 = vpop.f32.mrb[41].mxu0  ;;  %v5030_v46 = vadd.f32 %v10595_v18, %v5029_v51  ;;  %v5031_v10 = vpop.f32.mrb[19].mxu1 }
 0x4ef   : > { %5045 = vst.msk [vmem:[%s10605_s28 + $0x10] sm:$0xff] %vm11314_vm10, %v4970_v29 }
 0x4f0   : > { %5057 = vst.msk [vmem:[%s10605_s28 + $0x70] sm:$0xff] %vm11315_vm15, %v5030_v46 }
 0x504   : > { %v4974_v56 = vpop.f32.mrb[42].mxu0  ;;  %v5034_v59 = vpop.f32.mrb[20].mxu1 }
 0x505   : > { %v4975_v30 = vadd.f32 %v10595_v18, %v4974_v56  ;;  %v4976_v3 = vpop.f32.mrb[43].mxu0  ;;  %v5035_v63 = vadd.f32 %v10595_v18, %v5034_v59  ;;  %v5036_v32 = vpop.f32.mrb[21].mxu1 }
 0x507   : > { %5046 = vst.msk [vmem:[%s10605_s28 + $0x18] sm:$0xff] %vm11316_vm6, %v4975_v30 }
 0x508   : > { %5058 = vst.msk [vmem:[%s10605_s28 + $0x78] sm:$0xff] %vm11317_vm2, %v5035_v63 }
 0x51c   : > { %v4979_v40 = vpop.f32.mrb[44].mxu0 }
 0x51d   : > { %v4980_v15 = vadd.f32 %v10595_v18, %v4979_v40  ;;  %v4981_v39 = vpop.f32.mrb[45].mxu0  ;;  %v5039_v54 = vpop.f32.mrb[22].mxu1 }
 0x51e   : > { %v5040_v38 = vadd.f32 %v10595_v18, %v5039_v54  ;;  %v5041_v12 = vpop.f32.mrb[23].mxu1 }
 0x51f   : > { %5047 = vst.msk [vmem:[%s10605_s28 + $0x20] sm:$0xff] %vm11318_vm5, %v4980_v15 }
 0x520   : > { %5060 = vst.msk [vmem:[%s10605_s28 + $0x80] sm:$0x3f] %vm5059_vm9, %v5040_v38 }
 0x521 PF: > { %s15_s18 = sadd.s32 1, %s5773_s18  }
 0x522   : > { %p12_p5 = scmp.ge.s32.totalorder %s15_s18, 4  }
 0x524   :  { %14 = sbr.rel (!%p12_p5) target bundleno = 1 (0x1), region = 190 }

</bundles_post_ra>
